<compile_context>
chip_gen: v5e
topology: v5e:2x2
jax: 0.10.0
libtpu: 0.0.40
codegen_flags: <defaults>
</compile_context>

<pallas_src>
import jax
import jax.numpy as jnp
from jax.experimental import pallas as pl
from jax.experimental.pallas import tpu as pltpu

C1 = 16          # conv1 out channels
C2 = 32          # conv2 out channels
FC_HIDDEN = 64   # fc_conv out features
CT_HIDDEN = 16   # fc_constants / fc_time out features
TIME_FEATS = 6


def _rup(n, m):
    return -(-n // m) * m


def _pad16(n):
    return _rup(n, 16)


def _vmem_bytes(tb, L, nct, lbl, wslab_shape, w_itemsize, bcols):
    """Approximate per-grid-step VMEM footprint (128-lane / 8-sublane padded)."""
    L2 = L // 2

    def buf(r, c, itemsize=4):
        return _rup(r, 8) * _rup(c, 128) * itemsize

    total = 2 * (buf(tb, L + 2) + buf(tb, nct) + buf(tb, lbl)            # double-buffered blocks
                 + buf(wslab_shape[0], wslab_shape[1], w_itemsize) + buf(8, bcols))
    total += buf((L2 + 2) * tb, C1) + buf(L2 * tb, C2)                   # scratch
    return total


def _pick_block_b(B, footprint_fn, budget=40 << 20, max_tb=64):
    """Largest 8-aligned divisor of B that fits VMEM and gives >=2-4 grid steps."""
    cands = [d for d in range(8, min(B, max_tb) + 1, 8) if B % d == 0]
    if not cands:
        return B                                  # tiny / odd batch: single step fallback
    fitting = [tb for tb in cands if footprint_fn(tb) <= budget] or [min(cands)]
    for min_steps in (4, 2):                      # prefer 4 steps, then 2 (v7x megacore)
        good = [tb for tb in fitting if B // tb >= min_steps]
        if good:
            return max(good)
    return max(fitting)


def tempcnn_forward(x, constants, time, params, *,
                    matmul_dtype=jnp.bfloat16, block_b=None):
    """x: (B, 1, L) PyTorch-style input; constants: (B, NC) (NC may be 0); time: (B, 6)."""
    (w1, b1, w2, b2, wfc, bfc, wc, bc, wt, bt, wcmb, bcmb) = params
    f32 = jnp.float32

    xs = jnp.squeeze(x, axis=1)                                    # (B, L)
    B, L = xs.shape
    assert L % 4 == 0
    L2, L4 = L // 2, L // 4
    NC = constants.shape[1]
    NCT = NC + TIME_FEATS if NC > 0 else TIME_FEATS
    CT_OUT = 2 * CT_HIDDEN if NC > 0 else CT_HIDDEN
    LBL = wcmb.shape[0]
    assert wcmb.shape[1] == FC_HIDDEN + CT_OUT
    assert wfc.shape == (FC_HIDDEN, C2 * L4)

    # ---- inputs: lane-dense, no im2col (conv zero-pad baked into 2 extra lanes) ----
    x_pad = jnp.pad(xs.astype(f32), ((0, 0), (1, 1)))              # (B, L+2)
    if NC > 0:
        ct_in = jnp.concatenate([constants, time], axis=1).astype(f32)   # (B, NC+6)
    else:
        ct_in = time.astype(f32)                                          # (B, 6)

    # ---- kernel-layout weights, packed into one row-aligned slab -------------------
    w1m = jnp.transpose(w1[:, 0, :], (1, 0))                              # (3, 16)
    w2m = jnp.concatenate([w2[:, :, k].T for k in range(3)], axis=0)      # (48, 32) tap-major
    # torch flatten index is c*L4 + l; kernel feat accumulation is position-major.
    wfcm = wfc.reshape(FC_HIDDEN, C2, L4).transpose(2, 1, 0).reshape(L4 * C2, FC_HIDDEN)
    if NC > 0:
        wctm = jnp.zeros((NCT, CT_OUT), f32)
        wctm = wctm.at[:NC, :CT_HIDDEN].set(wc.T)
        wctm = wctm.at[NC:, CT_HIDDEN:].set(wt.T)                         # block-diag fc_c / fc_t
        bct = jnp.concatenate([bc, bt])
    else:
        wctm = wt.T                                                        # time-only head
        bct = bt
    wcmbm = wcmb.T                                                         # (64 + CT_OUT, LBL)

    blocks = [("w1", w1m), ("w2", w2m), ("wfc", wfcm), ("wct", wctm), ("wcmb", wcmbm)]
    slab_cols = max(blk.shape[1] for _, blk in blocks)
    offs, rows = {}, 0
    for name, blk in blocks:
        offs[name] = (rows, blk.shape[0], blk.shape[1])
        rows += _pad16(blk.shape[0])
    wslab = jnp.zeros((rows, slab_cols), f32)
    for name, blk in blocks:
        r0, nr, nc = offs[name]
        wslab = wslab.at[r0:r0 + nr, :nc].set(blk.astype(f32))
    wslab = wslab.astype(matmul_dtype)

    brows = [b1, b2, bfc, bct, bcmb]                                       # biases stay f32
    bcols = max(bb.shape[0] for bb in brows)
    bslab = jnp.zeros((8, bcols), f32)
    for i, bb in enumerate(brows):
        bslab = bslab.at[i, :bb.shape[0]].set(bb.astype(f32))

    # ---- batch tile: multiple grid steps for pipelining / v7x megacore -------------
    w_isz = jnp.dtype(matmul_dtype).itemsize
    fp_fn = lambda tb: _vmem_bytes(tb, L, NCT, LBL, wslab.shape, w_isz, bcols)
    TB = _pick_block_b(B, fp_fn) if block_b is None else block_b
    assert B % TB == 0 and (TB == B or TB % 8 == 0)
    grid = (B // TB,)
    vmem_limit = int(min(60 << 20, max(32 << 20, 2 * fp_fn(TB) + (4 << 20))))

    def kernel(x_ref, ct_ref, w_ref, b_ref, out_ref, p1_sc, g_sc):
        def mm(a, w):                          # bf16/f32 operands, f32 MXU accumulation
            return jnp.dot(a.astype(w.dtype), w, preferred_element_type=f32)

        b1k = b_ref[0:1, 0:C1]
        b2k = b_ref[1:2, 0:C2]
        bfck = b_ref[2:3, 0:FC_HIDDEN]
        bctk = b_ref[3:4, 0:CT_OUT]
        bcmbk = b_ref[4:5, 0:LBL]

        r1 = offs["w1"][0]
        r2 = offs["w2"][0]
        rf = offs["wfc"][0]
        rc = offs["wct"][0]
        ro = offs["wcmb"][0]

        w1k = w_ref[r1:r1 + 3, 0:C1]                                  # (3, 16)

        # Explicitly zero the conv2 halo blocks every step (no uninitialized reads,
        # and safe under per-core scratch with a parallel grid).
        zpad = jnp.zeros((TB, C1), f32)
        p1_sc[0:TB, :] = zpad
        p1_sc[(L2 + 1) * TB:(L2 + 2) * TB, :] = zpad

        # ---- conv1 + ReLU + maxpool1 fused; rows of p1_sc are position-major -------
        # row of pooled position l2, batch b  ==  (1 + l2) * TB + b
        for l2 in range(L2):
            he = mm(x_ref[:, 2 * l2:2 * l2 + 3], w1k)                # conv1 @ pos 2*l2
            ho = mm(x_ref[:, 2 * l2 + 1:2 * l2 + 4], w1k)            # conv1 @ pos 2*l2+1
            p1_sc[(1 + l2) * TB:(2 + l2) * TB, :] = (
                jnp.maximum(jnp.maximum(he, ho) + b1k, 0.0))

        # ---- conv2 + ReLU: split-K over the 3 taps (contiguous shifted blocks) -----
        prv = p1_sc[0:L2 * TB, :]                                     # p1[l2 - 1]
        cur = p1_sc[TB:(L2 + 1) * TB, :]                              # p1[l2]
        nxt = p1_sc[2 * TB:(L2 + 2) * TB, :]                          # p1[l2 + 1]
        g = mm(prv, w_ref[r2:r2 + C1, 0:C2])
        g = g + mm(cur, w_ref[r2 + C1:r2 + 2 * C1, 0:C2])
        g = g + mm(nxt, w_ref[r2 + 2 * C1:r2 + 3 * C1, 0:C2])
        g_sc[...] = jnp.maximum(g + b2k, 0.0)                         # (L2*TB, 32)

        # ---- maxpool2 fused with fc_conv: L4 partial K=32 matmuls (no concat) ------
        acc = jnp.zeros((TB, FC_HIDDEN), f32)
        for l4 in range(L4):
            pooled = jnp.maximum(g_sc[(2 * l4) * TB:(2 * l4 + 1) * TB, :],
                                 g_sc[(2 * l4 + 1) * TB:(2 * l4 + 2) * TB, :])
            acc = acc + mm(pooled, w_ref[rf + l4 * C2:rf + (l4 + 1) * C2, 0:FC_HIDDEN])
        feat = jnp.maximum(acc + bfck, 0.0)                           # (TB, 64)

        # ---- fc_constants & fc_time: one block-diagonal matmul ---------------------
        ctf = jnp.maximum(mm(ct_ref[...], w_ref[rc:rc + NCT, 0:CT_OUT]) + bctk, 0.0)

        # ---- fc_combined: split-K over (feat | ctf), no activation concat ----------
        out = mm(feat, w_ref[ro:ro + FC_HIDDEN, 0:LBL])
        out = out + mm(ctf, w_ref[ro + FC_HIDDEN:ro + FC_HIDDEN + CT_OUT, 0:LBL])
        out_ref[...] = (out + bcmbk).astype(out_ref.dtype)

    grid_spec = pltpu.PrefetchScalarGridSpec(
        num_scalar_prefetch=0,
        grid=grid,
        in_specs=[
            pl.BlockSpec((TB, L + 2), lambda i: (i, 0)),     # padded raw x
            pl.BlockSpec((TB, NCT), lambda i: (i, 0)),       # constants | time
            pl.BlockSpec(wslab.shape, lambda i: (0, 0)),     # packed weight slab
            pl.BlockSpec(bslab.shape, lambda i: (0, 0)),     # packed bias slab
        ],
        out_specs=pl.BlockSpec((TB, LBL), lambda i: (i, 0)),
        scratch_shapes=[
            pltpu.VMEM(((L2 + 2) * TB, C1), f32),   # pooled conv1 acts + zero halo blocks
            pltpu.VMEM((L2 * TB, C2), f32),         # conv2 acts
        ],
    )

    return pl.pallas_call(
        kernel,
        out_shape=jax.ShapeDtypeStruct((B, LBL), f32),
        grid_spec=grid_spec,
        compiler_params=pltpu.CompilerParams(
            dimension_semantics=("parallel",),
            vmem_limit_bytes=vmem_limit,
        ),
    )(x_pad, ct_in, wslab, bslab)


def torch_reference(x, constants, time, params):
    """Plain-JAX mirror of the PyTorch forward (NCL layout), for verification."""
    (w1, b1, w2, b2, wfc, bfc, wc, bc, wt, bt, wcmb, bcmb) = params
    xs = jnp.squeeze(x, axis=1)    # (B, L)
    h = xs[:, None, :]             # (B, 1, L)

    def conv1d(h, w, b):           # w: (Cout, Cin, 3), pad=1
        Lc = h.shape[2]
        hp = jnp.pad(h, ((0, 0), (0, 0), (1, 1)))
        out = jnp.zeros((h.shape[0], w.shape[0], Lc), jnp.float32)
        for k in range(3):
            out = out + jnp.einsum('bci,oc->boi', hp[:, :, k:k + Lc], w[:, :, k])
        return out + b[None, :, None]

    def pool(h):
        Bc, C, Lc = h.shape
        return jnp.max(h.reshape(Bc, C, Lc // 2, 2), axis=3)

    h = pool(jax.nn.relu(conv1d(h, w1, b1)))
    h = pool(jax.nn.relu(conv1d(h, w2, b2)))
    hf = h.reshape(h.shape[0], -1)                       # channel-major flatten
    feat = jax.nn.relu(hf @ wfc.T + bfc)
    tf_ = jax.nn.relu(time @ wt.T + bt)
    if constants.shape[1] > 0:
        cf = jax.nn.relu(constants @ wc.T + bc)
        comb = jnp.concatenate([feat, cf, tf_], axis=1)
    else:
        comb = jnp.concatenate([feat, tf_], axis=1)
    return comb @ wcmb.T + bcmb


if __name__ == "__main__":
    jax.config.update("jax_default_matmul_precision", "highest")

    B, SEQ, NC, LBL = 32, 16, 4, 8          # seq_length=16, num_constants=4, label_length=8
    CONV_OUT = C2 * (SEQ // 2 // 2)         # 128

    key = jax.random.PRNGKey(0)
    keys = jax.random.split(key, 20)

    def p(k, shape):
        return jax.random.normal(k, shape, jnp.float32) * 0.1

    # Deterministic synthetic parameters in PyTorch layouts.
    w1, b1 = p(keys[0], (C1, 1, 3)), p(keys[1], (C1,))
    w2, b2 = p(keys[2], (C2, C1, 3)), p(keys[3], (C2,))
    wfc, bfc = p(keys[4], (FC_HIDDEN, CONV_OUT)), p(keys[5], (FC_HIDDEN,))
    wc, bc = p(keys[6], (CT_HIDDEN, NC)), p(keys[7], (CT_HIDDEN,))
    wt, bt = p(keys[8], (CT_HIDDEN, TIME_FEATS)), p(keys[9], (CT_HIDDEN,))
    wcmb, bcmb = p(keys[10], (LBL, FC_HIDDEN + 2 * CT_HIDDEN)), p(keys[11], (LBL,))
    params = (w1, b1, w2, b2, wfc, bfc, wc, bc, wt, bt, wcmb, bcmb)

    x = jax.random.normal(keys[12], (B, 1, SEQ), jnp.float32)
    constants = jax.random.normal(keys[13], (B, NC), jnp.float32)
    t = jax.random.normal(keys[14], (B, TIME_FEATS), jnp.float32)

    ref = torch_reference(x, constants, t, params)

    # f32 matmul operands: tight correctness check (B=32 -> TB=8 -> 4 pipelined grid steps).
    out_f32 = jax.block_until_ready(
        tempcnn_forward(x, constants, t, params, matmul_dtype=jnp.float32))
    assert out_f32.shape == (B, LBL), out_f32.shape
    err = float(jnp.max(jnp.abs(out_f32 - ref)))
    assert jnp.allclose(out_f32, ref, atol=2e-3, rtol=2e-3), f"f32 max abs err {err}"

    # Default mode: bf16 matmul operands, f32 accumulation (v6e / v7x fast path).
    out_bf16 = jax.block_until_ready(tempcnn_forward(x, constants, t, params))
    err_bf16 = float(jnp.max(jnp.abs(out_bf16 - ref)))
    assert jnp.allclose(out_bf16, ref, atol=5e-2, rtol=5e-2), f"bf16 max abs err {err_bf16}"

    # num_constants == 0 configuration (80-wide combined head), previously a TODO.
    B0 = 16
    wcmb0, bcmb0 = p(keys[15], (LBL, FC_HIDDEN + CT_HIDDEN)), p(keys[16], (LBL,))
    params0 = (w1, b1, w2, b2, wfc, bfc, None, None, wt, bt, wcmb0, bcmb0)
    x0 = jax.random.normal(keys[17], (B0, 1, SEQ), jnp.float32)
    c0 = jnp.zeros((B0, 0), jnp.float32)
    t0 = jax.random.normal(keys[18], (B0, TIME_FEATS), jnp.float32)
    ref0 = torch_reference(x0, c0, t0, params0)
    out0 = jax.block_until_ready(
        tempcnn_forward(x0, c0, t0, params0, matmul_dtype=jnp.float32))
    err0 = float(jnp.max(jnp.abs(out0 - ref0)))
    assert jnp.allclose(out0, ref0, atol=2e-3, rtol=2e-3), f"NC=0 max abs err {err0}"

    print("KERNEL_OK")
</pallas_src>

<mosaic_0001>
module attributes {stable_mosaic.version = 11 : i64} {
  func.func @kernel(%arg0: i32, %arg1: memref<8x18xf32, #tpu.memory_space<vmem>>, %arg2: memref<8x10xf32, #tpu.memory_space<vmem>>, %arg3: memref<304x64xf32, #tpu.memory_space<vmem>>, %arg4: memref<8x64xf32, #tpu.memory_space<vmem>>, %arg5: memref<8x8xf32, #tpu.memory_space<vmem>>, %arg6: memref<80x16xf32, #tpu.memory_space<vmem>>, %arg7: memref<64x32xf32, #tpu.memory_space<vmem>>) attributes {dimension_semantics = [#tpu.dimension_semantics<parallel>], iteration_bounds = array<i64: 4>, scalar_prefetch = 0 : i64, scratch_operands = 2 : i64, tpu.core_type = #tpu.core_type<tc>, window_params = [{transform_indices = @transform_0, window_bounds = array<i64: 8, 18>}, {transform_indices = @transform_1, window_bounds = array<i64: 8, 10>}, {pipeline_mode = #tpu.pipeline_mode<synchronous>, transform_indices = @transform_2, window_bounds = array<i64: 304, 64>}, {pipeline_mode = #tpu.pipeline_mode<synchronous>, transform_indices = @transform_3, window_bounds = array<i64: 8, 64>}, {transform_indices = @transform_4, window_bounds = array<i64: 8, 8>}]} {
    %c0 = arith.constant 0 : index
    %c0_0 = arith.constant 0 : index
    %0 = vector.load %arg4[%c0, %c0_0] : memref<8x64xf32, #tpu.memory_space<vmem>>, vector<1x16xf32>
    %c1 = arith.constant 1 : index
    %c0_1 = arith.constant 0 : index
    %1 = vector.load %arg4[%c1, %c0_1] : memref<8x64xf32, #tpu.memory_space<vmem>>, vector<1x32xf32>
    %c2 = arith.constant 2 : index
    %c0_2 = arith.constant 0 : index
    %2 = vector.load %arg4[%c2, %c0_2] : memref<8x64xf32, #tpu.memory_space<vmem>>, vector<1x64xf32>
    %c3 = arith.constant 3 : index
    %c0_3 = arith.constant 0 : index
    %3 = vector.load %arg4[%c3, %c0_3] : memref<8x64xf32, #tpu.memory_space<vmem>>, vector<1x32xf32>
    %c4 = arith.constant 4 : index
    %c0_4 = arith.constant 0 : index
    %4 = vector.load %arg4[%c4, %c0_4] : memref<8x64xf32, #tpu.memory_space<vmem>>, vector<1x8xf32>
    %c0_5 = arith.constant 0 : index
    %c0_6 = arith.constant 0 : index
    %5 = vector.load %arg3[%c0_5, %c0_6] : memref<304x64xf32, #tpu.memory_space<vmem>>, vector<3x16xf32>
    %cst = arith.constant 0.000000e+00 : f32
    %6 = vector.broadcast %cst : f32 to vector<8x16xf32>
    %c0_7 = arith.constant 0 : index
    %c0_8 = arith.constant 0 : index
    %7 = vector.load %arg6[%c0_7, %c0_8] : memref<80x16xf32, #tpu.memory_space<vmem>>, vector<8x16xf32>
    tpu.vector_store %arg6[%c0_7, %c0_8], %6 {strides = array<i32>} : memref<80x16xf32, #tpu.memory_space<vmem>>, vector<8x16xf32>,
    %c72 = arith.constant 72 : index
    %c0_9 = arith.constant 0 : index
    %8 = vector.load %arg6[%c72, %c0_9] : memref<80x16xf32, #tpu.memory_space<vmem>>, vector<8x16xf32>
    tpu.vector_store %arg6[%c72, %c0_9], %6 {strides = array<i32>} : memref<80x16xf32, #tpu.memory_space<vmem>>, vector<8x16xf32>,
    %c0_10 = arith.constant 0 : index
    %c0_11 = arith.constant 0 : index
    %9 = vector.load %arg1[%c0_10, %c0_11] : memref<8x18xf32, #tpu.memory_space<vmem>>, vector<8x3xf32>
    %cst_12 = arith.constant dense<0.000000e+00> : vector<8x16xf32>
    %10 = tpu.matmul %9, %5, %cst_12 {dimension_numbers = #tpu.dot_dimension_numbers<[1], [0], [0], [1], [0, 0, 1, 1], [], []>, precision = #tpu.contract_precision<fp32>} : vector<8x3xf32>, vector<3x16xf32>, vector<8x16xf32> -> vector<8x16xf32>
    %c0_13 = arith.constant 0 : index
    %c1_14 = arith.constant 1 : index
    %11 = vector.load %arg1[%c0_13, %c1_14] : memref<8x18xf32, #tpu.memory_space<vmem>>, vector<8x3xf32>
    %cst_15 = arith.constant dense<0.000000e+00> : vector<8x16xf32>
    %12 = tpu.matmul %11, %5, %cst_15 {dimension_numbers = #tpu.dot_dimension_numbers<[1], [0], [0], [1], [0, 0, 1, 1], [], []>, precision = #tpu.contract_precision<fp32>} : vector<8x3xf32>, vector<3x16xf32>, vector<8x16xf32> -> vector<8x16xf32>
    %13 = arith.maximumf %10, %12 : vector<8x16xf32>
    %14 = vector.broadcast %0 : vector<1x16xf32> to vector<8x16xf32>
    %15 = arith.addf %13, %14 : vector<8x16xf32>
    %cst_16 = arith.constant 0.000000e+00 : f32
    %16 = vector.broadcast %cst_16 : f32 to vector<8x16xf32>
    %17 = arith.maximumf %15, %16 : vector<8x16xf32>
    %c8 = arith.constant 8 : index
    %c0_17 = arith.constant 0 : index
    %18 = vector.load %arg6[%c8, %c0_17] : memref<80x16xf32, #tpu.memory_space<vmem>>, vector<8x16xf32>
    tpu.vector_store %arg6[%c8, %c0_17], %17 {strides = array<i32>} : memref<80x16xf32, #tpu.memory_space<vmem>>, vector<8x16xf32>,
    %c0_18 = arith.constant 0 : index
    %c2_19 = arith.constant 2 : index
    %19 = vector.load %arg1[%c0_18, %c2_19] : memref<8x18xf32, #tpu.memory_space<vmem>>, vector<8x3xf32>
    %cst_20 = arith.constant dense<0.000000e+00> : vector<8x16xf32>
    %20 = tpu.matmul %19, %5, %cst_20 {dimension_numbers = #tpu.dot_dimension_numbers<[1], [0], [0], [1], [0, 0, 1, 1], [], []>, precision = #tpu.contract_precision<fp32>} : vector<8x3xf32>, vector<3x16xf32>, vector<8x16xf32> -> vector<8x16xf32>
    %c0_21 = arith.constant 0 : index
    %c3_22 = arith.constant 3 : index
    %21 = vector.load %arg1[%c0_21, %c3_22] : memref<8x18xf32, #tpu.memory_space<vmem>>, vector<8x3xf32>
    %cst_23 = arith.constant dense<0.000000e+00> : vector<8x16xf32>
    %22 = tpu.matmul %21, %5, %cst_23 {dimension_numbers = #tpu.dot_dimension_numbers<[1], [0], [0], [1], [0, 0, 1, 1], [], []>, precision = #tpu.contract_precision<fp32>} : vector<8x3xf32>, vector<3x16xf32>, vector<8x16xf32> -> vector<8x16xf32>
    %23 = arith.maximumf %20, %22 : vector<8x16xf32>
    %24 = vector.broadcast %0 : vector<1x16xf32> to vector<8x16xf32>
    %25 = arith.addf %23, %24 : vector<8x16xf32>
    %cst_24 = arith.constant 0.000000e+00 : f32
    %26 = vector.broadcast %cst_24 : f32 to vector<8x16xf32>
    %27 = arith.maximumf %25, %26 : vector<8x16xf32>
    %c16 = arith.constant 16 : index
    %c0_25 = arith.constant 0 : index
    %28 = vector.load %arg6[%c16, %c0_25] : memref<80x16xf32, #tpu.memory_space<vmem>>, vector<8x16xf32>
    tpu.vector_store %arg6[%c16, %c0_25], %27 {strides = array<i32>} : memref<80x16xf32, #tpu.memory_space<vmem>>, vector<8x16xf32>,
    %c0_26 = arith.constant 0 : index
    %c4_27 = arith.constant 4 : index
    %29 = vector.load %arg1[%c0_26, %c4_27] : memref<8x18xf32, #tpu.memory_space<vmem>>, vector<8x3xf32>
    %cst_28 = arith.constant dense<0.000000e+00> : vector<8x16xf32>
    %30 = tpu.matmul %29, %5, %cst_28 {dimension_numbers = #tpu.dot_dimension_numbers<[1], [0], [0], [1], [0, 0, 1, 1], [], []>, precision = #tpu.contract_precision<fp32>} : vector<8x3xf32>, vector<3x16xf32>, vector<8x16xf32> -> vector<8x16xf32>
    %c0_29 = arith.constant 0 : index
    %c5 = arith.constant 5 : index
    %31 = vector.load %arg1[%c0_29, %c5] : memref<8x18xf32, #tpu.memory_space<vmem>>, vector<8x3xf32>
    %cst_30 = arith.constant dense<0.000000e+00> : vector<8x16xf32>
    %32 = tpu.matmul %31, %5, %cst_30 {dimension_numbers = #tpu.dot_dimension_numbers<[1], [0], [0], [1], [0, 0, 1, 1], [], []>, precision = #tpu.contract_precision<fp32>} : vector<8x3xf32>, vector<3x16xf32>, vector<8x16xf32> -> vector<8x16xf32>
    %33 = arith.maximumf %30, %32 : vector<8x16xf32>
    %34 = vector.broadcast %0 : vector<1x16xf32> to vector<8x16xf32>
    %35 = arith.addf %33, %34 : vector<8x16xf32>
    %cst_31 = arith.constant 0.000000e+00 : f32
    %36 = vector.broadcast %cst_31 : f32 to vector<8x16xf32>
    %37 = arith.maximumf %35, %36 : vector<8x16xf32>
    %c24 = arith.constant 24 : index
    %c0_32 = arith.constant 0 : index
    %38 = vector.load %arg6[%c24, %c0_32] : memref<80x16xf32, #tpu.memory_space<vmem>>, vector<8x16xf32>
    tpu.vector_store %arg6[%c24, %c0_32], %37 {strides = array<i32>} : memref<80x16xf32, #tpu.memory_space<vmem>>, vector<8x16xf32>,
    %c0_33 = arith.constant 0 : index
    %c6 = arith.constant 6 : index
    %39 = vector.load %arg1[%c0_33, %c6] : memref<8x18xf32, #tpu.memory_space<vmem>>, vector<8x3xf32>
    %cst_34 = arith.constant dense<0.000000e+00> : vector<8x16xf32>
    %40 = tpu.matmul %39, %5, %cst_34 {dimension_numbers = #tpu.dot_dimension_numbers<[1], [0], [0], [1], [0, 0, 1, 1], [], []>, precision = #tpu.contract_precision<fp32>} : vector<8x3xf32>, vector<3x16xf32>, vector<8x16xf32> -> vector<8x16xf32>
    %c0_35 = arith.constant 0 : index
    %c7 = arith.constant 7 : index
    %41 = vector.load %arg1[%c0_35, %c7] : memref<8x18xf32, #tpu.memory_space<vmem>>, vector<8x3xf32>
    %cst_36 = arith.constant dense<0.000000e+00> : vector<8x16xf32>
    %42 = tpu.matmul %41, %5, %cst_36 {dimension_numbers = #tpu.dot_dimension_numbers<[1], [0], [0], [1], [0, 0, 1, 1], [], []>, precision = #tpu.contract_precision<fp32>} : vector<8x3xf32>, vector<3x16xf32>, vector<8x16xf32> -> vector<8x16xf32>
    %43 = arith.maximumf %40, %42 : vector<8x16xf32>
    %44 = vector.broadcast %0 : vector<1x16xf32> to vector<8x16xf32>
    %45 = arith.addf %43, %44 : vector<8x16xf32>
    %cst_37 = arith.constant 0.000000e+00 : f32
    %46 = vector.broadcast %cst_37 : f32 to vector<8x16xf32>
    %47 = arith.maximumf %45, %46 : vector<8x16xf32>
    %c32 = arith.constant 32 : index
    %c0_38 = arith.constant 0 : index
    %48 = vector.load %arg6[%c32, %c0_38] : memref<80x16xf32, #tpu.memory_space<vmem>>, vector<8x16xf32>
    tpu.vector_store %arg6[%c32, %c0_38], %47 {strides = array<i32>} : memref<80x16xf32, #tpu.memory_space<vmem>>, vector<8x16xf32>,
    %c0_39 = arith.constant 0 : index
    %c8_40 = arith.constant 8 : index
    %49 = vector.load %arg1[%c0_39, %c8_40] : memref<8x18xf32, #tpu.memory_space<vmem>>, vector<8x3xf32>
    %cst_41 = arith.constant dense<0.000000e+00> : vector<8x16xf32>
    %50 = tpu.matmul %49, %5, %cst_41 {dimension_numbers = #tpu.dot_dimension_numbers<[1], [0], [0], [1], [0, 0, 1, 1], [], []>, precision = #tpu.contract_precision<fp32>} : vector<8x3xf32>, vector<3x16xf32>, vector<8x16xf32> -> vector<8x16xf32>
    %c0_42 = arith.constant 0 : index
    %c9 = arith.constant 9 : index
    %51 = vector.load %arg1[%c0_42, %c9] : memref<8x18xf32, #tpu.memory_space<vmem>>, vector<8x3xf32>
    %cst_43 = arith.constant dense<0.000000e+00> : vector<8x16xf32>
    %52 = tpu.matmul %51, %5, %cst_43 {dimension_numbers = #tpu.dot_dimension_numbers<[1], [0], [0], [1], [0, 0, 1, 1], [], []>, precision = #tpu.contract_precision<fp32>} : vector<8x3xf32>, vector<3x16xf32>, vector<8x16xf32> -> vector<8x16xf32>
    %53 = arith.maximumf %50, %52 : vector<8x16xf32>
    %54 = vector.broadcast %0 : vector<1x16xf32> to vector<8x16xf32>
    %55 = arith.addf %53, %54 : vector<8x16xf32>
    %cst_44 = arith.constant 0.000000e+00 : f32
    %56 = vector.broadcast %cst_44 : f32 to vector<8x16xf32>
    %57 = arith.maximumf %55, %56 : vector<8x16xf32>
    %c40 = arith.constant 40 : index
    %c0_45 = arith.constant 0 : index
    %58 = vector.load %arg6[%c40, %c0_45] : memref<80x16xf32, #tpu.memory_space<vmem>>, vector<8x16xf32>
    tpu.vector_store %arg6[%c40, %c0_45], %57 {strides = array<i32>} : memref<80x16xf32, #tpu.memory_space<vmem>>, vector<8x16xf32>,
    %c0_46 = arith.constant 0 : index
    %c10 = arith.constant 10 : index
    %59 = vector.load %arg1[%c0_46, %c10] : memref<8x18xf32, #tpu.memory_space<vmem>>, vector<8x3xf32>
    %cst_47 = arith.constant dense<0.000000e+00> : vector<8x16xf32>
    %60 = tpu.matmul %59, %5, %cst_47 {dimension_numbers = #tpu.dot_dimension_numbers<[1], [0], [0], [1], [0, 0, 1, 1], [], []>, precision = #tpu.contract_precision<fp32>} : vector<8x3xf32>, vector<3x16xf32>, vector<8x16xf32> -> vector<8x16xf32>
    %c0_48 = arith.constant 0 : index
    %c11 = arith.constant 11 : index
    %61 = vector.load %arg1[%c0_48, %c11] : memref<8x18xf32, #tpu.memory_space<vmem>>, vector<8x3xf32>
    %cst_49 = arith.constant dense<0.000000e+00> : vector<8x16xf32>
    %62 = tpu.matmul %61, %5, %cst_49 {dimension_numbers = #tpu.dot_dimension_numbers<[1], [0], [0], [1], [0, 0, 1, 1], [], []>, precision = #tpu.contract_precision<fp32>} : vector<8x3xf32>, vector<3x16xf32>, vector<8x16xf32> -> vector<8x16xf32>
    %63 = arith.maximumf %60, %62 : vector<8x16xf32>
    %64 = vector.broadcast %0 : vector<1x16xf32> to vector<8x16xf32>
    %65 = arith.addf %63, %64 : vector<8x16xf32>
    %cst_50 = arith.constant 0.000000e+00 : f32
    %66 = vector.broadcast %cst_50 : f32 to vector<8x16xf32>
    %67 = arith.maximumf %65, %66 : vector<8x16xf32>
    %c48 = arith.constant 48 : index
    %c0_51 = arith.constant 0 : index
    %68 = vector.load %arg6[%c48, %c0_51] : memref<80x16xf32, #tpu.memory_space<vmem>>, vector<8x16xf32>
    tpu.vector_store %arg6[%c48, %c0_51], %67 {strides = array<i32>} : memref<80x16xf32, #tpu.memory_space<vmem>>, vector<8x16xf32>,
    %c0_52 = arith.constant 0 : index
    %c12 = arith.constant 12 : index
    %69 = vector.load %arg1[%c0_52, %c12] : memref<8x18xf32, #tpu.memory_space<vmem>>, vector<8x3xf32>
    %cst_53 = arith.constant dense<0.000000e+00> : vector<8x16xf32>
    %70 = tpu.matmul %69, %5, %cst_53 {dimension_numbers = #tpu.dot_dimension_numbers<[1], [0], [0], [1], [0, 0, 1, 1], [], []>, precision = #tpu.contract_precision<fp32>} : vector<8x3xf32>, vector<3x16xf32>, vector<8x16xf32> -> vector<8x16xf32>
    %c0_54 = arith.constant 0 : index
    %c13 = arith.constant 13 : index
    %71 = vector.load %arg1[%c0_54, %c13] : memref<8x18xf32, #tpu.memory_space<vmem>>, vector<8x3xf32>
    %cst_55 = arith.constant dense<0.000000e+00> : vector<8x16xf32>
    %72 = tpu.matmul %71, %5, %cst_55 {dimension_numbers = #tpu.dot_dimension_numbers<[1], [0], [0], [1], [0, 0, 1, 1], [], []>, precision = #tpu.contract_precision<fp32>} : vector<8x3xf32>, vector<3x16xf32>, vector<8x16xf32> -> vector<8x16xf32>
    %73 = arith.maximumf %70, %72 : vector<8x16xf32>
    %74 = vector.broadcast %0 : vector<1x16xf32> to vector<8x16xf32>
    %75 = arith.addf %73, %74 : vector<8x16xf32>
    %cst_56 = arith.constant 0.000000e+00 : f32
    %76 = vector.broadcast %cst_56 : f32 to vector<8x16xf32>
    %77 = arith.maximumf %75, %76 : vector<8x16xf32>
    %c56 = arith.constant 56 : index
    %c0_57 = arith.constant 0 : index
    %78 = vector.load %arg6[%c56, %c0_57] : memref<80x16xf32, #tpu.memory_space<vmem>>, vector<8x16xf32>
    tpu.vector_store %arg6[%c56, %c0_57], %77 {strides = array<i32>} : memref<80x16xf32, #tpu.memory_space<vmem>>, vector<8x16xf32>,
    %c0_58 = arith.constant 0 : index
    %c14 = arith.constant 14 : index
    %79 = vector.load %arg1[%c0_58, %c14] : memref<8x18xf32, #tpu.memory_space<vmem>>, vector<8x3xf32>
    %cst_59 = arith.constant dense<0.000000e+00> : vector<8x16xf32>
    %80 = tpu.matmul %79, %5, %cst_59 {dimension_numbers = #tpu.dot_dimension_numbers<[1], [0], [0], [1], [0, 0, 1, 1], [], []>, precision = #tpu.contract_precision<fp32>} : vector<8x3xf32>, vector<3x16xf32>, vector<8x16xf32> -> vector<8x16xf32>
    %c0_60 = arith.constant 0 : index
    %c15 = arith.constant 15 : index
    %81 = vector.load %arg1[%c0_60, %c15] : memref<8x18xf32, #tpu.memory_space<vmem>>, vector<8x3xf32>
    %cst_61 = arith.constant dense<0.000000e+00> : vector<8x16xf32>
    %82 = tpu.matmul %81, %5, %cst_61 {dimension_numbers = #tpu.dot_dimension_numbers<[1], [0], [0], [1], [0, 0, 1, 1], [], []>, precision = #tpu.contract_precision<fp32>} : vector<8x3xf32>, vector<3x16xf32>, vector<8x16xf32> -> vector<8x16xf32>
    %83 = arith.maximumf %80, %82 : vector<8x16xf32>
    %84 = vector.broadcast %0 : vector<1x16xf32> to vector<8x16xf32>
    %85 = arith.addf %83, %84 : vector<8x16xf32>
    %cst_62 = arith.constant 0.000000e+00 : f32
    %86 = vector.broadcast %cst_62 : f32 to vector<8x16xf32>
    %87 = arith.maximumf %85, %86 : vector<8x16xf32>
    %c64 = arith.constant 64 : index
    %c0_63 = arith.constant 0 : index
    %88 = vector.load %arg6[%c64, %c0_63] : memref<80x16xf32, #tpu.memory_space<vmem>>, vector<8x16xf32>
    tpu.vector_store %arg6[%c64, %c0_63], %87 {strides = array<i32>} : memref<80x16xf32, #tpu.memory_space<vmem>>, vector<8x16xf32>,
    %c0_64 = arith.constant 0 : index
    %c0_65 = arith.constant 0 : index
    %89 = vector.load %arg6[%c0_64, %c0_65] : memref<80x16xf32, #tpu.memory_space<vmem>>, vector<64x16xf32>
    %c8_66 = arith.constant 8 : index
    %c0_67 = arith.constant 0 : index
    %90 = vector.load %arg6[%c8_66, %c0_67] : memref<80x16xf32, #tpu.memory_space<vmem>>, vector<64x16xf32>
    %c16_68 = arith.constant 16 : index
    %c0_69 = arith.constant 0 : index
    %91 = vector.load %arg6[%c16_68, %c0_69] : memref<80x16xf32, #tpu.memory_space<vmem>>, vector<64x16xf32>
    %c16_70 = arith.constant 16 : index
    %c0_71 = arith.constant 0 : index
    %92 = vector.load %arg3[%c16_70, %c0_71] : memref<304x64xf32, #tpu.memory_space<vmem>>, vector<16x32xf32>
    %cst_72 = arith.constant dense<0.000000e+00> : vector<64x32xf32>
    %93 = tpu.matmul %89, %92, %cst_72 {dimension_numbers = #tpu.dot_dimension_numbers<[1], [0], [0], [1], [0, 0, 1, 1], [], []>, precision = #tpu.contract_precision<fp32>} : vector<64x16xf32>, vector<16x32xf32>, vector<64x32xf32> -> vector<64x32xf32>
    %c32_73 = arith.constant 32 : index
    %c0_74 = arith.constant 0 : index
    %94 = vector.load %arg3[%c32_73, %c0_74] : memref<304x64xf32, #tpu.memory_space<vmem>>, vector<16x32xf32>
    %cst_75 = arith.constant dense<0.000000e+00> : vector<64x32xf32>
    %95 = tpu.matmul %90, %94, %cst_75 {dimension_numbers = #tpu.dot_dimension_numbers<[1], [0], [0], [1], [0, 0, 1, 1], [], []>, precision = #tpu.contract_precision<fp32>} : vector<64x16xf32>, vector<16x32xf32>, vector<64x32xf32> -> vector<64x32xf32>
    %96 = arith.addf %93, %95 : vector<64x32xf32>
    %c48_76 = arith.constant 48 : index
    %c0_77 = arith.constant 0 : index
    %97 = vector.load %arg3[%c48_76, %c0_77] : memref<304x64xf32, #tpu.memory_space<vmem>>, vector<16x32xf32>
    %cst_78 = arith.constant dense<0.000000e+00> : vector<64x32xf32>
    %98 = tpu.matmul %91, %97, %cst_78 {dimension_numbers = #tpu.dot_dimension_numbers<[1], [0], [0], [1], [0, 0, 1, 1], [], []>, precision = #tpu.contract_precision<fp32>} : vector<64x16xf32>, vector<16x32xf32>, vector<64x32xf32> -> vector<64x32xf32>
    %99 = arith.addf %96, %98 : vector<64x32xf32>
    %100 = vector.broadcast %1 : vector<1x32xf32> to vector<64x32xf32>
    %101 = arith.addf %99, %100 : vector<64x32xf32>
    %cst_79 = arith.constant 0.000000e+00 : f32
    %102 = vector.broadcast %cst_79 : f32 to vector<64x32xf32>
    %103 = arith.maximumf %101, %102 : vector<64x32xf32>
    %c0_80 = arith.constant 0 : index
    %c0_81 = arith.constant 0 : index
    %104 = vector.load %arg7[%c0_80, %c0_81] : memref<64x32xf32, #tpu.memory_space<vmem>>, vector<64x32xf32>
    tpu.vector_store %arg7[%c0_80, %c0_81], %103 {strides = array<i32>} : memref<64x32xf32, #tpu.memory_space<vmem>>, vector<64x32xf32>,
    %cst_82 = arith.constant 0.000000e+00 : f32
    %105 = vector.broadcast %cst_82 : f32 to vector<8x64xf32>
    %c0_83 = arith.constant 0 : index
    %c0_84 = arith.constant 0 : index
    %106 = vector.load %arg7[%c0_83, %c0_84] : memref<64x32xf32, #tpu.memory_space<vmem>>, vector<8x32xf32>
    %c8_85 = arith.constant 8 : index
    %c0_86 = arith.constant 0 : index
    %107 = vector.load %arg7[%c8_85, %c0_86] : memref<64x32xf32, #tpu.memory_space<vmem>>, vector<8x32xf32>
    %108 = arith.maximumf %106, %107 : vector<8x32xf32>
    %c64_87 = arith.constant 64 : index
    %c0_88 = arith.constant 0 : index
    %109 = vector.load %arg3[%c64_87, %c0_88] : memref<304x64xf32, #tpu.memory_space<vmem>>, vector<32x64xf32>
    %cst_89 = arith.constant dense<0.000000e+00> : vector<8x64xf32>
    %110 = tpu.matmul %108, %109, %cst_89 {dimension_numbers = #tpu.dot_dimension_numbers<[1], [0], [0], [1], [0, 0, 1, 1], [], []>, precision = #tpu.contract_precision<fp32>} : vector<8x32xf32>, vector<32x64xf32>, vector<8x64xf32> -> vector<8x64xf32>
    %111 = arith.addf %105, %110 : vector<8x64xf32>
    %c16_90 = arith.constant 16 : index
    %c0_91 = arith.constant 0 : index
    %112 = vector.load %arg7[%c16_90, %c0_91] : memref<64x32xf32, #tpu.memory_space<vmem>>, vector<8x32xf32>
    %c24_92 = arith.constant 24 : index
    %c0_93 = arith.constant 0 : index
    %113 = vector.load %arg7[%c24_92, %c0_93] : memref<64x32xf32, #tpu.memory_space<vmem>>, vector<8x32xf32>
    %114 = arith.maximumf %112, %113 : vector<8x32xf32>
    %c96 = arith.constant 96 : index
    %c0_94 = arith.constant 0 : index
    %115 = vector.load %arg3[%c96, %c0_94] : memref<304x64xf32, #tpu.memory_space<vmem>>, vector<32x64xf32>
    %cst_95 = arith.constant dense<0.000000e+00> : vector<8x64xf32>
    %116 = tpu.matmul %114, %115, %cst_95 {dimension_numbers = #tpu.dot_dimension_numbers<[1], [0], [0], [1], [0, 0, 1, 1], [], []>, precision = #tpu.contract_precision<fp32>} : vector<8x32xf32>, vector<32x64xf32>, vector<8x64xf32> -> vector<8x64xf32>
    %117 = arith.addf %111, %116 : vector<8x64xf32>
    %c32_96 = arith.constant 32 : index
    %c0_97 = arith.constant 0 : index
    %118 = vector.load %arg7[%c32_96, %c0_97] : memref<64x32xf32, #tpu.memory_space<vmem>>, vector<8x32xf32>
    %c40_98 = arith.constant 40 : index
    %c0_99 = arith.constant 0 : index
    %119 = vector.load %arg7[%c40_98, %c0_99] : memref<64x32xf32, #tpu.memory_space<vmem>>, vector<8x32xf32>
    %120 = arith.maximumf %118, %119 : vector<8x32xf32>
    %c128 = arith.constant 128 : index
    %c0_100 = arith.constant 0 : index
    %121 = vector.load %arg3[%c128, %c0_100] : memref<304x64xf32, #tpu.memory_space<vmem>>, vector<32x64xf32>
    %cst_101 = arith.constant dense<0.000000e+00> : vector<8x64xf32>
    %122 = tpu.matmul %120, %121, %cst_101 {dimension_numbers = #tpu.dot_dimension_numbers<[1], [0], [0], [1], [0, 0, 1, 1], [], []>, precision = #tpu.contract_precision<fp32>} : vector<8x32xf32>, vector<32x64xf32>, vector<8x64xf32> -> vector<8x64xf32>
    %123 = arith.addf %117, %122 : vector<8x64xf32>
    %c48_102 = arith.constant 48 : index
    %c0_103 = arith.constant 0 : index
    %124 = vector.load %arg7[%c48_102, %c0_103] : memref<64x32xf32, #tpu.memory_space<vmem>>, vector<8x32xf32>
    %c56_104 = arith.constant 56 : index
    %c0_105 = arith.constant 0 : index
    %125 = vector.load %arg7[%c56_104, %c0_105] : memref<64x32xf32, #tpu.memory_space<vmem>>, vector<8x32xf32>
    %126 = arith.maximumf %124, %125 : vector<8x32xf32>
    %c160 = arith.constant 160 : index
    %c0_106 = arith.constant 0 : index
    %127 = vector.load %arg3[%c160, %c0_106] : memref<304x64xf32, #tpu.memory_space<vmem>>, vector<32x64xf32>
    %cst_107 = arith.constant dense<0.000000e+00> : vector<8x64xf32>
    %128 = tpu.matmul %126, %127, %cst_107 {dimension_numbers = #tpu.dot_dimension_numbers<[1], [0], [0], [1], [0, 0, 1, 1], [], []>, precision = #tpu.contract_precision<fp32>} : vector<8x32xf32>, vector<32x64xf32>, vector<8x64xf32> -> vector<8x64xf32>
    %129 = arith.addf %123, %128 : vector<8x64xf32>
    %130 = vector.broadcast %2 : vector<1x64xf32> to vector<8x64xf32>
    %131 = arith.addf %129, %130 : vector<8x64xf32>
    %cst_108 = arith.constant 0.000000e+00 : f32
    %132 = vector.broadcast %cst_108 : f32 to vector<8x64xf32>
    %133 = arith.maximumf %131, %132 : vector<8x64xf32>
    %c0_109 = arith.constant 0 : index
    %c0_110 = arith.constant 0 : index
    %134 = vector.load %arg2[%c0_109, %c0_110] : memref<8x10xf32, #tpu.memory_space<vmem>>, vector<8x10xf32>
    %c192 = arith.constant 192 : index
    %c0_111 = arith.constant 0 : index
    %135 = vector.load %arg3[%c192, %c0_111] : memref<304x64xf32, #tpu.memory_space<vmem>>, vector<10x32xf32>
    %cst_112 = arith.constant dense<0.000000e+00> : vector<8x32xf32>
    %136 = tpu.matmul %134, %135, %cst_112 {dimension_numbers = #tpu.dot_dimension_numbers<[1], [0], [0], [1], [0, 0, 1, 1], [], []>, precision = #tpu.contract_precision<fp32>} : vector<8x10xf32>, vector<10x32xf32>, vector<8x32xf32> -> vector<8x32xf32>
    %137 = vector.broadcast %3 : vector<1x32xf32> to vector<8x32xf32>
    %138 = arith.addf %136, %137 : vector<8x32xf32>
    %cst_113 = arith.constant 0.000000e+00 : f32
    %139 = vector.broadcast %cst_113 : f32 to vector<8x32xf32>
    %140 = arith.maximumf %138, %139 : vector<8x32xf32>
    %c208 = arith.constant 208 : index
    %c0_114 = arith.constant 0 : index
    %141 = vector.load %arg3[%c208, %c0_114] : memref<304x64xf32, #tpu.memory_space<vmem>>, vector<64x8xf32>
    %cst_115 = arith.constant dense<0.000000e+00> : vector<8x8xf32>
    %142 = tpu.matmul %133, %141, %cst_115 {dimension_numbers = #tpu.dot_dimension_numbers<[1], [0], [0], [1], [0, 0, 1, 1], [], []>, precision = #tpu.contract_precision<fp32>} : vector<8x64xf32>, vector<64x8xf32>, vector<8x8xf32> -> vector<8x8xf32>
    %c272 = arith.constant 272 : index
    %c0_116 = arith.constant 0 : index
    %143 = vector.load %arg3[%c272, %c0_116] : memref<304x64xf32, #tpu.memory_space<vmem>>, vector<32x8xf32>
    %cst_117 = arith.constant dense<0.000000e+00> : vector<8x8xf32>
    %144 = tpu.matmul %140, %143, %cst_117 {dimension_numbers = #tpu.dot_dimension_numbers<[1], [0], [0], [1], [0, 0, 1, 1], [], []>, precision = #tpu.contract_precision<fp32>} : vector<8x32xf32>, vector<32x8xf32>, vector<8x8xf32> -> vector<8x8xf32>
    %145 = arith.addf %142, %144 : vector<8x8xf32>
    %146 = vector.broadcast %4 : vector<1x8xf32> to vector<8x8xf32>
    %147 = arith.addf %145, %146 : vector<8x8xf32>
    %c0_118 = arith.constant 0 : index
    %c0_119 = arith.constant 0 : index
    %148 = vector.load %arg5[%c0_118, %c0_119] : memref<8x8xf32, #tpu.memory_space<vmem>>, vector<8x8xf32>
    tpu.vector_store %arg5[%c0_118, %c0_119], %147 {strides = array<i32>} : memref<8x8xf32, #tpu.memory_space<vmem>>, vector<8x8xf32>,
    return
  }
  func.func @transform_0(%arg0: i32) -> (i32, i32) {
    %c0_i32 = arith.constant 0 : i32
    %c0_i32_0 = arith.constant 0 : i32
    return %arg0, %c0_i32 : i32, i32
  }
  func.func @transform_1(%arg0: i32) -> (i32, i32) {
    %c0_i32 = arith.constant 0 : i32
    %c0_i32_0 = arith.constant 0 : i32
    return %arg0, %c0_i32 : i32, i32
  }
  func.func @transform_2(%arg0: i32) -> (i32, i32) {
    %c0_i32 = arith.constant 0 : i32
    %c0_i32_0 = arith.constant 0 : i32
    %c0_i32_1 = arith.constant 0 : i32
    return %c0_i32, %c0_i32_0 : i32, i32
  }
  func.func @transform_3(%arg0: i32) -> (i32, i32) {
    %c0_i32 = arith.constant 0 : i32
    %c0_i32_0 = arith.constant 0 : i32
    %c0_i32_1 = arith.constant 0 : i32
    return %c0_i32, %c0_i32_0 : i32, i32
  }
  func.func @transform_4(%arg0: i32) -> (i32, i32) {
    %c0_i32 = arith.constant 0 : i32
    %c0_i32_0 = arith.constant 0 : i32
    return %arg0, %c0_i32 : i32, i32
  }
}

</mosaic_0001>

<bundles_post_ra>
// kernel: tpu_custom_call.1
= control target key start
LH: loop header
LB: loop body
LE: loop exit
PB: predicated region body
PF: predicated region fallthrough
CT: control target
= control target key end

     0   :  { %s5434_s15 = smov 0   ;;  %s6806_s0 = inlined_call_operand.vmem [shape: f32[32,18], index: 0, kind: input, shape index: {}]   ;;  %s6807_s1 = inlined_call_operand.vmem [shape: f32[32,10], index: 1, kind: input, shape index: {}]   ;;  %s6808_s2 = inlined_call_operand.vmem [shape: f32[304,64], index: 2, kind: input, shape index: {}]   ;;  %s6809_s3 = inlined_call_operand.vmem [shape: f32[8,64], index: 3, kind: input, shape index: {}]   ;;  %s6810_s4 = inlined_call_operand.vmem [shape: f32[32,8], index: 4, kind: output, shape index: {}]  }
   0x1 LB: > { %s5346_s16 = sadd.s32 4294967295, %s5391_s15   ;;  %p5350_p0 = scmp.ge.s32.totalorder %s5391_s15, 1  ;;  %s5391_s15 = sphi %s5434_s15, %s14_s15  }
   0x2   : > { %p170_p1 = scmp.lt.s32.totalorder %s5391_s15, 5 }
   0x4   : > { %p171_p2 = pnand %p5350_p0, %p170_p1 }
   0x6   : > { %174 = sbr.rel (%p171_p2) target bundleno = 1256 (0x4e8), region = 36 }
   0xb   : > { %p198_p3 = scmp.lt.s32.totalorder %s5346_s16, 3  ;;  %v215_v0 = vld [vmem:[%s6808_s2] sm:$0x7]  ;;  %vm224_vm0 = vcmask 1042432   ;;  %vm220_vm1 = vcmask 23552   ;;  %s5393_s23 = smov 127  }
   0xc   : > { %v226_v1 = vsel %vm224_vm0, %v215_v0, 0  ;;  %s5394_s24 = smov 125   ;;  %s5395_s25 = smov 123   ;;  %vm216_vm2 = vcmask 130048   ;;  %vm3870_vm3 = vcmask 261120   ;;  %vm4672_vm4 = vcmask 1041408  }
   0xd   : > { %s6880_s16 = smov (!%p198_p3, %s5346_s16), 3  ;;  %v5445_v2 = vand.u32 4294901760, %v226_v1  ;;  %s5396_s26 = smov 126   ;;  %vm4668_vm5 = vcmask 80896   ;;  %vm5036_vm6 = vcmask 523264   ;;  %vm5279_vm7 = vcmask 64512  }
   0xe   : > { %s5447_s19 = sshll.u32 %s6880_s16, 3  ;;  %s5397_s27 = smov 124  }
   0xf   : > { %v5450_v3 = vsub.f32 %v226_v1, %v5445_v2  ;;  %244 = vmatpush.msra.mxu2 %v5445_v2  ;;  %368 = vmatpush.msra.mxu1 %v5445_v2  ;;  %s201_s22 = scalar_lea.vmem %s6806_s0, %s5447_s19  ;;  %s5398_s28 = smov 122  }
  0x10   : > { %v219_v4 = vld [vmem:[%s201_s22] sm:$0xff]  ;;  %s5399_s29 = smov 121   ;;  %s5400_s30 = smov 120  }
  0x11   : > { %470 = vmatpush.msrb.mxu1 %v5445_v2  ;;  %v5460_v5 = vand.u32 4294901760, %v5450_v3  ;;  %297 = vmatpush.msrb.mxu2 %v5450_v3  ;;  %v222_v6 = vsel %vm220_vm1, %v219_v4, 0  ;;  %s5401_s5 = smov 119   ;;  %s5402_s6 = smov 118  }
  0x12   : > { %374 = vrot.lane.b32.xlu0 %v219_v4, %s5393_s23  ;;  %681 = vrot.lane.b32.xlu1 %v219_v4, %s5394_s24  ;;  %v245_v7 = vand.u32 4294901760, %v222_v6  ;;  %s5403_s7 = smov 117   ;;  %s5404_s8 = smov 116  }
  0x13   : > { %987 = vrot.lane.b32.xlu2 %v219_v4, %s5395_s25  ;;  %v272_v8 = vsub.f32 %v5450_v3, %v5460_v5  ;;  %346 = vmatpush.msra.mxu0 %v5460_v5  ;;  %s5405_s9 = smov 115   ;;  %s5406_s10 = smov 114  }
  0x14   : > { %v246_v9 = vsub.f32 %v222_v6, %v245_v7  ;;  %348 = vmatmul.f32.vlgmr.msra.gmra.mxu0 %v245_v7  ;;  %370 = vmatmul.f32.vlgmr.msra.gmra.mxu1 %v245_v7  ;;  %s5407_s11 = smov 113   ;;  %s205_s14 = scalar_lea.vmem %s6807_s1, %s5447_s19 }
  0x15   : > { %447 = vmatpush.msrb.mxu0 %v5450_v3  ;;  %v5468_v10 = vand.u32 4294901760, %v272_v8 }
  0x16   : > { %v247_v11 = vand.u32 4294901760, %v246_v9 }
  0x17   : > { %551 = vmatpush.msra.mxu0 %v5445_v2  ;;  %274 = vmatpush.msra.mxu3 %v5468_v10 }
  0x18   : > { %581 = vmatpush.msra.mxu1 %v5468_v10  ;;  %276 = vmatmul.f32.vlgmr.msra.gmra.mxu3 %v245_v7  ;;  %v248_v12 = vsub.f32 %v246_v9, %v247_v11 }
  0x19   : > { %320 = vmatpush.msrb.mxu3 %v5445_v2 }
  0x1a   : > { %531 = vrot.lane.b32.xlu0 %v219_v4, %s5396_s26  ;;  %837 = vrot.lane.b32.xlu1 %v219_v4, %s5397_s27  ;;  %v249_v13 = vand.u32 4294901760, %v248_v12 }
  0x1b   : > { %1143 = vrot.lane.b32.xlu2 %v219_v4, %s5398_s28  ;;  %424 = vmatpush.msra.mxu3 %v5468_v10 }
  0x1c   : > { %250 = vmatmul.f32.vlgmr.msra.gmra.mxu2 %v249_v13 }
  0x1d   : > { %394 = vmatpush.msra.mxu2 %v5445_v2 }
  0x20   : > { %324 = vmatmul.f32.vlgmr.msrb.gmra.mxu3 %v247_v11 }
  0x21   : > { %518 = vmatpush.msrb.mxu3 %v5445_v2 }
  0x22   : > { %1293 = vrot.lane.b32.xlu0 %v219_v4, %s5399_s29  ;;  %1449 = vrot.lane.b32.xlu1 %v219_v4, %s5400_s30  ;;  %s209_s29 = scalar_lea.vmem %s6810_s4, %s5447_s19 }
  0x23   : > { %1599 = vrot.lane.b32.xlu2 %v219_v4, %s5401_s5 }
  0x24   : > { %300 = vmatmul.f32.vlgmr.msrb.gmra.mxu2 %v246_v9 }
  0x25   : > { %496 = vmatpush.msrb.mxu2 %v5460_v5 }
  0x2a   : > { %1755 = vrot.lane.b32.xlu0 %v219_v4, %s5402_s6  ;;  %1905 = vrot.lane.b32.xlu1 %v219_v4, %s5403_s7 }
  0x2b   : > { %2061 = vrot.lane.b32.xlu2 %v219_v4, %s5404_s8 }
  0x32   : > { %2211 = vrot.lane.b32.xlu0 %v219_v4, %s5405_s9  ;;  %2367 = vrot.lane.b32.xlu1 %v219_v4, %s5406_s10 }
  0x33   : > { %2517 = vrot.lane.b32.xlu2 %v219_v4, %s5407_s11 }
  0x6d   : > { %v988_v40 = vpop.permute.xlu2 %987 }
  0x6e   : > { %v989_v42 = vsel %vm220_vm1, %v988_v40, 0 }
  0x6f   : > { %v1008_v44 = vand.u32 4294901760, %v989_v42 }
  0x71   : > { %v1009_v47 = vsub.f32 %v989_v42, %v1008_v44 }
  0x73   : > { %v1010_v49 = vand.u32 4294901760, %v1009_v47 }
  0x75   : > { %v1144_v45 = vpop.permute.xlu2 %1143  ;;  %v1011_v51 = vsub.f32 %v1009_v47, %v1010_v49 }
  0x76   : > { %v1145_v46 = vsel %vm220_vm1, %v1144_v45, 0 }
  0x77   : > { %v1164_v48 = vand.u32 4294901760, %v1145_v46  ;;  %v1012_v53 = vand.u32 4294901760, %v1011_v51 }
  0x79   : > { %v1165_v50 = vsub.f32 %v1145_v46, %v1164_v48 }
  0x7b   : > { %v1166_v52 = vand.u32 4294901760, %v1165_v50 }
  0x7d   : > { %v1167_v54 = vsub.f32 %v1165_v50, %v1166_v52  ;;  %v1600_v8 = vpop.permute.xlu2 %1599 }
  0x7e   : > { %v1601_v9 = vsel %vm220_vm1, %v1600_v8, 0 }
  0x7f   : > { %v1168_v57 = vand.u32 4294901760, %v1167_v54  ;;  %v1620_v12 = vand.u32 4294901760, %v1601_v9 }
  0x84   : > { %v375_v14 = vpop.permute.xlu0 %374  ;;  %v682_v24 = vpop.permute.xlu1 %681 }
  0x85   : > { %v376_v15 = vsel %vm220_vm1, %v375_v14, 0  ;;  %v683_v27 = vsel %vm220_vm1, %v682_v24, 0 }
  0x86   : > { %v395_v16 = vand.u32 4294901760, %v376_v15  ;;  %v702_v30 = vand.u32 4294901760, %v683_v27 }
  0x88   : > { %v396_v17 = vsub.f32 %v376_v15, %v395_v16  ;;  %426 = vmatmul.f32.vlgmr.msra.gmra.mxu3 %v395_v16  ;;  %v703_v33 = vsub.f32 %v683_v27, %v702_v30  ;;  %v1621_v15 = vsub.f32 %v1601_v9, %v1620_v12  ;;  %v2062_v27 = vpop.permute.xlu2 %2061 }
  0x89   : > { %627 = vmatpush.msra.mxu3 %v5445_v2 }
  0x8a   : > { %450 = vmatmul.f32.vlgmr.msrb.gmra.mxu0 %v396_v17  ;;  %v397_v18 = vand.u32 4294901760, %v396_v17  ;;  %v704_v35 = vand.u32 4294901760, %v703_v33 }
  0x8b   : > { %653 = vmatpush.msrb.mxu0 %v5460_v5 }
  0x8c   : > { %v532_v19 = vpop.permute.xlu0 %531  ;;  %v398_v20 = vsub.f32 %v396_v17, %v397_v18  ;;  %474 = vmatmul.f32.vlgmr.msrb.gmra.mxu1 %v397_v18  ;;  %v838_v31 = vpop.permute.xlu1 %837  ;;  %v705_v37 = vsub.f32 %v703_v33, %v704_v35  ;;  %v1622_v17 = vand.u32 4294901760, %v1621_v15 }
  0x8d   : > { %v533_v21 = vsel %vm220_vm1, %v532_v19, 0  ;;  %675 = vmatpush.msrb.mxu1 %v5445_v2  ;;  %v839_v32 = vsel %vm220_vm1, %v838_v31, 0 }
  0x8e   : > { %v552_v22 = vand.u32 4294901760, %v533_v21  ;;  %v399_v23 = vand.u32 4294901760, %v398_v20  ;;  %v858_v34 = vand.u32 4294901760, %v839_v32  ;;  %v706_v39 = vand.u32 4294901760, %v705_v37 }
  0x8f   : > { %v1623_v19 = vsub.f32 %v1621_v15, %v1622_v17 }
  0x90   : > { %v553_v25 = vsub.f32 %v533_v21, %v552_v22  ;;  %400 = vmatmul.f32.vlgmr.msra.gmra.mxu2 %v399_v23  ;;  %520 = vmatmul.f32.vlgmr.msrb.gmra.mxu3 %v395_v16  ;;  %v859_v36 = vsub.f32 %v839_v32, %v858_v34 }
  0x91   : > { %604 = vmatpush.msra.mxu2 %v5450_v3  ;;  %731 = vmatpush.msrb.mxu3 %v5468_v10  ;;  %v1624_v21 = vand.u32 4294901760, %v1623_v19 }
  0x92   : > { %v554_v26 = vand.u32 4294901760, %v553_v25  ;;  %v860_v38 = vand.u32 4294901760, %v859_v36 }
  0x94   : > { %v555_v28 = vsub.f32 %v553_v25, %v554_v26  ;;  %583 = vmatmul.f32.vlgmr.msra.gmra.mxu1 %v552_v22  ;;  %v861_v41 = vsub.f32 %v859_v36, %v860_v38  ;;  %v1294_v55 = vpop.permute.xlu0 %1293  ;;  %v1450_v59 = vpop.permute.xlu1 %1449 }
  0x95   : > { %777 = vmatpush.msra.mxu1 %v5445_v2  ;;  %v1295_v56 = vsel %vm220_vm1, %v1294_v55, 0  ;;  %v1451_v60 = vsel %vm220_vm1, %v1450_v59, 0 }
  0x96   : > { %v556_v29 = vand.u32 4294901760, %v555_v28  ;;  %v862_v43 = vand.u32 4294901760, %v861_v41  ;;  %v1314_v58 = vand.u32 4294901760, %v1295_v56  ;;  %v1470_v62 = vand.u32 4294901760, %v1451_v60 }
  0x98   : > { %498 = vmatmul.f32.vlgmr.msrb.gmra.mxu2 %v395_v16  ;;  %557 = vmatmul.f32.vlgmr.msra.gmra.mxu0 %v556_v29  ;;  %v1315_v61 = vsub.f32 %v1295_v56, %v1314_v58  ;;  %v1471_v0 = vsub.f32 %v1451_v60, %v1470_v62  ;;  %v2063_v29 = vsel %vm220_vm1, %v2062_v27, 0 }
  0x99   : > { %631 = vmatmul.f32.vlgmr.msra.gmra.mxu3 %v554_v26  ;;  %701 = vmatpush.msrb.mxu2 %v5445_v2  ;;  %v2082_v31 = vand.u32 4294901760, %v2063_v29 }
  0x9a   : > { %754 = vmatpush.msra.mxu0 %v5450_v3  ;;  %825 = vmatpush.msra.mxu3 %v5445_v2  ;;  %v1316_v63 = vand.u32 4294901760, %v1315_v61  ;;  %v1472_v4 = vand.u32 4294901760, %v1471_v0 }
  0x9b   : > { %v277_v28 = vpop.f32.mrf.mxu3 }
  0x9c   : > { %677 = vmatmul.f32.vlgmr.msrb.gmra.mxu1 %v552_v22  ;;  %v1317_v1 = vsub.f32 %v1315_v61, %v1316_v63  ;;  %v1473_v7 = vsub.f32 %v1471_v0, %v1472_v4  ;;  %v1756_v13 = vpop.permute.xlu0 %1755  ;;  %v1906_v23 = vpop.permute.xlu1 %1905 }
  0x9d   : > { %887 = vmatpush.msrb.mxu1 %v5468_v10  ;;  %v1757_v14 = vsel %vm220_vm1, %v1756_v13, 0  ;;  %v1907_v24 = vsel %vm220_vm1, %v1906_v23, 0  ;;  %v2518_v23 = vpop.permute.xlu2 %2517 }
  0x9e   : > { %v1318_v6 = vand.u32 4294901760, %v1317_v1  ;;  %v1474_v11 = vand.u32 4294901760, %v1473_v7  ;;  %v1776_v16 = vand.u32 4294901760, %v1757_v14  ;;  %v1926_v26 = vand.u32 4294901760, %v1907_v24 }
  0xa0   : > { %607 = vmatmul.f32.vlgmr.msra.gmra.mxu2 %v553_v25  ;;  %655 = vmatmul.f32.vlgmr.msrb.gmra.mxu0 %v552_v22  ;;  %v1777_v18 = vsub.f32 %v1757_v14, %v1776_v16 }
  0xa1   : > { %733 = vmatmul.f32.vlgmr.msrb.gmra.mxu3 %v702_v30  ;;  %803 = vmatpush.msra.mxu2 %v5460_v5 }
  0xa2   : > { %857 = vmatpush.msrb.mxu0 %v5445_v2  ;;  %933 = vmatpush.msrb.mxu3 %v5445_v2  ;;  %v1778_v20 = vand.u32 4294901760, %v1777_v18 }
  0xa4   : > { %781 = vmatmul.f32.vlgmr.msra.gmra.mxu1 %v704_v35  ;;  %v1779_v22 = vsub.f32 %v1777_v18, %v1778_v20  ;;  %v251_v35 = vpop.f32.mrf.mxu2  ;;  %v2212_v42 = vpop.permute.xlu0 %2211 }
  0xa5   : > { %981 = vmatpush.msra.mxu1 %v5445_v2  ;;  %v2213_v46 = vsel %vm220_vm1, %v2212_v42, 0  ;;  %v2368_v51 = vpop.permute.xlu1 %2367 }
  0xa6   : > { %v1780_v25 = vand.u32 4294901760, %v1779_v22  ;;  %v5601_v22 = vld [vmem:[%s6809_s3] ss:$0 sm:$0xff] }
  0xa8   : > { %707 = vmatmul.f32.vlgmr.msrb.gmra.mxu2 %v706_v39  ;;  %757 = vmatmul.f32.vlgmr.msra.gmra.mxu0 %v703_v33  ;;  %v5548_v33 = vpop.f32.mrf.mxu1 }
  0xa9   : > { %827 = vmatmul.f32.vlgmr.msra.gmra.mxu3 %v702_v30  ;;  %910 = vmatpush.msrb.mxu2 %v5450_v3 }
  0xaa   : > { %959 = vmatpush.msra.mxu0 %v5460_v5  ;;  %1037 = vmatpush.msra.mxu3 %v5468_v10 }
  0xac   : > { %889 = vmatmul.f32.vlgmr.msrb.gmra.mxu1 %v858_v34 }
  0xad   : > { %1083 = vmatpush.msrb.mxu1 %v5445_v2 }
  0xb0   : > { %805 = vmatmul.f32.vlgmr.msra.gmra.mxu2 %v702_v30  ;;  %863 = vmatmul.f32.vlgmr.msrb.gmra.mxu0 %v862_v43  ;;  %v1927_v30 = vsub.f32 %v1907_v24, %v1926_v26 }
  0xb1   : > { %937 = vmatmul.f32.vlgmr.msrb.gmra.mxu3 %v860_v38  ;;  %1007 = vmatpush.msra.mxu2 %v5445_v2  ;;  %v349_v38 = vpop.f32.mrf.mxu0 }
  0xb2   : > { %1060 = vmatpush.msrb.mxu0 %v5450_v3  ;;  %1131 = vmatpush.msrb.mxu3 %v5445_v2  ;;  %v1928_v32 = vand.u32 4294901760, %v1927_v30 }
  0xb4   : > { %983 = vmatmul.f32.vlgmr.msra.gmra.mxu1 %v858_v34  ;;  %v1929_v37 = vsub.f32 %v1927_v30, %v1928_v32 }
  0xb5   : > { %1193 = vmatpush.msra.mxu1 %v5468_v10 }
  0xb6   : > { %v1930_v40 = vand.u32 4294901760, %v1929_v37 }
  0xb8   : > { %913 = vmatmul.f32.vlgmr.msrb.gmra.mxu2 %v859_v36  ;;  %961 = vmatmul.f32.vlgmr.msra.gmra.mxu0 %v858_v34  ;;  %v2083_v34 = vsub.f32 %v2063_v29, %v2082_v31  ;;  %v325_v36 = vpop.f32.mrf.mxu3 }
  0xb9   : > { %1039 = vmatmul.f32.vlgmr.msra.gmra.mxu3 %v1008_v44  ;;  %1109 = vmatpush.msrb.mxu2 %v5460_v5 }
  0xba   : > { %1163 = vmatpush.msra.mxu0 %v5445_v2  ;;  %1239 = vmatpush.msra.mxu3 %v5445_v2  ;;  %v2084_v39 = vand.u32 4294901760, %v2083_v34 }
  0xbc   : > { %1087 = vmatmul.f32.vlgmr.msrb.gmra.mxu1 %v1010_v49  ;;  %v2085_v41 = vsub.f32 %v2083_v34, %v2084_v39  ;;  %v278_v49 = vadd.f32 %v277_v28, %v251_v35 }
  0xbd   : > { %1287 = vmatpush.msrb.mxu1 %v5445_v2 }
  0xc0   : > { %1013 = vmatmul.f32.vlgmr.msra.gmra.mxu2 %v1012_v53  ;;  %1063 = vmatmul.f32.vlgmr.msrb.gmra.mxu0 %v1009_v47  ;;  %v2086_v47 = vand.u32 4294901760, %v2085_v41  ;;  %v2369_v53 = vsel %vm220_vm1, %v2368_v51, 0 }
  0xc1   : > { %1133 = vmatmul.f32.vlgmr.msrb.gmra.mxu3 %v1008_v44  ;;  %1216 = vmatpush.msra.mxu2 %v5450_v3  ;;  %v5568_v59 = vand.u32 4294901760, %v2369_v53 }
  0xc2   : > { %1265 = vmatpush.msrb.mxu0 %v5460_v5  ;;  %1343 = vmatpush.msrb.mxu3 %v5468_v10 }
  0xc3   : > { %v5575_v1 = vsub.f32 %v2369_v53, %v5568_v59 }
  0xc4   : > { %1195 = vmatmul.f32.vlgmr.msra.gmra.mxu1 %v1164_v48 }
  0xc5   : > { %1389 = vmatpush.msra.mxu1 %v5445_v2 }
  0xc8   : > { %1111 = vmatmul.f32.vlgmr.msrb.gmra.mxu2 %v1008_v44  ;;  %1169 = vmatmul.f32.vlgmr.msra.gmra.mxu0 %v1168_v57  ;;  %v301_v44 = vpop.f32.mrf.mxu2 }
  0xc9   : > { %1243 = vmatmul.f32.vlgmr.msra.gmra.mxu3 %v1166_v52  ;;  %1313 = vmatpush.msrb.mxu2 %v5445_v2  ;;  %v302_v54 = vadd.f32 %v301_v44, %v278_v49 }
  0xca   : > { %1366 = vmatpush.msra.mxu0 %v5450_v3  ;;  %1437 = vmatpush.msra.mxu3 %v5445_v2 }
  0xcc   : > { %1289 = vmatmul.f32.vlgmr.msrb.gmra.mxu1 %v1164_v48 }
  0xcd   : > { %1499 = vmatpush.msrb.mxu1 %v5468_v10 }
  0xd0   : > { %1219 = vmatmul.f32.vlgmr.msra.gmra.mxu2 %v1165_v50  ;;  %1267 = vmatmul.f32.vlgmr.msrb.gmra.mxu0 %v1164_v48  ;;  %v5559_v50 = vand.u32 4294901760, %v2213_v46 }
  0xd1   : > { %1345 = vmatmul.f32.vlgmr.msrb.gmra.mxu3 %v1314_v58  ;;  %1415 = vmatpush.msra.mxu2 %v5460_v5 }
  0xd2   : > { %1469 = vmatpush.msrb.mxu0 %v5445_v2  ;;  %1545 = vmatpush.msrb.mxu3 %v5445_v2  ;;  %v2233_v55 = vsub.f32 %v2213_v46, %v5559_v50 }
  0xd4   : > { %1393 = vmatmul.f32.vlgmr.msra.gmra.mxu1 %v1316_v63 }
  0xd5   : > { %1593 = vmatpush.msra.mxu1 %v5445_v2 }
  0xd8   : > { %1319 = vmatmul.f32.vlgmr.msrb.gmra.mxu2 %v1318_v6  ;;  %1369 = vmatmul.f32.vlgmr.msra.gmra.mxu0 %v1315_v61  ;;  %v326_v61 = vadd.f32 %v325_v36, %v302_v54 }
  0xd9   : > { %1439 = vmatmul.f32.vlgmr.msra.gmra.mxu3 %v1314_v58  ;;  %1522 = vmatpush.msrb.mxu2 %v5450_v3 }
  0xda   : > { %1571 = vmatpush.msra.mxu0 %v5460_v5  ;;  %1649 = vmatpush.msra.mxu3 %v5468_v10  ;;  %v350_v8 = vadd.f32 %v349_v38, %v326_v61 }
  0xdc   : > { %1501 = vmatmul.f32.vlgmr.msrb.gmra.mxu1 %v1470_v62 }
  0xdd   : > { %1695 = vmatpush.msrb.mxu1 %v5445_v2 }
  0xe0   : > { %1417 = vmatmul.f32.vlgmr.msra.gmra.mxu2 %v1314_v58  ;;  %1475 = vmatmul.f32.vlgmr.msrb.gmra.mxu0 %v1474_v11 }
  0xe1   : > { %1549 = vmatmul.f32.vlgmr.msrb.gmra.mxu3 %v1472_v4  ;;  %1619 = vmatpush.msra.mxu2 %v5445_v2  ;;  %v2683_v4 = vld [vmem:[%s6808_s2 + $0x20] sm:$0xff] }
  0xe2   : > { %1672 = vmatpush.msrb.mxu0 %v5450_v3  ;;  %1743 = vmatpush.msrb.mxu3 %v5445_v2  ;;  %v5588_v13 = vand.u32 4294901760, %v2683_v4 }
  0xe4   : > { %1595 = vmatmul.f32.vlgmr.msra.gmra.mxu1 %v1470_v62  ;;  %v5604_v24 = vsub.f32 %v2683_v4, %v5588_v13 }
  0xe5   : > { %1805 = vmatpush.msra.mxu1 %v5468_v10 }
  0xe8   : > { %1525 = vmatmul.f32.vlgmr.msrb.gmra.mxu2 %v1471_v0  ;;  %1573 = vmatmul.f32.vlgmr.msra.gmra.mxu0 %v1470_v62  ;;  %v2234_v62 = vand.u32 4294901760, %v2233_v55  ;;  %v2684_v0 = vld [vmem:[%s6808_s2 + $0x28] sm:$0xff] }
  0xe9   : > { %1651 = vmatmul.f32.vlgmr.msra.gmra.mxu3 %v1620_v12  ;;  %1721 = vmatpush.msrb.mxu2 %v5460_v5  ;;  %v5584_v7 = vand.u32 4294901760, %v2684_v0 }
  0xea   : > { %1775 = vmatpush.msra.mxu0 %v5445_v2  ;;  %1851 = vmatpush.msra.mxu3 %v5445_v2  ;;  %v2235_v9 = vsub.f32 %v2233_v55, %v2234_v62 }
  0xec   : > { %1699 = vmatmul.f32.vlgmr.msrb.gmra.mxu1 %v1622_v17  ;;  %v2236_v19 = vand.u32 4294901760, %v2235_v9 }
  0xed   : > { %1899 = vmatpush.msrb.mxu1 %v5445_v2 }
  0xf0   : > { %1625 = vmatmul.f32.vlgmr.msra.gmra.mxu2 %v1624_v21  ;;  %1675 = vmatmul.f32.vlgmr.msrb.gmra.mxu0 %v1621_v15 }
  0xf1   : > { %1745 = vmatmul.f32.vlgmr.msrb.gmra.mxu3 %v1620_v12  ;;  %1828 = vmatpush.msra.mxu2 %v5450_v3 }
  0xf2   : > { %1877 = vmatpush.msrb.mxu0 %v5460_v5  ;;  %1955 = vmatpush.msrb.mxu3 %v5468_v10 }
  0xf4   : > { %1807 = vmatmul.f32.vlgmr.msra.gmra.mxu1 %v1776_v16 }
  0xf5   : > { %2001 = vmatpush.msra.mxu1 %v5445_v2 }
  0xf8   : > { %1723 = vmatmul.f32.vlgmr.msrb.gmra.mxu2 %v1620_v12  ;;  %1781 = vmatmul.f32.vlgmr.msra.gmra.mxu0 %v1780_v25 }
  0xf9   : > { %1855 = vmatmul.f32.vlgmr.msra.gmra.mxu3 %v1778_v20  ;;  %1925 = vmatpush.msrb.mxu2 %v5445_v2  ;;  %v372_v20 = vadd.f32 %v5548_v33, %v350_v8 }
  0xfa   : > { %1978 = vmatpush.msra.mxu0 %v5450_v3  ;;  %2049 = vmatpush.msra.mxu3 %v5445_v2 }
  0xfc   : > { %1901 = vmatmul.f32.vlgmr.msrb.gmra.mxu1 %v1776_v16 }
  0xfd   : > { %2111 = vmatpush.msrb.mxu1 %v5468_v10 }
 0x100   : > { %1831 = vmatmul.f32.vlgmr.msra.gmra.mxu2 %v1777_v18  ;;  %1879 = vmatmul.f32.vlgmr.msrb.gmra.mxu0 %v1776_v16  ;;  %v2390_v16 = vand.u32 4294901760, %v5575_v1  ;;  %v5595_v18 = vsub.f32 %v2684_v0, %v5584_v7 }
 0x101   : > { %1957 = vmatmul.f32.vlgmr.msrb.gmra.mxu3 %v1926_v26  ;;  %2027 = vmatpush.msra.mxu2 %v5460_v5 }
 0x102   : > { %2081 = vmatpush.msrb.mxu0 %v5445_v2  ;;  %2157 = vmatpush.msrb.mxu3 %v5445_v2  ;;  %v2808_v28 = vand.u32 4294901760, %v5595_v18 }
 0x104   : > { %2005 = vmatmul.f32.vlgmr.msra.gmra.mxu1 %v1928_v32  ;;  %v2814_v32 = vand.u32 4294901760, %v5604_v24  ;;  %v2809_v38 = vsub.f32 %v5595_v18, %v2808_v28 }
 0x105   : > { %2205 = vmatpush.msra.mxu1 %v5445_v2 }
 0x106   : > { %v2810_v42 = vand.u32 4294901760, %v2809_v38 }
 0x107   : > { %v451_v48 = vpop.f32.mrf.mxu0 }
 0x108   : > { %1931 = vmatmul.f32.vlgmr.msrb.gmra.mxu2 %v1930_v40  ;;  %1981 = vmatmul.f32.vlgmr.msra.gmra.mxu0 %v1927_v30  ;;  %v2519_v30 = vsel %vm220_vm1, %v2518_v23, 0 }
 0x109   : > { %2051 = vmatmul.f32.vlgmr.msra.gmra.mxu3 %v1926_v26  ;;  %v475_v43 = vpop.f32.mrf.mxu1  ;;  %2134 = vmatpush.msrb.mxu2 %v5450_v3  ;;  %v5616_v37 = vand.u32 4294901760, %v2519_v30 }
 0x10a   : > { %2183 = vmatpush.msra.mxu0 %v5460_v5  ;;  %2261 = vmatpush.msra.mxu3 %v5468_v10 }
 0x10b   : > { %v427_v45 = vpop.f32.mrf.mxu3  ;;  %v2539_v40 = vsub.f32 %v2519_v30, %v5616_v37 }
 0x10c   : > { %2113 = vmatmul.f32.vlgmr.msrb.gmra.mxu1 %v2082_v31 }
 0x10d   : > { %2307 = vmatpush.msrb.mxu1 %v5445_v2 }
 0x110   : > { %2029 = vmatmul.f32.vlgmr.msra.gmra.mxu2 %v1926_v26  ;;  %2087 = vmatmul.f32.vlgmr.msrb.gmra.mxu0 %v2086_v47  ;;  %v2391_v26 = vsub.f32 %v5575_v1, %v2390_v16 }
 0x111   : > { %2161 = vmatmul.f32.vlgmr.msrb.gmra.mxu3 %v2084_v39  ;;  %v5561_v52 = vpop.f32.mrf.mxu1  ;;  %2231 = vmatpush.msra.mxu2 %v5445_v2 }
 0x112   : > { %2284 = vmatpush.msrb.mxu0 %v5450_v3  ;;  %2355 = vmatpush.msrb.mxu3 %v5445_v2 }
 0x113   : > { %v401_v56 = vpop.f32.mrf.mxu2  ;;  %v521_v57 = vpop.f32.mrf.mxu3 }
 0x114   : > { %v428_v58 = vadd.f32 %v427_v45, %v401_v56  ;;  %2207 = vmatmul.f32.vlgmr.msra.gmra.mxu1 %v2082_v31 }
 0x115   : > { %v558_v60 = vpop.f32.mrf.mxu0  ;;  %2417 = vmatpush.msra.mxu1 %v5468_v10 }
 0x116   : > { %v452_v63 = vadd.f32 %v451_v48, %v428_v58  ;;  %v585_v39 = vadd.f32 %v5561_v52, %v558_v60  ;;  %v2540_v48 = vand.u32 4294901760, %v2539_v40 }
 0x118   : > { %2137 = vmatmul.f32.vlgmr.msrb.gmra.mxu2 %v2083_v34  ;;  %2185 = vmatmul.f32.vlgmr.msra.gmra.mxu0 %v2082_v31  ;;  %v476_v11 = vadd.f32 %v475_v43, %v452_v63  ;;  %v2392_v34 = vand.u32 4294901760, %v2391_v26 }
 0x119   : > { %2263 = vmatmul.f32.vlgmr.msra.gmra.mxu3 %v5559_v50  ;;  %v5581_v6 = vpop.f32.mrf.mxu1  ;;  %2333 = vmatpush.msrb.mxu2 %v5460_v5 }
 0x11a   : > { %2387 = vmatpush.msra.mxu0 %v5445_v2  ;;  %2463 = vmatpush.msra.mxu3 %v5445_v2 }
 0x11b   : > { %v499_v12 = vpop.f32.mrf.mxu2 }
 0x11c   : > { %v500_v14 = vadd.f32 %v499_v12, %v476_v11  ;;  %v632_v15 = vpop.f32.mrf.mxu3  ;;  %2311 = vmatmul.f32.vlgmr.msrb.gmra.mxu1 %v2234_v62 }
 0x11d   : > { %v5591_v17 = vpop.f32.mrf.mxu0  ;;  %2511 = vmatpush.msrb.mxu1 %v5445_v2 }
 0x11e   : > { %v522_v21 = vadd.f32 %v521_v57, %v500_v14 }
 0x120   : > { %v524_v25 = vmax.f32 %v372_v20, %v522_v21  ;;  %2237 = vmatmul.f32.vlgmr.msra.gmra.mxu2 %v2236_v19  ;;  %2287 = vmatmul.f32.vlgmr.msrb.gmra.mxu0 %v2233_v55 }
 0x121   : > { %2357 = vmatmul.f32.vlgmr.msrb.gmra.mxu3 %v5559_v50  ;;  %v782_v27 = vpop.f32.mrf.mxu1  ;;  %2440 = vmatpush.msra.mxu2 %v5450_v3 }
 0x122   : > { %v526_v29 = vadd.f32 %v5601_v22, %v524_v25  ;;  %2489 = vmatpush.msrb.mxu0 %v5460_v5  ;;  %2567 = vmatpush.msrb.mxu3 %v5468_v10  ;;  %v2815_v10 = vsub.f32 %v5604_v24, %v2814_v32 }
 0x123   : > { %v608_v31 = vpop.f32.mrf.mxu2 }
 0x124   : > { %v527_v33 = vmax.f32 %v526_v29, 0.0  ;;  %v734_v35 = vpop.f32.mrf.mxu3  ;;  %2419 = vmatmul.f32.vlgmr.msra.gmra.mxu1 %v5568_v59  ;;  %v609_v43 = vadd.f32 %v608_v31, %v585_v39  ;;  %v2816_v45 = vand.u32 4294901760, %v2815_v10 }
 0x125   : > { %v758_v36 = vpop.f32.mrf.mxu0  ;;  %2613 = vmatpush.msra.mxu1 %v5445_v2 }
 0x126   : > { %528 = vst.msk [vmem:[#allocation2 + $0x8] sm:$0xff] %vm216_vm2, %v527_v33  ;;  %v633_v51 = vadd.f32 %v632_v15, %v609_v43 }
 0x128   : > { %2335 = vmatmul.f32.vlgmr.msrb.gmra.mxu2 %v5559_v50  ;;  %2393 = vmatmul.f32.vlgmr.msra.gmra.mxu0 %v2392_v34  ;;  %v657_v55 = vadd.f32 %v5591_v17, %v633_v51 }
 0x129   : > { %2467 = vmatmul.f32.vlgmr.msra.gmra.mxu3 %v2390_v16  ;;  %v890_v41 = vpop.f32.mrf.mxu1  ;;  %2537 = vmatpush.msrb.mxu2 %v5445_v2 }
 0x12a   : > { %2590 = vmatpush.msra.mxu0 %v5450_v3  ;;  %2661 = vmatpush.msra.mxu3 %v5445_v2  ;;  %v2541_v2 = vsub.f32 %v2539_v40, %v2540_v48  ;;  %v679_v62 = vadd.f32 %v5581_v6, %v657_v55 }
 0x12b   : > { %v708_v44 = vpop.f32.mrf.mxu2 }
 0x12c   : > { %v735_v46 = vadd.f32 %v734_v35, %v708_v44  ;;  %v828_v47 = vpop.f32.mrf.mxu3  ;;  %2513 = vmatmul.f32.vlgmr.msrb.gmra.mxu1 %v5568_v59 }
 0x12d   : > { %v864_v49 = vpop.f32.mrf.mxu0  ;;  %2811 = vmatpush.msrb.mxu1 %v2810_v42  ;;  %v2672_v50 = vld [vmem:[#allocation2 + $0x8] sm:$0xff] }
 0x12e   : > { %v759_v52 = vadd.f32 %v758_v36, %v735_v46  ;;  %v2686_v53 = vsel %vm216_vm2, %v2672_v50, 0  ;;  %v891_v14 = vadd.f32 %v890_v41, %v864_v49 }
 0x12f   : > { %2817 = vmatpush.msrb.mxu1 %v2816_v45  ;;  %v5634_v54 = vand.u32 4294901760, %v2686_v53 }
 0x130   : > { %2443 = vmatmul.f32.vlgmr.msra.gmra.mxu2 %v5575_v1  ;;  %2491 = vmatmul.f32.vlgmr.msrb.gmra.mxu0 %v5568_v59  ;;  %v783_v56 = vadd.f32 %v782_v27, %v759_v52 }
 0x131   : > { %2569 = vmatmul.f32.vlgmr.msrb.gmra.mxu3 %v5616_v37  ;;  %v5639_v3 = vpop.f32.mrf.mxu1  ;;  %2639 = vmatpush.msra.mxu2 %v5460_v5  ;;  %v5646_v57 = vsub.f32 %v2686_v53, %v5634_v54  ;;  %v2542_v5 = vand.u32 4294901760, %v2541_v2 }
 0x132   : > { %2724 = vmatpush.msrb.mxu0 %v5584_v7  ;;  %2927 = vmatpush.msrb.mxu3 %v5584_v7 }
 0x133   : > { %v806_v58 = vpop.f32.mrf.mxu2  ;;  %v5653_v0 = vand.u32 4294901760, %v5646_v57 }
 0x134   : > { %v807_v60 = vadd.f32 %v806_v58, %v783_v56  ;;  %v938_v59 = vpop.f32.mrf.mxu3  ;;  %2617 = vmatmul.f32.vlgmr.msra.gmra.mxu1 %v2540_v48  ;;  %2726 = vmatpush.msrb.mxu0 %v5588_v13 }
 0x135   : > { %v962_v61 = vpop.f32.mrf.mxu0  ;;  %2929 = vmatpush.msrb.mxu3 %v5588_v13  ;;  %3049 = vmatpush.msra.mxu1 %v5584_v7  ;;  %v2730_v7 = vsub.f32 %v5646_v57, %v5653_v0 }
 0x136   : > { %v829_v63 = vadd.f32 %v828_v47, %v807_v60 }
 0x137   : > { %3051 = vmatpush.msra.mxu1 %v5588_v13  ;;  %v5668_v13 = vand.u32 4294901760, %v2730_v7 }
 0x138   : > { %v831_v1 = vmax.f32 %v679_v62, %v829_v63  ;;  %2543 = vmatmul.f32.vlgmr.msrb.gmra.mxu2 %v2542_v5  ;;  %2593 = vmatmul.f32.vlgmr.msra.gmra.mxu0 %v2539_v40 }
 0x139   : > { %2663 = vmatmul.f32.vlgmr.msra.gmra.mxu3 %v5616_v37  ;;  %v1088_v4 = vpop.f32.mrf.mxu1  ;;  %2867 = vmatpush.msrb.mxu2 %v5595_v18 }
 0x13a   : > { %v832_v8 = vadd.f32 %v5601_v22, %v831_v1  ;;  %2996 = vmatpush.msra.mxu0 %v2808_v28 }
 0x13b   : > { %v914_v6 = vpop.f32.mrf.mxu2  ;;  %2870 = vmatpush.msrb.mxu2 %v5604_v24 }
 0x13c   : > { %v833_v9 = vmax.f32 %v832_v8, 0.0  ;;  %v1040_v11 = vpop.f32.mrf.mxu3  ;;  %2819 = vmatmul.f32.vlgmr.msrb.gmra.mxu1 %v5634_v54  ;;  %3000 = vmatpush.msra.mxu0 %v2814_v32  ;;  %v915_v16 = vadd.f32 %v914_v6, %v891_v14 }
 0x13d   : > { %v1064_v12 = vpop.f32.mrf.mxu0 }
 0x13e   : > { %834 = vst.msk [vmem:[#allocation2 + $0x10] sm:$0xff] %vm216_vm2, %v833_v9  ;;  %v939_v24 = vadd.f32 %v938_v59, %v915_v16 }
 0x140   : > { %2641 = vmatmul.f32.vlgmr.msra.gmra.mxu2 %v5616_v37  ;;  %2732 = vmatmul.f32.vlgmr.msrb.gmra.mxu0 %v5668_v13  ;;  %v963_v29 = vadd.f32 %v962_v61, %v939_v24 }
 0x141   : > { %2933 = vmatmul.f32.vlgmr.msrb.gmra.mxu3 %v5653_v0  ;;  %v1196_v15 = vpop.f32.mrf.mxu1 }
 0x142   : > { %v985_v37 = vadd.f32 %v5639_v3, %v963_v29 }
 0x143   : > { %v1014_v17 = vpop.f32.mrf.mxu2 }
 0x144   : > { %v1041_v18 = vadd.f32 %v1040_v11, %v1014_v17  ;;  %v1134_v19 = vpop.f32.mrf.mxu3 }
 0x145   : > { %v2673_v20 = vld [vmem:[#allocation2 + $0x10] sm:$0xff]  ;;  %v1170_v21 = vpop.f32.mrf.mxu0 }
 0x146   : > { %v2689_v23 = vsel %vm216_vm2, %v2673_v20, 0  ;;  %v1065_v25 = vadd.f32 %v1064_v12, %v1041_v18  ;;  %v1197_v46 = vadd.f32 %v1196_v15, %v1170_v21 }
 0x147   : > { %v5674_v26 = vand.u32 4294901760, %v2689_v23 }
 0x148   : > { %2873 = vmatmul.f32.vlgmr.msrb.gmra.mxu2 %v5646_v57  ;;  %v1089_v30 = vadd.f32 %v1088_v4, %v1065_v25 }
 0x149   : > { %v1290_v27 = vpop.f32.mrf.mxu1  ;;  %2823 = vmatmul.f32.gmra.mxu1 %v5674_v26  ;;  %v5679_v28 = vsub.f32 %v2689_v23, %v5674_v26 }
 0x14b   : > { %v1112_v31 = vpop.f32.mrf.mxu2  ;;  %v5682_v32 = vand.u32 4294901760, %v5679_v28 }
 0x14c   : > { %v1113_v33 = vadd.f32 %v1112_v31, %v1089_v30  ;;  %v1244_v34 = vpop.f32.mrf.mxu3 }
 0x14d   : > { %v1268_v35 = vpop.f32.mrf.mxu0  ;;  %2939 = vmatmul.f32.gmra.mxu3 %v5682_v32  ;;  %v2738_v36 = vsub.f32 %v5679_v28, %v5682_v32 }
 0x14e   : > { %v1135_v38 = vadd.f32 %v1134_v19, %v1113_v33 }
 0x14f   : > { %v5688_v10 = vand.u32 4294901760, %v2738_v36 }
 0x150   : > { %v1137_v39 = vmax.f32 %v985_v37, %v1135_v38  ;;  %2878 = vmatmul.f32.gmra.mxu2 %v5679_v28 }
 0x151   : > { %v1394_v40 = vpop.f32.mrf.mxu1  ;;  %2740 = vmatmul.f32.gmra.mxu0 %v5688_v10 }
 0x152   : > { %v1138_v41 = vadd.f32 %v5601_v22, %v1137_v39 }
 0x153   : > { %v1220_v42 = vpop.f32.mrf.mxu2 }
 0x154   : > { %v1139_v43 = vmax.f32 %v1138_v41, 0.0  ;;  %v1346_v44 = vpop.f32.mrf.mxu3  ;;  %v1221_v48 = vadd.f32 %v1220_v42, %v1197_v46 }
 0x155   : > { %v1370_v45 = vpop.f32.mrf.mxu0 }
 0x156   : > { %1140 = vst.msk [vmem:[#allocation2 + $0x18] sm:$0xff] %vm216_vm2, %v1139_v43  ;;  %v1245_v3 = vadd.f32 %v1244_v34, %v1221_v48 }
 0x158   : > { %v1269_v59 = vadd.f32 %v1268_v35, %v1245_v3 }
 0x159   : > { %v1502_v47 = vpop.f32.mrf.mxu1 }
 0x15a   : > { %v1291_v7 = vadd.f32 %v1290_v27, %v1269_v59 }
 0x15b   : > { %v1320_v49 = vpop.f32.mrf.mxu2 }
 0x15c   : > { %v1347_v50 = vadd.f32 %v1346_v44, %v1320_v49  ;;  %v1440_v51 = vpop.f32.mrf.mxu3 }
 0x15d   : > { %v2674_v52 = vld [vmem:[#allocation2 + $0x18] sm:$0xff]  ;;  %v1476_v53 = vpop.f32.mrf.mxu0 }
 0x15e   : > { %v2692_v2 = vsel %vm216_vm2, %v2674_v52, 0  ;;  %v1371_v55 = vadd.f32 %v1370_v45, %v1347_v50  ;;  %v1503_v19 = vadd.f32 %v1502_v47, %v1476_v53 }
 0x15f   : > { %v5695_v56 = vand.u32 4294901760, %v2692_v2 }
 0x160   : > { %v1395_v61 = vadd.f32 %v1394_v40, %v1371_v55 }
 0x161   : > { %v1596_v58 = vpop.f32.mrf.mxu1  ;;  %2827 = vmatmul.f32.gmra.mxu1 %v5695_v56  ;;  %v5699_v60 = vsub.f32 %v2692_v2, %v5695_v56 }
 0x163   : > { %v1418_v5 = vpop.f32.mrf.mxu2  ;;  %2883 = vmatmul.f32.gmra.mxu2 %v5699_v60  ;;  %v5703_v62 = vand.u32 4294901760, %v5699_v60 }
 0x164   : > { %v1419_v63 = vadd.f32 %v1418_v5, %v1395_v61  ;;  %v1550_v1 = vpop.f32.mrf.mxu3 }
 0x165   : > { %v1574_v4 = vpop.f32.mrf.mxu0  ;;  %2945 = vmatmul.f32.gmra.mxu3 %v5703_v62  ;;  %v2746_v8 = vsub.f32 %v5699_v60, %v5703_v62 }
 0x166   : > { %v1441_v6 = vadd.f32 %v1440_v51, %v1419_v63 }
 0x167   : > { %v5708_v9 = vand.u32 4294901760, %v2746_v8 }
 0x168   : > { %v1443_v11 = vmax.f32 %v1291_v7, %v1441_v6 }
 0x169   : > { %v1700_v12 = vpop.f32.mrf.mxu1  ;;  %2748 = vmatmul.f32.gmra.mxu0 %v5708_v9 }
 0x16a   : > { %v1444_v14 = vadd.f32 %v5601_v22, %v1443_v11 }
 0x16b   : > { %v1526_v15 = vpop.f32.mrf.mxu2 }
 0x16c   : > { %v1445_v16 = vmax.f32 %v1444_v14, 0.0  ;;  %v1652_v17 = vpop.f32.mrf.mxu3  ;;  %v1527_v21 = vadd.f32 %v1526_v15, %v1503_v19 }
 0x16d   : > { %v1676_v18 = vpop.f32.mrf.mxu0 }
 0x16e   : > { %1446 = vst.msk [vmem:[#allocation2 + $0x20] sm:$0xff] %vm216_vm2, %v1445_v16  ;;  %v1551_v31 = vadd.f32 %v1550_v1, %v1527_v21 }
 0x170   : > { %v1575_v36 = vadd.f32 %v1574_v4, %v1551_v31 }
 0x171   : > { %v1808_v20 = vpop.f32.mrf.mxu1 }
 0x172   : > { %v1597_v45 = vadd.f32 %v1596_v58, %v1575_v36 }
 0x173   : > { %v1626_v23 = vpop.f32.mrf.mxu2 }
 0x174   : > { %v1653_v24 = vadd.f32 %v1652_v17, %v1626_v23  ;;  %v1746_v25 = vpop.f32.mrf.mxu3 }
 0x175   : > { %v2675_v27 = vld [vmem:[#allocation2 + $0x20] sm:$0xff]  ;;  %v1782_v29 = vpop.f32.mrf.mxu0 }
 0x176   : > { %v2695_v30 = vsel %vm216_vm2, %v2675_v27, 0  ;;  %v1677_v33 = vadd.f32 %v1676_v18, %v1653_v24  ;;  %v1809_v3 = vadd.f32 %v1808_v20, %v1782_v29 }
 0x177   : > { %v5714_v34 = vand.u32 4294901760, %v2695_v30 }
 0x178   : > { %v1701_v37 = vadd.f32 %v1700_v12, %v1677_v33 }
 0x179   : > { %2831 = vmatmul.f32.gmra.mxu1 %v5714_v34  ;;  %v5718_v35 = vsub.f32 %v2695_v30, %v5714_v34  ;;  %v1902_v38 = vpop.f32.mrf.mxu1 }
 0x17b   : > { %v1724_v39 = vpop.f32.mrf.mxu2  ;;  %2888 = vmatmul.f32.gmra.mxu2 %v5718_v35  ;;  %v5722_v40 = vand.u32 4294901760, %v5718_v35 }
 0x17c   : > { %v1725_v41 = vadd.f32 %v1724_v39, %v1701_v37  ;;  %v1856_v42 = vpop.f32.mrf.mxu3 }
 0x17d   : > { %v1880_v43 = vpop.f32.mrf.mxu0  ;;  %2951 = vmatmul.f32.gmra.mxu3 %v5722_v40  ;;  %v2754_v44 = vsub.f32 %v5718_v35, %v5722_v40 }
 0x17e   : > { %v1747_v46 = vadd.f32 %v1746_v25, %v1725_v41 }
 0x17f   : > { %v5727_v47 = vand.u32 4294901760, %v2754_v44 }
 0x180   : > { %v1749_v48 = vmax.f32 %v1597_v45, %v1747_v46 }
 0x181   : > { %2756 = vmatmul.f32.gmra.mxu0 %v5727_v47  ;;  %v2006_v53 = vpop.f32.mrf.mxu1 }
 0x182   : > { %v1750_v49 = vadd.f32 %v5601_v22, %v1749_v48 }
 0x183   : > { %v1832_v50 = vpop.f32.mrf.mxu2 }
 0x184   : > { %v1751_v51 = vmax.f32 %v1750_v49, 0.0  ;;  %v1958_v52 = vpop.f32.mrf.mxu3  ;;  %v1833_v55 = vadd.f32 %v1832_v50, %v1809_v3 }
 0x185   : > { %v1982_v2 = vpop.f32.mrf.mxu0 }
 0x186   : > { %1752 = vst.msk [vmem:[#allocation2 + $0x28] sm:$0xff] %vm216_vm2, %v1751_v51  ;;  %v1857_v4 = vadd.f32 %v1856_v42, %v1833_v55 }
 0x188   : > { %v1881_v12 = vadd.f32 %v1880_v43, %v1857_v4 }
 0x189   : > { %v2114_v6 = vpop.f32.mrf.mxu1 }
 0x18a   : > { %v1903_v21 = vadd.f32 %v1902_v38, %v1881_v12 }
 0x18b   : > { %v1932_v59 = vpop.f32.mrf.mxu2 }
 0x18c   : > { %v1959_v61 = vadd.f32 %v1958_v52, %v1932_v59  ;;  %v2052_v58 = vpop.f32.mrf.mxu3 }
 0x18d   : > { %v2676_v5 = vld [vmem:[#allocation2 + $0x28] sm:$0xff]  ;;  %v2088_v63 = vpop.f32.mrf.mxu0 }
 0x18e   : > { %v2698_v1 = vsel %vm216_vm2, %v2676_v5, 0  ;;  %v1983_v8 = vadd.f32 %v1982_v2, %v1959_v61  ;;  %v2115_v37 = vadd.f32 %v2114_v6, %v2088_v63 }
 0x18f   : > { %v5733_v7 = vand.u32 4294901760, %v2698_v1 }
 0x190   : > { %v2007_v14 = vadd.f32 %v2006_v53, %v1983_v8  ;;  %v5408_v8 = vmov 0.0  }
 0x191   : > { %2835 = vmatmul.f32.gmra.mxu1 %v5733_v7  ;;  %v5737_v11 = vsub.f32 %v2698_v1, %v5733_v7  ;;  %v2208_v27 = vpop.f32.mrf.mxu1  ;;  %217 = vst.msk [vmem:[#allocation2] sm:$0xff] %vm216_vm2, %v5408_v8 }
 0x192   : > { %218 = vst.msk [vmem:[#allocation2 + $0x48] sm:$0xff] %vm216_vm2, %v5408_v8 }
 0x193   : > { %v2030_v15 = vpop.f32.mrf.mxu2  ;;  %2893 = vmatmul.f32.gmra.mxu2 %v5737_v11  ;;  %v5741_v16 = vand.u32 4294901760, %v5737_v11 }
 0x194   : > { %v2031_v17 = vadd.f32 %v2030_v15, %v2007_v14  ;;  %v2162_v18 = vpop.f32.mrf.mxu3 }
 0x195   : > { %v2186_v19 = vpop.f32.mrf.mxu0  ;;  %2957 = vmatmul.f32.gmra.mxu3 %v5741_v16  ;;  %v2762_v20 = vsub.f32 %v5737_v11, %v5741_v16 }
 0x196   : > { %v2053_v23 = vadd.f32 %v2052_v58, %v2031_v17 }
 0x197   : > { %v5746_v24 = vand.u32 4294901760, %v2762_v20 }
 0x198   : > { %v2055_v25 = vmax.f32 %v1903_v21, %v2053_v23  ;;  %v2681_v23 = vld [vmem:[%s6808_s2 + $0x10] sm:$0xff] }
 0x199   : > { %2764 = vmatmul.f32.gmra.mxu0 %v5746_v24  ;;  %v2312_v41 = vpop.f32.mrf.mxu1 }
 0x19a   : > { %v2056_v29 = vadd.f32 %v5601_v22, %v2055_v25 }
 0x19b   : > { %v2138_v30 = vpop.f32.mrf.mxu2 }
 0x19c   : > { %v2057_v31 = vmax.f32 %v2056_v29, 0.0  ;;  %v2264_v33 = vpop.f32.mrf.mxu3  ;;  %v2139_v39 = vadd.f32 %v2138_v30, %v2115_v37  ;;  %v3104_v30 = vand.u32 4294901760, %v2681_v23 }
 0x19d   : > { %v2288_v36 = vpop.f32.mrf.mxu0 }
 0x19e   : > { %2058 = vst.msk [vmem:[#allocation2 + $0x30] sm:$0xff] %vm216_vm2, %v2057_v31  ;;  %v2163_v45 = vadd.f32 %v2162_v18, %v2139_v39  ;;  %v3192_v39 = vsub.f32 %v2681_v23, %v3104_v30 }
 0x1a0   : > { %v2187_v52 = vadd.f32 %v2186_v19, %v2163_v45  ;;  %v2682_v19 = vld [vmem:[%s6808_s2 + $0x18] sm:$0xff]  ;;  %v3193_v45 = vand.u32 4294901760, %v3192_v39 }
 0x1a1   : > { %v2420_v59 = vpop.f32.mrf.mxu1  ;;  %v3102_v20 = vand.u32 4294901760, %v2682_v19 }
 0x1a2   : > { %v2209_v58 = vadd.f32 %v2208_v27, %v2187_v52  ;;  %v3194_v52 = vsub.f32 %v3192_v39, %v3193_v45 }
 0x1a3   : > { %v2238_v42 = vpop.f32.mrf.mxu2  ;;  %3103 = vmatpush.msra.mxu2 %v3102_v20  ;;  %v3186_v29 = vsub.f32 %v2682_v19, %v3102_v20  ;;  %3306 = vmatpush.msrb.mxu1 %v3102_v20 }
 0x1a4   : > { %v2265_v38 = vadd.f32 %v2264_v33, %v2238_v42  ;;  %v2358_v49 = vpop.f32.mrf.mxu3 }
 0x1a5   : > { %v2677_v43 = vld [vmem:[#allocation2 + $0x30] sm:$0xff]  ;;  %v2394_v50 = vpop.f32.mrf.mxu0  ;;  %v3187_v37 = vand.u32 4294901760, %v3186_v29  ;;  %3105 = vmatpush.msra.mxu2 %v3104_v30  ;;  %3246 = vmatpush.msrb.mxu0 %v3186_v29 }
 0x1a6   : > { %v2701_v44 = vsel %vm216_vm2, %v2677_v43, 0  ;;  %v2289_v46 = vadd.f32 %v2288_v36, %v2265_v38  ;;  %v2421_v18 = vadd.f32 %v2420_v59, %v2394_v50  ;;  %3308 = vmatpush.msrb.mxu1 %v3104_v30 }
 0x1a7   : > { %v5752_v48 = vand.u32 4294901760, %v2701_v44  ;;  %3249 = vmatpush.msrb.mxu0 %v3192_v39  ;;  %3375 = vmatpush.msrb.mxu2 %v3187_v37 }
 0x1a8   : > { %v2313_v53 = vadd.f32 %v2312_v41, %v2289_v46 }
 0x1a9   : > { %2839 = vmatmul.f32.gmra.mxu1 %v5752_v48  ;;  %v5756_v51 = vsub.f32 %v2701_v44, %v5752_v48  ;;  %v2514_v17 = vpop.f32.mrf.mxu1  ;;  %v3188_v44 = vsub.f32 %v3186_v29, %v3187_v37  ;;  %3379 = vmatpush.msrb.mxu2 %v3193_v45 }
 0x1ab   : > { %v2336_v2 = vpop.f32.mrf.mxu2  ;;  %2898 = vmatmul.f32.gmra.mxu2 %v5756_v51  ;;  %v5760_v3 = vand.u32 4294901760, %v5756_v51  ;;  %v3189_v50 = vand.u32 4294901760, %v3188_v44 }
 0x1ac   : > { %v2337_v55 = vadd.f32 %v2336_v2, %v2313_v53  ;;  %v2468_v4 = vpop.f32.mrf.mxu3 }
 0x1ad   : > { %2963 = vmatmul.f32.gmra.mxu3 %v5760_v3  ;;  %v2770_v61 = vsub.f32 %v5756_v51, %v5760_v3  ;;  %v2492_v12 = vpop.f32.mrf.mxu0 }
 0x1ae   : > { %v2359_v5 = vadd.f32 %v2358_v49, %v2337_v55  ;;  %3190 = vmatpush.msra.mxu3 %v3189_v50 }
 0x1af   : > { %v5765_v63 = vand.u32 4294901760, %v2770_v61  ;;  %v3195_v61 = vand.u32 4294901760, %v3194_v52 }
 0x1b0   : > { %v2361_v1 = vmax.f32 %v2209_v58, %v2359_v5 }
 0x1b1   : > { %2772 = vmatmul.f32.gmra.mxu0 %v5765_v63  ;;  %v2618_v46 = vpop.f32.mrf.mxu1  ;;  %3196 = vmatpush.msra.mxu3 %v3195_v61 }
 0x1b2   : > { %v2362_v6 = vadd.f32 %v5601_v22, %v2361_v1 }
 0x1b3   : > { %v2444_v14 = vpop.f32.mrf.mxu2  ;;  %3428 = vmatpush.msrb.mxu3 %v3102_v20 }
 0x1b4   : > { %v2363_v15 = vmax.f32 %v2362_v6, 0.0  ;;  %v2445_v21 = vadd.f32 %v2444_v14, %v2421_v18  ;;  %v2570_v25 = vpop.f32.mrf.mxu3  ;;  %v2671_v14 = vld [vmem:[#allocation2] sm:$0xff] }
 0x1b5   : > { %v2594_v36 = vpop.f32.mrf.mxu0  ;;  %3430 = vmatpush.msrb.mxu3 %v3104_v30  ;;  %v3086_v19 = vsel %vm216_vm2, %v2671_v14, 0 }
 0x1b6   : > { %2364 = vst.msk [vmem:[#allocation2 + $0x38] sm:$0xff] %vm216_vm2, %v2363_v15  ;;  %v2469_v42 = vadd.f32 %v2468_v4, %v2445_v21  ;;  %v3106_v21 = vand.u32 4294901760, %v3086_v19 }
 0x1b8   : > { %v2493_v53 = vadd.f32 %v2492_v12, %v2469_v42  ;;  %v5798_v23 = vsub.f32 %v3086_v19, %v3106_v21 }
 0x1b9   : > { %v5851_v44 = vpop.f32.mrf.mxu1 }
 0x1ba   : > { %v2515_v4 = vadd.f32 %v2514_v17, %v2493_v53  ;;  %v3108_v20 = vand.u32 4294901760, %v5798_v23  ;;  %v3464_v53 = vld [vmem:[%s6808_s2 + $0x30] sm:$0xff] }
 0x1bb   : > { %v2544_v27 = vpop.f32.mrf.mxu2 }
 0x1bc   : > { %v2571_v31 = vadd.f32 %v2570_v25, %v2544_v27  ;;  %v2664_v5 = vpop.f32.mrf.mxu3  ;;  %v3109_v30 = vsub.f32 %v5798_v23, %v3108_v20 }
 0x1bd   : > { %v2678_v33 = vld [vmem:[#allocation2 + $0x38] sm:$0xff] }
 0x1be   : > { %v2704_v41 = vsel %vm216_vm2, %v2678_v33, 0  ;;  %v2595_v38 = vadd.f32 %v2594_v36, %v2571_v31  ;;  %v3110_v36 = vand.u32 4294901760, %v3109_v30 }
 0x1bf   : > { %v5779_v43 = vand.u32 4294901760, %v2704_v41 }
 0x1c0   : > { %v2619_v2 = vadd.f32 %v2618_v46, %v2595_v38  ;;  %v5856_v46 = vpop.f32.mrf.mxu0 }
 0x1c1   : > { %2843 = vmatmul.f32.gmra.mxu1 %v5779_v43  ;;  %v5783_v49 = vsub.f32 %v2704_v41, %v5779_v43 }
 0x1c3   : > { %v2642_v55 = vpop.f32.mrf.mxu2  ;;  %2903 = vmatmul.f32.gmra.mxu2 %v5783_v49  ;;  %v5787_v59 = vand.u32 4294901760, %v5783_v49 }
 0x1c4   : > { %v2643_v58 = vadd.f32 %v2642_v55, %v2619_v2  ;;  %v5860_v52 = vpop.f32.mrf.mxu3  ;;  %v3485_v2 = vand.u32 4294901760, %v3464_v53 }
 0x1c5   : > { %2969 = vmatmul.f32.gmra.mxu3 %v5787_v59  ;;  %v2778_v1 = vsub.f32 %v5783_v49, %v5787_v59 }
 0x1c6   : > { %v2665_v8 = vadd.f32 %v2664_v5, %v2643_v58  ;;  %v5858_v50 = vpop.f32.mrf.mxu1  ;;  %v3573_v5 = vsub.f32 %v3464_v53, %v3485_v2 }
 0x1c7   : > { %v5792_v6 = vand.u32 4294901760, %v2778_v1 }
 0x1c8   : > { %v2667_v12 = vmax.f32 %v2515_v4, %v2665_v8  ;;  %v3574_v1 = vand.u32 4294901760, %v3573_v5 }
 0x1c9   : > { %2780 = vmatmul.f32.gmra.mxu0 %v5792_v6 }
 0x1ca   : > { %v2668_v15 = vadd.f32 %v5601_v22, %v2667_v12  ;;  %v3575_v4 = vsub.f32 %v3573_v5, %v3574_v1 }
 0x1cb   : > { %v5854_v45 = vpop.f32.mrf.mxu2 }
 0x1cc   : > { %v2669_v18 = vmax.f32 %v2668_v15, 0.0 }
 0x1ce   : > { %2670 = vst.msk [vmem:[#allocation2 + $0x40] sm:$0xff] %vm216_vm2, %v2669_v18  ;;  %v5868_v55 = vpop.f32.mrf.mxu0 }
 0x1d3   : > { %v5871_v61 = vpop.f32.mrf.mxu2 }
 0x1d5   : > { %v2679_v17 = vld [vmem:[#allocation2 + $0x40] sm:$0xff] }
 0x1d6   : > { %v2707_v25 = vsel %vm216_vm2, %v2679_v17, 0 }
 0x1d7   : > { %v5801_v27 = vand.u32 4294901760, %v2707_v25 }
 0x1d9   : > { %2847 = vmatmul.f32.gmra.mxu1 %v5801_v27  ;;  %v5806_v29 = vsub.f32 %v2707_v25, %v5801_v27 }
 0x1db   : > { %2908 = vmatmul.f32.gmra.mxu2 %v5806_v29  ;;  %v5810_v22 = vand.u32 4294901760, %v5806_v29 }
 0x1dd   : > { %2975 = vmatmul.f32.gmra.mxu3 %v5810_v22  ;;  %v2786_v31 = vsub.f32 %v5806_v29, %v5810_v22 }
 0x1de   : > { %v5873_v58 = vpop.f32.mrf.mxu1 }
 0x1df   : > { %v5816_v33 = vand.u32 4294901760, %v2786_v31 }
 0x1e1   : > { %2788 = vmatmul.f32.gmra.mxu0 %v5816_v33  ;;  %3053 = vmatmul.f32.vlgmr.msra.gmra.mxu1 %v5634_v54 }
 0x1e3   : > { %3111 = vmatmul.f32.vlgmr.msra.gmra.mxu2 %v3110_v36 }
 0x1e5   : > { %3198 = vmatmul.f32.vlgmr.msra.gmra.mxu3 %v3106_v21 }
 0x1e6   : > { %v5880_v8 = vpop.f32.mrf.mxu0  ;;  %v5883_v12 = vpop.f32.mrf.mxu2 }
 0x1e9   : > { %3002 = vmatmul.f32.vlgmr.msra.gmra.mxu0 %v5634_v54  ;;  %3057 = vmatmul.f32.gmra.mxu1 %v5674_v26 }
 0x1eb   : > { %3119 = vmatmul.f32.gmra.mxu2 %v5668_v13  ;;  %v3465_v13 = vld [vmem:[%s6808_s2 + $0x38] sm:$0xff] }
 0x1ec   : > { %v3483_v37 = vand.u32 4294901760, %v3465_v13 }
 0x1ed   : > { %3202 = vmatmul.f32.gmra.mxu3 %v5634_v54 }
 0x1ee   : > { %3484 = vmatpush.msra.mxu0 %v3483_v37  ;;  %v3567_v39 = vsub.f32 %v3465_v13, %v3483_v37  ;;  %3687 = vmatpush.msra.mxu3 %v3483_v37 }
 0x1f0   : > { %v3568_v41 = vand.u32 4294901760, %v3567_v39  ;;  %3627 = vmatpush.msra.mxu2 %v3567_v39  ;;  %3486 = vmatpush.msra.mxu0 %v3485_v2 }
 0x1f1   : > { %3006 = vmatmul.f32.gmra.mxu0 %v5674_v26  ;;  %3061 = vmatmul.f32.gmra.mxu1 %v5695_v56 }
 0x1f2   : > { %v3569_v42 = vsub.f32 %v3567_v39, %v3568_v41  ;;  %3689 = vmatpush.msra.mxu3 %v3485_v2  ;;  %3630 = vmatpush.msra.mxu2 %v3573_v5 }
 0x1f3   : > { %3127 = vmatmul.f32.gmra.mxu2 %v5688_v10 }
 0x1f4   : > { %v3570_v38 = vand.u32 4294901760, %v3569_v42 }
 0x1f5   : > { %3206 = vmatmul.f32.gmra.mxu3 %v5674_v26 }
 0x1f6   : > { %3571 = vmatpush.msra.mxu1 %v3570_v38  ;;  %v5885_v14 = vpop.f32.mrf.mxu1 }
 0x1f9   : > { %3010 = vmatmul.f32.gmra.mxu0 %v5695_v56  ;;  %3065 = vmatmul.f32.gmra.mxu1 %v5714_v34 }
 0x1fb   : > { %3135 = vmatmul.f32.gmra.mxu2 %v5708_v9 }
 0x1fd   : > { %3210 = vmatmul.f32.gmra.mxu3 %v5695_v56 }
 0x1fe   : > { %v5895_v18 = vpop.f32.mrf.mxu2 }
 0x201   : > { %3014 = vmatmul.f32.gmra.mxu0 %v5714_v34  ;;  %3069 = vmatmul.f32.gmra.mxu1 %v5733_v7 }
 0x203   : > { %3143 = vmatmul.f32.gmra.mxu2 %v5727_v47 }
 0x205   : > { %3214 = vmatmul.f32.gmra.mxu3 %v5714_v34 }
 0x209   : > { %3018 = vmatmul.f32.gmra.mxu0 %v5733_v7  ;;  %3073 = vmatmul.f32.gmra.mxu1 %v5752_v48 }
 0x20b   : > { %3151 = vmatmul.f32.gmra.mxu2 %v5746_v24 }
 0x20d   : > { %3218 = vmatmul.f32.gmra.mxu3 %v5733_v7 }
 0x20e   : > { %v5897_v19 = vpop.f32.mrf.mxu1 }
 0x211   : > { %3022 = vmatmul.f32.gmra.mxu0 %v5752_v48  ;;  %3077 = vmatmul.f32.gmra.mxu1 %v5779_v43 }
 0x213   : > { %3159 = vmatmul.f32.gmra.mxu2 %v5765_v63 }
 0x215   : > { %3222 = vmatmul.f32.gmra.mxu3 %v5752_v48 }
 0x216   : > { %v5907_v17 = vpop.f32.mrf.mxu2 }
 0x219   : > { %3026 = vmatmul.f32.gmra.mxu0 %v5779_v43  ;;  %3081 = vmatmul.f32.gmra.mxu1 %v5801_v27 }
 0x21b   : > { %3167 = vmatmul.f32.gmra.mxu2 %v5792_v6 }
 0x21d   : > { %3226 = vmatmul.f32.gmra.mxu3 %v5779_v43 }
 0x221   : > { %3030 = vmatmul.f32.gmra.mxu0 %v5801_v27  ;;  %3312 = vmatmul.f32.vlgmr.msrb.gmra.mxu1 %v3108_v20 }
 0x223   : > { %3381 = vmatmul.f32.vlgmr.msrb.gmra.mxu2 %v3106_v21 }
 0x225   : > { %3432 = vmatmul.f32.vlgmr.msrb.gmra.mxu3 %v3106_v21 }
 0x226   : > { %v5909_v25 = vpop.f32.mrf.mxu1 }
 0x229   : > { %3252 = vmatmul.f32.vlgmr.msrb.gmra.mxu0 %v5798_v23  ;;  %3318 = vmatmul.f32.gmra.mxu1 %v5653_v0  ;;  %v5875_v0 = vpop.f32.mrf.mxu3 }
 0x22a   : > { %3756 = vmatpush.msrb.mxu0 %v3568_v41 }
 0x22b   : > { %3385 = vmatmul.f32.gmra.mxu2 %v5634_v54 }
 0x22c   : > { %3760 = vmatpush.msrb.mxu0 %v3574_v1 }
 0x22d   : > { %3436 = vmatmul.f32.gmra.mxu3 %v5634_v54  ;;  %v3576_v54 = vand.u32 4294901760, %v3575_v4 }
 0x22e   : > { %v5919_v31 = vpop.f32.mrf.mxu2 }
 0x22f   : > { %3577 = vmatpush.msra.mxu1 %v3576_v54  ;;  %6813 = vst [vmem:[#allocation5_spill] sm:$0xff] %v5919_v31 }
 0x231   : > { %3257 = vmatmul.f32.gmra.mxu0 %v5646_v57  ;;  %3324 = vmatmul.f32.gmra.mxu1 %v5682_v32  ;;  %v5887_v15 = vpop.f32.mrf.mxu3  ;;  %v5892_v57 = vpop.f32.mrf.mxu0 }
 0x232   : > { %3809 = vmatpush.msrb.mxu1 %v3483_v37 }
 0x233   : > { %3389 = vmatmul.f32.gmra.mxu2 %v5674_v26 }
 0x234   : > { %3811 = vmatpush.msrb.mxu1 %v3485_v2 }
 0x235   : > { %3440 = vmatmul.f32.gmra.mxu3 %v5674_v26 }
 0x239   : > { %3262 = vmatmul.f32.gmra.mxu0 %v5679_v28  ;;  %3330 = vmatmul.f32.gmra.mxu1 %v5703_v62  ;;  %v5899_v21 = vpop.f32.mrf.mxu3  ;;  %v5904_v23 = vpop.f32.mrf.mxu0 }
 0x23b   : > { %3393 = vmatmul.f32.gmra.mxu2 %v5695_v56 }
 0x23d   : > { %3444 = vmatmul.f32.gmra.mxu3 %v5695_v56 }
 0x23e   : > { %v5921_v36 = vpop.f32.mrf.mxu1 }
 0x241   : > { %3267 = vmatmul.f32.gmra.mxu0 %v5699_v60  ;;  %3336 = vmatmul.f32.gmra.mxu1 %v5722_v40  ;;  %v5911_v20 = vpop.f32.mrf.mxu3  ;;  %v5916_v30 = vpop.f32.mrf.mxu0 }
 0x242   : > { %6812 = vst [vmem:[#allocation4_spill] sm:$0xff] %v5911_v20 }
 0x243   : > { %3397 = vmatmul.f32.gmra.mxu2 %v5714_v34 }
 0x245   : > { %3448 = vmatmul.f32.gmra.mxu3 %v5714_v34 }
 0x246   : > { %v5931_v39 = vpop.f32.mrf.mxu2 }
 0x249   : > { %3272 = vmatmul.f32.gmra.mxu0 %v5718_v35  ;;  %3342 = vmatmul.f32.gmra.mxu1 %v5741_v16  ;;  %v5923_v13 = vpop.f32.mrf.mxu3  ;;  %v5928_v37 = vpop.f32.mrf.mxu0 }
 0x24a   : > { %6814 = vst [vmem:[#allocation6_spill] sm:$0xff] %v5923_v13 }
 0x24b   : > { %3401 = vmatmul.f32.gmra.mxu2 %v5733_v7 }
 0x24d   : > { %3452 = vmatmul.f32.gmra.mxu3 %v5733_v7 }
 0x251   : > { %3277 = vmatmul.f32.gmra.mxu0 %v5737_v11  ;;  %3348 = vmatmul.f32.gmra.mxu1 %v5760_v3  ;;  %v5933_v42 = vpop.f32.mrf.mxu3 }
 0x253   : > { %3405 = vmatmul.f32.gmra.mxu2 %v5752_v48 }
 0x255   : > { %3456 = vmatmul.f32.gmra.mxu3 %v5752_v48 }
 0x256   : > { %v2848_v41 = vpop.f32.mrf.mxu1 }
 0x259   : > { %3282 = vmatmul.f32.gmra.mxu0 %v5756_v51  ;;  %3354 = vmatmul.f32.gmra.mxu1 %v5787_v59 }
 0x25b   : > { %3409 = vmatmul.f32.gmra.mxu2 %v5779_v43 }
 0x25d   : > { %3460 = vmatmul.f32.gmra.mxu3 %v5779_v43 }
 0x25e   : > { %v2789_v38 = vpop.f32.mrf.mxu0  ;;  %v2909_v53 = vpop.f32.mrf.mxu2 }
 0x25f   : > { %v2849_v2 = vadd.f32 %v2848_v41, %v2789_v38  ;;  %v5939_v5 = vpop.f32.mrf.mxu1 }
 0x260   : > { %v2976_v1 = vpop.f32.mrf.mxu3 }
 0x261   : > { %v2910_v4 = vadd.f32 %v2909_v53, %v2849_v2  ;;  %3287 = vmatmul.f32.gmra.mxu0 %v5783_v49  ;;  %3579 = vmatmul.f32.vlgmr.msra.gmra.mxu1 %v5674_v26 }
 0x263   : > { %v5943_v54 = vadd.f32 %v2976_v1, %v2910_v4  ;;  %3633 = vmatmul.f32.vlgmr.msra.gmra.mxu2 %v5679_v28  ;;  %v2680_v4 = vld [vmem:[#allocation2 + $0x48] sm:$0xff] }
 0x265   : > { %3693 = vmatmul.f32.vlgmr.msra.gmra.mxu3 %v5682_v32 }
 0x266   : > { %v5947_v13 = vpop.f32.mrf.mxu0  ;;  %v5949_v31 = vpop.f32.mrf.mxu2 }
 0x267   : > { %v5951_v20 = vpop.f32.mrf.mxu1 }
 0x268   : > { %v5953_v41 = vpop.f32.mrf.mxu3 }
 0x269   : > { %3492 = vmatmul.f32.vlgmr.msra.gmra.mxu0 %v5688_v10  ;;  %3583 = vmatmul.f32.gmra.mxu1 %v5695_v56 }
 0x26b   : > { %3638 = vmatmul.f32.gmra.mxu2 %v5699_v60 }
 0x26d   : > { %3699 = vmatmul.f32.gmra.mxu3 %v5703_v62 }
 0x26e   : > { %v5959_v38 = vpop.f32.mrf.mxu0  ;;  %v5961_v28 = vpop.f32.mrf.mxu2 }
 0x26f   : > { %v5963_v32 = vpop.f32.mrf.mxu1 }
 0x270   : > { %v5965_v53 = vpop.f32.mrf.mxu3 }
 0x271   : > { %3500 = vmatmul.f32.gmra.mxu0 %v5708_v9  ;;  %3587 = vmatmul.f32.gmra.mxu1 %v5714_v34 }
 0x273   : > { %3643 = vmatmul.f32.gmra.mxu2 %v5718_v35 }
 0x275   : > { %3705 = vmatmul.f32.gmra.mxu3 %v5722_v40 }
 0x276   : > { %v5971_v10 = vpop.f32.mrf.mxu0  ;;  %v5973_v60 = vpop.f32.mrf.mxu2 }
 0x277   : > { %v5975_v62 = vpop.f32.mrf.mxu1 }
 0x278   : > { %6815 = vst [vmem:[#allocation7_spill] sm:$0xff] %v5975_v62  ;;  %v5977_v2 = vpop.f32.mrf.mxu3 }
 0x279   : > { %6816 = vst [vmem:[#allocation8_spill] sm:$0xff] %v5977_v2  ;;  %3508 = vmatmul.f32.gmra.mxu0 %v5727_v47  ;;  %3591 = vmatmul.f32.gmra.mxu1 %v5733_v7 }
 0x27b   : > { %3648 = vmatmul.f32.gmra.mxu2 %v5737_v11 }
 0x27d   : > { %3711 = vmatmul.f32.gmra.mxu3 %v5741_v16 }
 0x27e   : > { %v5983_v9 = vpop.f32.mrf.mxu0  ;;  %v5985_v35 = vpop.f32.mrf.mxu2 }
 0x27f   : > { %6817 = vst [vmem:[#allocation9_spill] sm:$0xff] %v5985_v35  ;;  %v5987_v40 = vpop.f32.mrf.mxu1 }
 0x280   : > { %6818 = vst [vmem:[#allocation10_spill] sm:$0xff] %v5987_v40  ;;  %v5989_v1 = vpop.f32.mrf.mxu3 }
 0x281   : > { %6819 = vst [vmem:[#allocation11_spill] sm:$0xff] %v5989_v1  ;;  %3516 = vmatmul.f32.gmra.mxu0 %v5746_v24  ;;  %3595 = vmatmul.f32.gmra.mxu1 %v5752_v48  ;;  %v3467_v24 = vsel %vm216_vm2, %v2680_v4, 0 }
 0x283   : > { %3653 = vmatmul.f32.gmra.mxu2 %v5756_v51  ;;  %v6008_v51 = vand.u32 4294901760, %v3467_v24 }
 0x285   : > { %3717 = vmatmul.f32.gmra.mxu3 %v5760_v3 }
 0x286   : > { %v5995_v47 = vpop.f32.mrf.mxu0  ;;  %v5997_v11 = vpop.f32.mrf.mxu2 }
 0x287   : > { %6820 = vst [vmem:[#allocation12_spill] sm:$0xff] %v5995_v47  ;;  %v5999_v16 = vpop.f32.mrf.mxu1 }
 0x288   : > { %6821 = vst [vmem:[#allocation13_spill] sm:$0xff] %v5997_v11  ;;  %v6001_v35 = vpop.f32.mrf.mxu3 }
 0x289   : > { %6822 = vst [vmem:[#allocation14_spill] sm:$0xff] %v5999_v16  ;;  %3524 = vmatmul.f32.gmra.mxu0 %v5765_v63  ;;  %3599 = vmatmul.f32.gmra.mxu1 %v5779_v43  ;;  %v3544_v63 = vsub.f32 %v3467_v24, %v6008_v51 }
 0x28a   : > { %6823 = vst [vmem:[#allocation15_spill] sm:$0xff] %v6001_v35 }
 0x28b   : > { %3658 = vmatmul.f32.gmra.mxu2 %v5783_v49  ;;  %v3545_v49 = vand.u32 4294901760, %v3544_v63 }
 0x28d   : > { %3723 = vmatmul.f32.gmra.mxu3 %v5787_v59 }
 0x28e   : > { %v6010_v3 = vpop.f32.mrf.mxu0  ;;  %v6012_v11 = vpop.f32.mrf.mxu2 }
 0x28f   : > { %6824 = vst [vmem:[#allocation16_spill] sm:$0xff] %v6010_v3  ;;  %v3078_v16 = vpop.f32.mrf.mxu1 }
 0x290   : > { %6825 = vst [vmem:[#allocation17_spill] sm:$0xff] %v6012_v11  ;;  %v6014_v40 = vpop.f32.mrf.mxu3 }
 0x291   : > { %6826 = vst [vmem:[#allocation18_spill] sm:$0xff] %v6014_v40  ;;  %3532 = vmatmul.f32.gmra.mxu0 %v5792_v6  ;;  %3603 = vmatmul.f32.gmra.mxu1 %v5801_v27  ;;  %v3546_v40 = vsub.f32 %v3544_v63, %v3545_v49 }
 0x293   : > { %3663 = vmatmul.f32.gmra.mxu2 %v5806_v29  ;;  %v3547_v6 = vand.u32 4294901760, %v3546_v40 }
 0x295   : > { %3729 = vmatmul.f32.gmra.mxu3 %v5810_v22 }
 0x296   : > { %v3027_v59 = vpop.f32.mrf.mxu0  ;;  %v3160_v4 = vpop.f32.mrf.mxu2 }
 0x297   : > { %v3082_v35 = vpop.f32.mrf.mxu1 }
 0x298   : > { %v3223_v3 = vpop.f32.mrf.mxu3 }
 0x299   : > { %3540 = vmatmul.f32.gmra.mxu0 %v5816_v33  ;;  %3607 = vmatmul.f32.gmra.mxu1 %v6008_v51 }
 0x29b   : > { %3668 = vmatmul.f32.gmra.mxu2 %v3544_v63 }
 0x29d   : > { %3735 = vmatmul.f32.gmra.mxu3 %v3545_v49 }
 0x29e   : > { %v3031_v11 = vpop.f32.mrf.mxu0  ;;  %v3168_v1 = vpop.f32.mrf.mxu2 }
 0x29f   : > { %v3032_v24 = vadd.f32 %v3031_v11, %v5943_v54  ;;  %v6024_v29 = vpop.f32.mrf.mxu1 }
 0x2a0   : > { %v3227_v22 = vpop.f32.mrf.mxu3 }
 0x2a1   : > { %v3083_v47 = vadd.f32 %v3082_v35, %v3032_v24  ;;  %3548 = vmatmul.f32.gmra.mxu0 %v3547_v6  ;;  %3813 = vmatmul.f32.vlgmr.msrb.gmra.mxu1 %v5674_v26 }
 0x2a6   : > { %v6027_v2 = vpop.f32.mrf.mxu0  ;;  %v6029_v33 = vpop.f32.mrf.mxu2 }
 0x2a7   : > { %v6031_v62 = vpop.f32.mrf.mxu1 }
 0x2a8   : > { %v6033_v63 = vpop.f32.mrf.mxu3 }
 0x2a9   : > { %3762 = vmatmul.f32.vlgmr.msrb.gmra.mxu0 %v5674_v26  ;;  %3817 = vmatmul.f32.gmra.mxu1 %v5695_v56 }
 0x2ae   : > { %v6037_v54 = vpop.f32.mrf.mxu0  ;;  %v6039_v40 = vpop.f32.mrf.mxu2 }
 0x2af   : > { %6827 = vst [vmem:[#allocation19_spill] sm:$0xff] %v6039_v40  ;;  %v6041_v35 = vpop.f32.mrf.mxu1 }
 0x2b0   : > { %6828 = vst [vmem:[#allocation20_spill] sm:$0xff] %v6041_v35  ;;  %v6043_v11 = vpop.f32.mrf.mxu3 }
 0x2b1   : > { %6829 = vst [vmem:[#allocation21_spill] sm:$0xff] %v6043_v11  ;;  %3766 = vmatmul.f32.gmra.mxu0 %v5695_v56  ;;  %3821 = vmatmul.f32.gmra.mxu1 %v5714_v34  ;;  %v2845_v56 = vadd.f32 %v5921_v36, %v5928_v37 }
 0x2b6   : > { %v6047_v49 = vpop.f32.mrf.mxu0  ;;  %v6049_v6 = vpop.f32.mrf.mxu2 }
 0x2b7   : > { %6830 = vst [vmem:[#allocation22_spill] sm:$0xff] %v6047_v49  ;;  %v6051_v24 = vpop.f32.mrf.mxu1 }
 0x2b8   : > { %6831 = vst [vmem:[#allocation23_spill] sm:$0xff] %v6049_v6  ;;  %v6053_v26 = vpop.f32.mrf.mxu3 }
 0x2b9   : > { %6832 = vst [vmem:[#allocation24_spill] sm:$0xff] %v6051_v24  ;;  %3770 = vmatmul.f32.gmra.mxu0 %v5714_v34  ;;  %3825 = vmatmul.f32.gmra.mxu1 %v5733_v7 }
 0x2ba   : > { %6833 = vst [vmem:[#allocation25_spill] sm:$0xff] %v6053_v26  ;;  %v2905_v26 = vadd.f32 %v5931_v39, %v2845_v56 }
 0x2bc   : > { %v2971_v6 = vadd.f32 %v5933_v42, %v2905_v26 }
 0x2be   : > { %v6057_v40 = vpop.f32.mrf.mxu0  ;;  %v6059_v35 = vpop.f32.mrf.mxu2  ;;  %v3028_v36 = vadd.f32 %v3027_v59, %v2971_v6 }
 0x2bf   : > { %6834 = vst [vmem:[#allocation26_spill] sm:$0xff] %v6057_v40  ;;  %v6063_v11 = vpop.f32.mrf.mxu1 }
 0x2c0   : > { %6835 = vst [vmem:[#allocation27_spill] sm:$0xff] %v6059_v35  ;;  %v6065_v49 = vpop.f32.mrf.mxu3 }
 0x2c1   : > { %6836 = vst [vmem:[#allocation28_spill] sm:$0xff] %v6063_v11  ;;  %3774 = vmatmul.f32.gmra.mxu0 %v5733_v7  ;;  %3829 = vmatmul.f32.gmra.mxu1 %v5752_v48  ;;  %v3079_v7 = vadd.f32 %v3078_v16, %v3028_v36 }
 0x2c6   : > { %v6070_v34 = vpop.f32.mrf.mxu0  ;;  %v6072_v24 = vpop.f32.mrf.mxu2 }
 0x2c7   : > { %6837 = vst [vmem:[#allocation29_spill] sm:$0xff] %v6072_v24  ;;  %v6075_v35 = vpop.f32.mrf.mxu1  ;;  %v3161_v24 = vadd.f32 %v3160_v4, %v3079_v7 }
 0x2c8   : > { %6838 = vst [vmem:[#allocation30_spill] sm:$0xff] %v6075_v35  ;;  %v6077_v40 = vpop.f32.mrf.mxu3 }
 0x2c9   : > { %6839 = vst [vmem:[#allocation31_spill] sm:$0xff] %v6077_v40  ;;  %3778 = vmatmul.f32.gmra.mxu0 %v5752_v48  ;;  %3833 = vmatmul.f32.gmra.mxu1 %v5779_v43  ;;  %v3224_v42 = vadd.f32 %v3223_v3, %v3161_v24  ;;  %v3169_v40 = vadd.f32 %v3168_v1, %v3083_v47 }
 0x2ce   : > { %v6081_v37 = vpop.f32.mrf.mxu0  ;;  %v6083_v11 = vpop.f32.mrf.mxu2 }
 0x2cf   : > { %6840 = vst [vmem:[#allocation32_spill] sm:$0xff] %v6081_v37  ;;  %v3349_v39 = vpop.f32.mrf.mxu1 }
 0x2d0   : > { %6841 = vst [vmem:[#allocation33_spill] sm:$0xff] %v6083_v11  ;;  %v6085_v56 = vpop.f32.mrf.mxu3  ;;  %v3228_v11 = vadd.f32 %v3227_v22, %v3169_v40 }
 0x2d1   : > { %6842 = vst [vmem:[#allocation34_spill] sm:$0xff] %v6085_v56  ;;  %3782 = vmatmul.f32.gmra.mxu0 %v5779_v43  ;;  %3837 = vmatmul.f32.gmra.mxu1 %v5801_v27 }
 0x2d6   : > { %v3283_v26 = vpop.f32.mrf.mxu0  ;;  %v3406_v48 = vpop.f32.mrf.mxu2 }
 0x2d7   : > { %v3284_v59 = vadd.f32 %v3283_v26, %v3224_v42  ;;  %v3355_v6 = vpop.f32.mrf.mxu1 }
 0x2d8   : > { %v3457_v16 = vpop.f32.mrf.mxu3 }
 0x2d9   : > { %v3350_v35 = vadd.f32 %v3349_v39, %v3284_v59  ;;  %3786 = vmatmul.f32.gmra.mxu0 %v5801_v27  ;;  %3841 = vmatmul.f32.gmra.mxu1 %v6008_v51 }
 0x2db   : > { %v3407_v36 = vadd.f32 %v3406_v48, %v3350_v35 }
 0x2dd   : > { %v6091_v56 = vadd.f32 %v3457_v16, %v3407_v36  ;;  %v2821_v36 = vadd.f32 %v5851_v44, %v5856_v46 }
 0x2de   : > { %v3288_v4 = vpop.f32.mrf.mxu0  ;;  %v3410_v3 = vpop.f32.mrf.mxu2 }
 0x2df   : > { %6843 = vst [vmem:[#allocation35_spill] sm:$0xff] %v6091_v56  ;;  %v3289_v43 = vadd.f32 %v3288_v4, %v3228_v11  ;;  %v3580_v7 = vpop.f32.mrf.mxu1 }
 0x2e0   : > { %v3461_v42 = vpop.f32.mrf.mxu3 }
 0x2e1   : > { %v3356_v37 = vadd.f32 %v3355_v6, %v3289_v43  ;;  %3790 = vmatmul.f32.gmra.mxu0 %v6008_v51  ;;  %v3892_v51 = vld [vmem:[%s6808_s2 + $0x78] sm:$0xff] }
 0x2e3   : > { %v3411_v24 = vadd.f32 %v3410_v3, %v3356_v37  ;;  %v6113_v37 = vand.u32 4294901760, %v3892_v51  ;;  %v2875_v3 = vadd.f32 %v5854_v45, %v2821_v36  ;;  %v2829_v45 = vadd.f32 %v5873_v58, %v5880_v8 }
 0x2e5   : > { %v6094_v1 = vadd.f32 %v3461_v42, %v3411_v24  ;;  %3909 = vmatpush.msrb.mxu2 %v6113_v37  ;;  %v6117_v59 = vsub.f32 %v3892_v51, %v6113_v37  ;;  %v2935_v24 = vadd.f32 %v5860_v52, %v2875_v3  ;;  %v2825_v42 = vadd.f32 %v5858_v50, %v5868_v55 }
 0x2e6   : > { %v3493_v47 = vpop.f32.mrf.mxu0  ;;  %v3634_v44 = vpop.f32.mrf.mxu2 }
 0x2e7   : > { %6844 = vst [vmem:[#allocation36_spill] sm:$0xff] %v6094_v1  ;;  %v6096_v27 = vpop.f32.mrf.mxu1  ;;  %v6811_v6 = vand.u32 4294901760, %v6117_v59  ;;  %v3004_v1 = vadd.f32 %v5947_v13, %v2935_v24 }
 0x2e8   : > { %v3694_v52 = vpop.f32.mrf.mxu3 }
 0x2e9   : > { %v3940_v16 = vsub.f32 %v6117_v59, %v6811_v6  ;;  %v2880_v6 = vadd.f32 %v5871_v61, %v2825_v42  ;;  %v3055_v46 = vadd.f32 %v5939_v5, %v3004_v1  ;;  %v3891_v61 = vld [vmem:[%s6808_s2 + $0x70] sm:$0xff] }
 0x2ea   : > { %v6154_v5 = vand.u32 4294901760, %v3891_v61 }
 0x2eb   : > { %v3941_v43 = vand.u32 4294901760, %v3940_v16  ;;  %v2941_v16 = vadd.f32 %v5875_v0, %v2880_v6  ;;  %v3113_v55 = vadd.f32 %v5949_v31, %v3055_v46  ;;  %v3581_v6 = vadd.f32 %v3580_v7, %v3493_v47 }
 0x2ec   : > { %3911 = vmatpush.msrb.mxu2 %v6154_v5  ;;  %v6161_v31 = vsub.f32 %v3891_v61, %v6154_v5  ;;  %v2837_v47 = vadd.f32 %v5897_v19, %v5904_v23 }
 0x2ed   : > { %3942 = vmatpush.msrb.mxu3 %v3941_v43  ;;  %v3008_v36 = vadd.f32 %v5959_v38, %v2941_v16  ;;  %v2885_v43 = vadd.f32 %v5883_v12, %v2829_v45  ;;  %v3200_v58 = vadd.f32 %v5953_v41, %v3113_v55  ;;  %v2833_v38 = vadd.f32 %v5885_v14, %v5892_v57 }
 0x2ee   : > { %v6098_v39 = vpop.f32.mrf.mxu0  ;;  %v3639_v8 = vpop.f32.mrf.mxu2  ;;  %v3945_v41 = vand.u32 4294901760, %v6161_v31 }
 0x2ef   : > { %v6100_v35 = vpop.f32.mrf.mxu1  ;;  %v3059_v0 = vadd.f32 %v5951_v20, %v3008_v36  ;;  %v2947_v12 = vadd.f32 %v5887_v15, %v2885_v43  ;;  %v3254_v1 = vadd.f32 %v6027_v2, %v3200_v58  ;;  %v2890_v57 = vadd.f32 %v5895_v18, %v2833_v38  ;;  %v6848_v38 = vld [vmem:[#allocation5_spill] sm:$0xff] }
 0x2f0   : > { %v3700_v42 = vpop.f32.mrf.mxu3  ;;  %v3946_v46 = vsub.f32 %v6161_v31, %v3945_v41  ;;  %v3635_v2 = vadd.f32 %v3634_v44, %v3581_v6  ;;  %v2895_v43 = vadd.f32 %v5907_v17, %v2837_v47  ;;  %v3890_v17 = vld [vmem:[%s6808_s2 + $0x68] sm:$0xff] }
 0x2f1   : > { %v3121_v20 = vadd.f32 %v5961_v28, %v3059_v0  ;;  %v3012_v24 = vadd.f32 %v5971_v10, %v2947_v12  ;;  %v3314_v15 = vadd.f32 %v6024_v29, %v3254_v1  ;;  %v2953_v10 = vadd.f32 %v5899_v21, %v2890_v57  ;;  %v6849_v1 = vld [vmem:[#allocation19_spill] sm:$0xff] }
 0x2f2   : > { %v3947_v28 = vand.u32 4294901760, %v3946_v46  ;;  %v3695_v36 = vadd.f32 %v3694_v52, %v3635_v2  ;;  %v3585_v29 = vadd.f32 %v6096_v27, %v6098_v39  ;;  %v2841_v21 = vadd.f32 %v5909_v25, %v5916_v30  ;;  %v6846_v25 = vld [vmem:[#allocation4_spill] sm:$0xff] }
 0x2f3   : > { %v3204_v7 = vadd.f32 %v5965_v53, %v3121_v20  ;;  %v3063_v16 = vadd.f32 %v5963_v32, %v3012_v24  ;;  %v3383_v18 = vadd.f32 %v6029_v33, %v3314_v15  ;;  %v3016_v53 = vadd.f32 %v5983_v9, %v2953_v10  ;;  %v6194_v9 = vld [vmem:[%s6809_s3 + $0x1] ss:$0 sm:$0xff] }
 0x2f4   : > { %3948 = vmatpush.msrb.mxu3 %v3947_v28  ;;  %v3640_v52 = vadd.f32 %v3639_v8, %v3585_v29  ;;  %v6200_v0 = vand.u32 4294901760, %v3890_v17  ;;  %v2959_v30 = vadd.f32 %v6846_v25, %v2895_v43  ;;  %v3889_v8 = vld [vmem:[%s6808_s2 + $0x60] sm:$0xff]  ;;  %v2900_v12 = vadd.f32 %v6848_v38, %v2841_v21 }
 0x2f5   : > { %v3259_v45 = vadd.f32 %v6037_v54, %v3204_v7  ;;  %v3129_v19 = vadd.f32 %v5973_v60, %v3063_v16  ;;  %v3434_v33 = vadd.f32 %v6033_v63, %v3383_v18  ;;  %v6845_v60 = vld [vmem:[#allocation7_spill] sm:$0xff]  ;;  %v6213_v24 = vand.u32 4294901760, %v3889_v8  ;;  %v6851_v7 = vld [vmem:[#allocation9_spill] sm:$0xff]  ;;  %v6857_v25 = vld [vmem:[#allocation10_spill] sm:$0xff] }
 0x2f6   : > { %v6102_v22 = vpop.f32.mrf.mxu0  ;;  %v3644_v44 = vpop.f32.mrf.mxu2  ;;  %v3067_v39 = vadd.f32 %v6845_v60, %v3016_v53  ;;  %3913 = vmatpush.msrb.mxu2 %v6200_v0  ;;  %v6211_v20 = vsub.f32 %v3890_v17, %v6200_v0  ;;  %v3701_v46 = vadd.f32 %v3700_v42, %v3640_v52 }
 0x2f7   : > { %v6104_v40 = vpop.f32.mrf.mxu1  ;;  %v3320_v54 = vadd.f32 %v6031_v62, %v3259_v45  ;;  %v6847_v62 = vld [vmem:[#allocation8_spill] sm:$0xff]  ;;  %v3589_v15 = vadd.f32 %v6100_v35, %v6102_v22  ;;  %v6223_v10 = vsub.f32 %v3889_v8, %v6213_v24  ;;  %v6853_v35 = vld [vmem:[#allocation21_spill] sm:$0xff] }
 0x2f8   : > { %v3706_v61 = vpop.f32.mrf.mxu3  ;;  %v3208_v63 = vadd.f32 %v6847_v62, %v3129_v19  ;;  %v3137_v28 = vadd.f32 %v6851_v7, %v3067_v39  ;;  %v3951_v16 = vand.u32 4294901760, %v6211_v20  ;;  %3915 = vmatpush.msrb.mxu2 %v6213_v24  ;;  %v6852_v45 = vld [vmem:[#allocation12_spill] sm:$0xff] }
 0x2f9   : > { %v3387_v6 = vadd.f32 %v6849_v1, %v3320_v54  ;;  %v3020_v18 = vadd.f32 %v6852_v45, %v2959_v30  ;;  %v3957_v43 = vand.u32 4294901760, %v6223_v10  ;;  %v6854_v19 = vld [vmem:[#allocation20_spill] sm:$0xff]  ;;  %v3645_v21 = vadd.f32 %v3644_v44, %v3589_v15  ;;  %v6861_v15 = vld [vmem:[#allocation13_spill] sm:$0xff] }
 0x2fa   : > { %3980 = vmatpush.msra.mxu2 %v6117_v59  ;;  %v6858_v44 = vld [vmem:[#allocation16_spill] sm:$0xff] }
 0x2fb   : > { %v3438_v22 = vadd.f32 %v6853_v35, %v3387_v6  ;;  %v3958_v39 = vsub.f32 %v6223_v10, %v3957_v43  ;;  %v3071_v30 = vadd.f32 %v6857_v25, %v3020_v18  ;;  %v3707_v6 = vadd.f32 %v3706_v61, %v3645_v21  ;;  %v6863_v18 = vld [vmem:[#allocation24_spill] sm:$0xff] }
 0x2fc   : > { %3983 = vmatpush.msra.mxu2 %v6161_v31 }
 0x2fd   : > { %v3959_v38 = vand.u32 4294901760, %v3958_v39 }
 0x2fe   : > { %v6106_v11 = vpop.f32.mrf.mxu0  ;;  %3986 = vmatpush.msra.mxu2 %v6211_v20 }
 0x2ff   : > { %v6108_v26 = vpop.f32.mrf.mxu1 }
 0x300   : > { %v3712_v62 = vpop.f32.mrf.mxu3  ;;  %3989 = vmatpush.msra.mxu2 %v6223_v10 }
 0x306   : > { %v6120_v48 = vpop.f32.mrf.mxu0 }
 0x307   : > { %v6127_v4 = vpop.f32.mrf.mxu1 }
 0x30e   : > { %v6133_v51 = vpop.f32.mrf.mxu0 }
 0x30f   : > { %v6136_v56 = vpop.f32.mrf.mxu1 }
 0x316   : > { %v6144_v50 = vpop.f32.mrf.mxu0 }
 0x317   : > { %v6147_v13 = vpop.f32.mrf.mxu1 }
 0x31e   : > { %v6166_v3 = vpop.f32.mrf.mxu0 }
 0x31f   : > { %v3814_v14 = vpop.f32.mrf.mxu1 }
 0x326   : > { %v3763_v55 = vpop.f32.mrf.mxu0 }
 0x327   : > { %v3764_v23 = vadd.f32 %v3763_v55, %v3695_v36  ;;  %v3818_v32 = vpop.f32.mrf.mxu1  ;;  %v3649_v36 = vpop.f32.mrf.mxu2  ;;  %v3952_v55 = vsub.f32 %v6211_v20, %v3951_v16 }
 0x329   : > { %v3815_v27 = vadd.f32 %v3814_v14, %v3764_v23  ;;  %v6850_v14 = vld [vmem:[#allocation22_spill] sm:$0xff]  ;;  %v3953_v60 = vand.u32 4294901760, %v3952_v55  ;;  %v4275_v55 = vld [vmem:[%s6808_s2 + $0x98] sm:$0xff] }
 0x32a   : > { %v3264_v57 = vadd.f32 %v6850_v14, %v3208_v63  ;;  %v3593_v14 = vadd.f32 %v6104_v40, %v6106_v11 }
 0x32b   : > { %v3845_v58 = vadd.f32 %v3815_v27, %v3434_v33  ;;  %v6855_v33 = vld [vmem:[#allocation6_spill] sm:$0xff]  ;;  %v6856_v27 = vld [vmem:[#allocation11_spill] sm:$0xff]  ;;  %3954 = vmatpush.msrb.mxu3 %v3953_v60 }
 0x32c   : > { %v3326_v23 = vadd.f32 %v6854_v19, %v3264_v57  ;;  %v2965_v52 = vadd.f32 %v6855_v33, %v2900_v12  ;;  %v3212_v17 = vadd.f32 %v6856_v27, %v3137_v28  ;;  %v6860_v12 = vld [vmem:[#allocation23_spill] sm:$0xff]  ;;  %v3650_v40 = vadd.f32 %v3649_v36, %v3593_v14  ;;  %v4274_v36 = vld [vmem:[%s6808_s2 + $0x90] sm:$0xff]  ;;  %v6866_v33 = vld [vmem:[#allocation17_spill] sm:$0xff] }
 0x32d   : > { %v3854_v2 = vadd.f32 %v6194_v9, %v3845_v58  ;;  %3960 = vmatpush.msrb.mxu3 %v3959_v38  ;;  %v6259_v19 = vand.u32 4294901760, %v4275_v55  ;;  %v6272_v60 = vand.u32 4294901760, %v4274_v36 }
 0x32e   : > { %v3767_v47 = vpop.f32.mrf.mxu0  ;;  %v3024_v58 = vadd.f32 %v6858_v44, %v2965_v52  ;;  %v3391_v1 = vadd.f32 %v6860_v12, %v3326_v23  ;;  %v6865_v23 = vld [vmem:[#allocation15_spill] sm:$0xff]  ;;  %v3713_v25 = vadd.f32 %v3712_v62, %v3650_v40  ;;  %v4272_v62 = vld [vmem:[%s6808_s2 + $0x80] sm:$0xff]  ;;  %v6871_v40 = vld [vmem:[#allocation29_spill] sm:$0xff] }
 0x32f   : > { %v3862_v42 = vmax.f32 %v3854_v2, 0.0  ;;  %v3768_v29 = vadd.f32 %v3767_v47, %v3701_v46  ;;  %v3822_v53 = vpop.f32.mrf.mxu1  ;;  %v3145_v2 = vadd.f32 %v6861_v15, %v3071_v30  ;;  %4009 = vmatpush.msra.mxu3 %v6113_v37  ;;  %v6862_v47 = vld [vmem:[#allocation14_spill] sm:$0xff]  ;;  %v3654_v11 = vpop.f32.mrf.mxu2  ;;  %4452 = vmatpush.msra.mxu1 %v6259_v19  ;;  %v3597_v30 = vadd.f32 %v6108_v26, %v6120_v48  ;;  %v6869_v15 = vld [vmem:[#allocation28_spill] sm:$0xff] }
 0x330   : > { %v3075_v45 = vadd.f32 %v6862_v47, %v3024_v58  ;;  %v4273_v58 = vld [vmem:[%s6808_s2 + $0x88] sm:$0xff]  ;;  %v6284_v38 = vsub.f32 %v4274_v36, %v6272_v60  ;;  %v6868_v12 = vld [vmem:[#allocation18_spill] sm:$0xff]  ;;  %v6870_v47 = vld [vmem:[#allocation32_spill] sm:$0xff] }
 0x331   : > { %3871 = vst.msk [vmem:[#allocation3] sm:$0xff] %vm3870_vm3, %v3862_v42  ;;  %v3819_v54 = vadd.f32 %v3818_v32, %v3768_v29  ;;  %v6859_v32 = vld [vmem:[#allocation26_spill] sm:$0xff]  ;;  %v6864_v29 = vld [vmem:[#allocation25_spill] sm:$0xff]  ;;  %4011 = vmatpush.msra.mxu3 %v6154_v5  ;;  %v3216_v21 = vadd.f32 %v6865_v23, %v3145_v2  ;;  %4454 = vmatpush.msra.mxu1 %v6272_v60 }
 0x332   : > { %v3269_v8 = vadd.f32 %v6859_v32, %v3212_v17  ;;  %v3442_v35 = vadd.f32 %v6864_v29, %v3391_v1  ;;  %v3153_v52 = vadd.f32 %v6866_v33, %v3075_v45  ;;  %v6269_v17 = vsub.f32 %v4275_v55, %v6259_v19 }
 0x333   : > { %v3846_v63 = vadd.f32 %v3819_v54, %v3438_v22  ;;  %4013 = vmatpush.msra.mxu3 %v6200_v0  ;;  %v3274_v39 = vadd.f32 %v6070_v34, %v3216_v21  ;;  %v6287_v34 = vand.u32 4294901760, %v4273_v58  ;;  %v3601_v55 = vadd.f32 %v6127_v4, %v6133_v51  ;;  %v6872_v21 = vld [vmem:[#allocation30_spill] sm:$0xff]  ;;  %v3884_v51 = vld [vmem:[%s6808_s2 + $0x50] sm:$0xff] }
 0x334   : > { %v3332_v42 = vadd.f32 %v6863_v18, %v3269_v8  ;;  %v4322_v8 = vand.u32 4294901760, %v6269_v17  ;;  %v3220_v1 = vadd.f32 %v6868_v12, %v3153_v52  ;;  %v3883_v12 = vld [vmem:[%s6808_s2 + $0x48] sm:$0xff] }
 0x335   : > { %v3855_v57 = vadd.f32 %v6194_v9, %v3846_v63  ;;  %v3718_v63 = vpop.f32.mrf.mxu3  ;;  %4015 = vmatpush.msra.mxu3 %v6213_v24  ;;  %v6297_v14 = vsub.f32 %v4273_v58, %v6287_v34  ;;  %4456 = vmatpush.msra.mxu1 %v6287_v34  ;;  %v3338_v2 = vadd.f32 %v6869_v15, %v3274_v39  ;;  %v6873_v39 = vld [vmem:[#allocation31_spill] sm:$0xff] }
 0x336   : > { %v3771_v46 = vpop.f32.mrf.mxu0  ;;  %4421 = vmatpush.msra.mxu0 %v4322_v8  ;;  %v3279_v45 = vadd.f32 %v6870_v47, %v3220_v1 }
 0x337   : > { %v3863_v7 = vmax.f32 %v3855_v57, 0.0  ;;  %v3772_v28 = vadd.f32 %v3771_v46, %v3707_v6  ;;  %v3826_v61 = vpop.f32.mrf.mxu1  ;;  %v4328_v6 = vand.u32 4294901760, %v6284_v38  ;;  %v6300_v57 = vand.u32 4294901760, %v4272_v62 }
 0x339   : > { %3872 = vst.msk [vmem:[#allocation3 + $0x8] sm:$0xff] %vm3870_vm3, %v3863_v7  ;;  %v3823_v22 = vadd.f32 %v3822_v53, %v3772_v28  ;;  %v6867_v53 = vld [vmem:[#allocation27_spill] sm:$0xff]  ;;  %v3655_v7 = vadd.f32 %v3654_v11, %v3597_v30  ;;  %4425 = vmatpush.msra.mxu0 %v4328_v6  ;;  %v6310_v29 = vsub.f32 %v4272_v62, %v6300_v57  ;;  %v6336_v62 = vand.u32 4294901760, %v3884_v51 }
 0x33a   : > { %v3395_v27 = vadd.f32 %v6867_v53, %v3332_v42  ;;  %v4334_v42 = vand.u32 4294901760, %v6297_v14  ;;  %4458 = vmatpush.msra.mxu1 %v6300_v57  ;;  %v3399_v11 = vadd.f32 %v6871_v40, %v3338_v2  ;;  %v4471_v2 = vld [vmem:[%s6808_s2 + $0xb8] sm:$0xff]  ;;  %v6357_v40 = vand.u32 4294901760, %v3883_v12 }
 0x33b   : > { %v3847_v54 = vadd.f32 %v3823_v22, %v3442_v35  ;;  %v3719_v22 = vadd.f32 %v3718_v63, %v3655_v7  ;;  %v6874_v63 = vld [vmem:[#allocation33_spill] sm:$0xff]  ;;  %v6875_v7 = vld [vmem:[#allocation34_spill] sm:$0xff] }
 0x33c   : > { %v3446_v46 = vadd.f32 %v6065_v49, %v3395_v27  ;;  %v3659_v49 = vpop.f32.mrf.mxu2  ;;  %4429 = vmatpush.msra.mxu0 %v4334_v42  ;;  %v3885_v27 = vld [vmem:[%s6808_s2 + $0x58] sm:$0xff] }
 0x33d   : > { %v3856_v44 = vadd.f32 %v6194_v9, %v3847_v54  ;;  %v3344_v54 = vadd.f32 %v6872_v21, %v3279_v45  ;;  %v3724_v33 = vpop.f32.mrf.mxu3  ;;  %v3660_v30 = vadd.f32 %v3659_v49, %v3601_v55  ;;  %v6332_v58 = vand.u32 4294901760, %v3885_v27 }
 0x33e   : > { %v3775_v32 = vpop.f32.mrf.mxu0  ;;  %v6352_v45 = vand.u32 4294901760, %v4471_v2 }
 0x33f   : > { %v3864_v26 = vmax.f32 %v3856_v44, 0.0  ;;  %v3776_v48 = vadd.f32 %v3775_v32, %v3713_v25  ;;  %v3830_v18 = vpop.f32.mrf.mxu1  ;;  %v3450_v25 = vadd.f32 %v6873_v39, %v3399_v11  ;;  %v3403_v44 = vadd.f32 %v6874_v63, %v3344_v54 }
 0x340   : > { %v3725_v1 = vadd.f32 %v3724_v33, %v3660_v30  ;;  %v6365_v54 = vsub.f32 %v3884_v51, %v6336_v62  ;;  %4588 = vmatpush.msrb.mxu1 %v6352_v45 }
 0x341   : > { %3873 = vst.msk [vmem:[#allocation3 + $0x10] sm:$0xff] %vm3870_vm3, %v3864_v26  ;;  %v3827_v28 = vadd.f32 %v3826_v61, %v3776_v48  ;;  %v4340_v61 = vand.u32 4294901760, %v6310_v29  ;;  %v3605_v26 = vadd.f32 %v6136_v56, %v6144_v50  ;;  %v6347_v56 = vsub.f32 %v3885_v27, %v6332_v58  ;;  %v3882_v50 = vld [vmem:[%s6808_s2 + $0x40] sm:$0xff] }
 0x342   : > { %v6374_v39 = vand.u32 4294901760, %v3882_v50 }
 0x343   : > { %v3848_v35 = vadd.f32 %v3827_v28, %v3446_v46  ;;  %4433 = vmatpush.msra.mxu0 %v4340_v61  ;;  %v3454_v28 = vadd.f32 %v6875_v7, %v3403_v44  ;;  %v4127_v63 = vand.u32 4294901760, %v6347_v56  ;;  %v6387_v44 = vsub.f32 %v3883_v12, %v6357_v40 }
 0x344   : > { %v3664_v46 = vpop.f32.mrf.mxu2  ;;  %v6403_v7 = vsub.f32 %v3882_v50, %v6374_v39 }
 0x345   : > { %v3857_v23 = vadd.f32 %v6194_v9, %v3848_v35  ;;  %v3665_v55 = vadd.f32 %v3664_v46, %v3605_v26  ;;  %v3609_v26 = vadd.f32 %v6147_v13, %v6166_v3  ;;  %v4128_v50 = vsub.f32 %v6347_v56, %v4127_v63 }
 0x346   : > { %v3779_v36 = vpop.f32.mrf.mxu0 }
 0x347   : > { %v3865_v52 = vmax.f32 %v3857_v23, 0.0  ;;  %v3780_v53 = vadd.f32 %v3779_v36, %v3719_v22  ;;  %v3834_v48 = vpop.f32.mrf.mxu1  ;;  %v4469_v22 = vld [vmem:[%s6808_s2 + $0xa8] sm:$0xff]  ;;  %v6368_v36 = vsub.f32 %v4471_v2, %v6352_v45  ;;  %v4133_v2 = vand.u32 4294901760, %v6365_v54 }
 0x348   : > { %v3886_v23 = vld [vmem:[#allocation3 + $0x10] sm:$0xff]  ;;  %v6371_v33 = vand.u32 4294901760, %v4469_v22 }
 0x349   : > { %3874 = vst.msk [vmem:[#allocation3 + $0x18] sm:$0xff] %vm3870_vm3, %v3865_v52  ;;  %v3831_v4 = vadd.f32 %v3830_v18, %v3780_v53  ;;  %v4470_v18 = vld [vmem:[%s6808_s2 + $0xb0] sm:$0xff]  ;;  %v3730_v52 = vpop.f32.mrf.mxu3  ;;  %4559 = vmatpush.msrb.mxu0 %v6368_v36 }
 0x34a   : > { %v6359_v11 = vand.u32 4294901760, %v4470_v18  ;;  %v6381_v30 = vsub.f32 %v4469_v22, %v6371_v33  ;;  %v3731_v46 = vadd.f32 %v3730_v52, %v3665_v55  ;;  %v4145_v52 = vand.u32 4294901760, %v6403_v7 }
 0x34b   : > { %v3849_v32 = vadd.f32 %v3831_v4, %v3450_v25 }
 0x34c   : > { %v6377_v25 = vsub.f32 %v4470_v18, %v6359_v11  ;;  %4590 = vmatpush.msrb.mxu1 %v6359_v11 }
 0x34d   : > { %v3858_v15 = vadd.f32 %v6194_v9, %v3849_v32  ;;  %v4468_v32 = vld [vmem:[%s6808_s2 + $0xa0] sm:$0xff] }
 0x34e   : > { %v3783_v47 = vpop.f32.mrf.mxu0  ;;  %4562 = vmatpush.msrb.mxu0 %v6377_v25  ;;  %4592 = vmatpush.msrb.mxu1 %v6371_v33 }
 0x34f   : > { %v3866_v49 = vmax.f32 %v3858_v15, 0.0  ;;  %v3784_v35 = vadd.f32 %v3783_v47, %v3725_v1  ;;  %v6397_v1 = vand.u32 4294901760, %v4468_v32  ;;  %v3669_v15 = vpop.f32.mrf.mxu2 }
 0x350   : > { %v3887_v21 = vld [vmem:[#allocation3 + $0x18] sm:$0xff]  ;;  %4565 = vmatpush.msrb.mxu0 %v6381_v30  ;;  %v3670_v22 = vadd.f32 %v3669_v15, %v3609_v26 }
 0x351   : > { %3875 = vst.msk [vmem:[#allocation3 + $0x20] sm:$0xff] %vm3870_vm3, %v3866_v49  ;;  %v3835_v53 = vadd.f32 %v3834_v48, %v3784_v35  ;;  %v3888_v27 = vmax.f32 %v3886_v23, %v3887_v21  ;;  %v6409_v3 = vsub.f32 %v4468_v32, %v6397_v1  ;;  %v4139_v35 = vand.u32 4294901760, %v6387_v44  ;;  %4594 = vmatpush.msrb.mxu1 %v6397_v1  ;;  %v3736_v23 = vpop.f32.mrf.mxu3 }
 0x352   : > { %v4129_v32 = vand.u32 4294901760, %v4128_v50 }
 0x353   : > { %v3850_v4 = vadd.f32 %v3835_v53, %v3454_v28  ;;  %v3894_v51 = vsel %vm3870_vm3, %v3888_v27, 0  ;;  %v3838_v28 = vpop.f32.mrf.mxu1  ;;  %4568 = vmatpush.msrb.mxu0 %v6409_v3  ;;  %v3880_v27 = vld [vmem:[#allocation3 + $0x8] sm:$0xff]  ;;  %v4140_v26 = vsub.f32 %v6387_v44, %v4139_v35 }
 0x354   : > { %v6394_v48 = vand.u32 4294901760, %v3894_v51 }
 0x355   : > { %v3859_v12 = vadd.f32 %v6194_v9, %v3850_v4  ;;  %v6876_v4 = vld [vmem:[#allocation35_spill] sm:$0xff] }
 0x356   : > { %v3787_v47 = vpop.f32.mrf.mxu0  ;;  %v3917_v13 = vsub.f32 %v3894_v51, %v6394_v48  ;;  %3962 = vmatmul.f32.vlgmr.msrb.gmra.mxu3 %v6394_v48 }
 0x357   : > { %v3867_v18 = vmax.f32 %v3859_v12, 0.0  ;;  %v3788_v49 = vadd.f32 %v3787_v47, %v3731_v46  ;;  %4069 = vmatpush.msrb.mxu3 %v6113_v37  ;;  %v4134_v37 = vsub.f32 %v6365_v54, %v4133_v2  ;;  %v3737_v46 = vadd.f32 %v3736_v23, %v3670_v22 }
 0x358   : > { %v3918_v55 = vand.u32 4294901760, %v3917_v13  ;;  %v4146_v47 = vsub.f32 %v6403_v7, %v4145_v52  ;;  %v6877_v22 = vand.u32 4294901760, %v6117_v59  ;;  %v4141_v23 = vand.u32 4294901760, %v4140_v26 }
 0x359   : > { %3876 = vst.msk [vmem:[#allocation3 + $0x28] sm:$0xff] %vm3870_vm3, %v3867_v18  ;;  %v3839_v21 = vadd.f32 %v3838_v28, %v3788_v49  ;;  %4071 = vmatpush.msrb.mxu3 %v6154_v5  ;;  %v3879_v5 = vld [vmem:[#allocation3] sm:$0xff]  ;;  %v4135_v28 = vand.u32 4294901760, %v4134_v37 }
 0x35a   : > { %v3919_v53 = vsub.f32 %v3917_v13, %v3918_v55  ;;  %v3881_v18 = vmax.f32 %v3879_v5, %v3880_v27  ;;  %v4147_v27 = vand.u32 4294901760, %v4146_v47  ;;  %v4329_v5 = vsub.f32 %v6284_v38, %v4328_v6 }
 0x35b   : > { %v3851_v51 = vadd.f32 %v3839_v21, %v6876_v4  ;;  %4073 = vmatpush.msrb.mxu3 %v6200_v0  ;;  %v3842_v0 = vpop.f32.mrf.mxu1  ;;  %v4341_v47 = vsub.f32 %v6310_v29, %v4340_v61  ;;  %v4518_v61 = vand.u32 4294901760, %v6368_v36 }
 0x35c   : > { %v3920_v15 = vand.u32 4294901760, %v3919_v53  ;;  %v4269_v53 = vld [vmem:[#allocation3 + $0x20] sm:$0xff]  ;;  %v4330_v6 = vand.u32 4294901760, %v4329_v5 }
 0x35d   : > { %v3860_v12 = vadd.f32 %v6194_v9, %v3851_v51  ;;  %4075 = vmatpush.msrb.mxu3 %v6213_v24  ;;  %v6878_v51 = vld [vmem:[#allocation36_spill] sm:$0xff] }
 0x35e   : > { %v3791_v49 = vpop.f32.mrf.mxu0  ;;  %3921 = vmatmul.f32.vlgmr.msrb.gmra.mxu2 %v3920_v15  ;;  %4019 = vmatmul.f32.vlgmr.msra.gmra.mxu3 %v3918_v55  ;;  %v4082_v55 = vsel %vm3870_vm3, %v3881_v18, 0  ;;  %v4323_v15 = vsub.f32 %v6269_v17, %v4322_v8  ;;  %v4335_v8 = vsub.f32 %v6297_v14, %v4334_v42 }
 0x35f   : > { %v3868_v50 = vmax.f32 %v3860_v12, 0.0  ;;  %v3792_v21 = vadd.f32 %v3791_v49, %v3737_v46  ;;  %4038 = vmatpush.msrb.mxu2 %v6877_v22  ;;  %4130 = vmatpush.msra.mxu3 %v4129_v32  ;;  %v6449_v26 = vand.u32 4294901760, %v4082_v55  ;;  %v4664_v49 = vld [vmem:[%s205_s14] sm:$0xff] }
 0x360   : > { %v4270_v4 = vld [vmem:[#allocation3 + $0x28] sm:$0xff]  ;;  %v4336_v42 = vand.u32 4294901760, %v4335_v8  ;;  %v4843_v8 = vld [vmem:[%s6808_s2 + $0x108] sm:$0xff] }
 0x361   : > { %3877 = vst.msk [vmem:[#allocation3 + $0x30] sm:$0xff] %vm3870_vm3, %v3868_v50  ;;  %v3843_v24 = vadd.f32 %v3842_v0, %v3792_v21  ;;  %v4271_v37 = vmax.f32 %v4269_v53, %v4270_v4  ;;  %4042 = vmatpush.msrb.mxu2 %v3945_v41  ;;  %4136 = vmatpush.msra.mxu3 %v4135_v28  ;;  %v4665_v50 = vld [vmem:[%s6808_s2 + $0xc0] sm:$0xff]  ;;  %v4670_v21 = vsel %vm4668_vm5, %v4664_v49, 0 }
 0x362   : > { %v4105_v20 = vsub.f32 %v4082_v55, %v6449_v26  ;;  %v4694_v53 = vand.u32 4294901760, %v4670_v21 }
 0x363   : > { %v3852_v46 = vadd.f32 %v3843_v24, %v6878_v51  ;;  %v6442_v59 = vsel %vm3870_vm3, %v4271_v37, 0  ;;  %4046 = vmatpush.msrb.mxu2 %v3951_v16  ;;  %4142 = vmatpush.msra.mxu3 %v4141_v23  ;;  %v4692_v23 = vand.u32 4294901760, %v4665_v50 }
 0x364   : > { %v6447_v32 = vand.u32 4294901760, %v6442_v59  ;;  %v4695_v55 = vsub.f32 %v4670_v21, %v4694_v53 }
 0x365   : > { %v3861_v31 = vadd.f32 %v6194_v9, %v3852_v46  ;;  %4050 = vmatpush.msrb.mxu2 %v3957_v43  ;;  %4148 = vmatpush.msra.mxu3 %v4147_v27  ;;  %v4106_v9 = vand.u32 4294901760, %v4105_v20  ;;  %v4724_v27 = vsub.f32 %v4665_v50, %v4692_v23 }
 0x366   : > { %3992 = vmatmul.f32.vlgmr.msra.gmra.mxu2 %v3917_v13  ;;  %4077 = vmatmul.f32.vlgmr.msrb.gmra.mxu3 %v6394_v48 }
 0x367   : > { %v3869_v41 = vmax.f32 %v3861_v31, 0.0  ;;  %4435 = vmatmul.f32.vlgmr.msra.gmra.mxu0 %v6447_v32  ;;  %4460 = vmatmul.f32.vlgmr.msra.gmra.mxu1 %v6447_v32  ;;  %v4107_v16 = vsub.f32 %v4105_v20, %v4106_v9  ;;  %v4725_v46 = vand.u32 4294901760, %v4724_v27 }
 0x368   : > { %4097 = vmatpush.msra.mxu2 %v6332_v58  ;;  %4197 = vmatpush.msrb.mxu3 %v6332_v58  ;;  %v4465_v10 = vld [vmem:[#allocation3 + $0x30] sm:$0xff] }
 0x369   : > { %3878 = vst.msk [vmem:[#allocation3 + $0x38] sm:$0xff] %vm3870_vm3, %v3869_v41  ;;  %v4108_v12 = vand.u32 4294901760, %v4107_v16 }
 0x36a   : > { %4099 = vmatpush.msra.mxu2 %v6336_v62  ;;  %4199 = vmatpush.msrb.mxu3 %v6336_v62 }
 0x36c   : > { %4101 = vmatpush.msra.mxu2 %v6357_v40  ;;  %4201 = vmatpush.msrb.mxu3 %v6357_v40 }
 0x36e   : > { %4052 = vmatmul.f32.vlgmr.msrb.gmra.mxu2 %v6394_v48  ;;  %4150 = vmatmul.f32.vlgmr.msra.gmra.mxu3 %v6449_v26 }
 0x36f   : > { %4103 = vmatpush.msra.mxu2 %v6374_v39  ;;  %4203 = vmatpush.msrb.mxu3 %v6374_v39 }
 0x370   : > { %v4466_v43 = vld [vmem:[#allocation3 + $0x38] sm:$0xff] }
 0x371   : > { %4168 = vmatpush.msrb.mxu2 %v6347_v56  ;;  %4257 = vmatpush.msra.mxu3 %v6332_v58  ;;  %v4467_v13 = vmax.f32 %v4465_v10, %v4466_v43  ;;  %v4324_v58 = vand.u32 4294901760, %v4323_v15  ;;  %v4524_v56 = vand.u32 4294901760, %v6377_v25  ;;  %v4847_v43 = vld [vmem:[%s6808_s2 + $0x128] sm:$0xff] }
 0x372   : > { %v6594_v15 = vand.u32 4294901760, %v4847_v43 }
 0x373   : > { %4171 = vmatpush.msrb.mxu2 %v6365_v54  ;;  %4259 = vmatpush.msra.mxu3 %v6336_v62  ;;  %v4473_v48 = vsel %vm3870_vm3, %v4467_v13, 0  ;;  %v6512_v54 = vsub.f32 %v6442_v59, %v6447_v32  ;;  %v4696_v59 = vand.u32 4294901760, %v4695_v55 }
 0x374   : > { %v6480_v28 = vand.u32 4294901760, %v4473_v48 }
 0x375   : > { %4174 = vmatpush.msrb.mxu2 %v6387_v44  ;;  %4261 = vmatpush.msra.mxu3 %v6357_v40  ;;  %v4530_v44 = vand.u32 4294901760, %v6381_v30  ;;  %v4697_v31 = vsub.f32 %v4695_v55, %v4696_v59 }
 0x376   : > { %4109 = vmatmul.f32.vlgmr.msra.gmra.mxu2 %v4108_v12  ;;  %4207 = vmatmul.f32.vlgmr.msrb.gmra.mxu3 %v4106_v9  ;;  %v6488_v62 = vsub.f32 %v4473_v48, %v6480_v28  ;;  %v4846_v48 = vld [vmem:[%s6808_s2 + $0x120] sm:$0xff] }
 0x377   : > { %4177 = vmatpush.msrb.mxu2 %v6403_v7  ;;  %4263 = vmatpush.msra.mxu3 %v6374_v39  ;;  %v4342_v39 = vand.u32 4294901760, %v4341_v47  ;;  %v4301_v7 = vand.u32 4294901760, %v6512_v54 }
 0x378   : > { %4571 = vmatmul.f32.vlgmr.msrb.gmra.mxu0 %v6488_v62  ;;  %v4497_v40 = vand.u32 4294901760, %v6488_v62 }
 0x379   : > { %4226 = vmatpush.msra.mxu2 %v4127_v63  ;;  %4325 = vmatpush.msrb.mxu3 %v4324_v58  ;;  %v4519_v63 = vsub.f32 %v6368_v36, %v4518_v61  ;;  %v4302_v4 = vsub.f32 %v6512_v54, %v4301_v7  ;;  %v6602_v58 = vand.u32 4294901760, %v4846_v48 }
 0x37a   : > { %4598 = vmatmul.f32.vlgmr.msrb.gmra.mxu1 %v4497_v40 }
 0x37b   : > { %4230 = vmatpush.msra.mxu2 %v4133_v2  ;;  %4331 = vmatpush.msrb.mxu3 %v4330_v6  ;;  %v4525_v2 = vsub.f32 %v6377_v25, %v4524_v56  ;;  %v6612_v6 = vand.u32 4294901760, %v4843_v8 }
 0x37d   : > { %4234 = vmatpush.msra.mxu2 %v4139_v35  ;;  %4337 = vmatpush.msrb.mxu3 %v4336_v42  ;;  %v4520_v35 = vand.u32 4294901760, %v4519_v63 }
 0x37e   : > { %4180 = vmatmul.f32.vlgmr.msrb.gmra.mxu2 %v4105_v20  ;;  %4265 = vmatmul.f32.vlgmr.msra.gmra.mxu3 %v6449_v26  ;;  %v4698_v20 = vand.u32 4294901760, %v4697_v31 }
 0x37f   : > { %4238 = vmatpush.msra.mxu2 %v4145_v52  ;;  %4343 = vmatpush.msrb.mxu3 %v4342_v39  ;;  %v4666_v52 = vld [vmem:[%s6808_s2 + $0xc8] sm:$0x3] }
 0x380   : > { %v4674_v18 = vsel %vm4672_vm4, %v4666_v52, 0 }
 0x381   : > { %4292 = vmatpush.msrb.mxu2 %v6259_v19  ;;  %4392 = vmatpush.msra.mxu3 %v6259_v19  ;;  %v4536_v19 = vand.u32 4294901760, %v6409_v3  ;;  %v4690_v0 = vand.u32 4294901760, %v4674_v18 }
 0x383   : > { %4294 = vmatpush.msrb.mxu2 %v6272_v60  ;;  %4394 = vmatpush.msra.mxu3 %v6272_v60  ;;  %v4531_v60 = vsub.f32 %v6381_v30, %v4530_v44  ;;  %v4537_v22 = vsub.f32 %v6409_v3, %v4536_v19  ;;  %v4718_v37 = vsub.f32 %v4674_v18, %v4690_v0 }
 0x384   : > { %4691 = vmatpush.msra.mxu0 %v4690_v0 }
 0x385   : > { %4296 = vmatpush.msrb.mxu2 %v6287_v34  ;;  %4396 = vmatpush.msra.mxu3 %v6287_v34  ;;  %v4526_v34 = vand.u32 4294901760, %v4525_v2  ;;  %v4532_v24 = vand.u32 4294901760, %v4531_v60  ;;  %v4538_v51 = vand.u32 4294901760, %v4537_v22  ;;  %v4840_v22 = vld [vmem:[%s6808_s2 + $0xf0] sm:$0xff] }
 0x386   : > { %4240 = vmatmul.f32.vlgmr.msra.gmra.mxu2 %v6449_v26  ;;  %4345 = vmatmul.f32.vlgmr.msrb.gmra.mxu3 %v6447_v32  ;;  %v4303_v32 = vand.u32 4294901760, %v4302_v4 }
 0x387   : > { %4298 = vmatpush.msrb.mxu2 %v6300_v57  ;;  %4398 = vmatpush.msra.mxu3 %v6300_v57  ;;  %v4719_v57 = vand.u32 4294901760, %v4718_v37 }
 0x388   : > { %4693 = vmatpush.msra.mxu0 %v4692_v23 }
 0x389   : > { %4363 = vmatpush.msra.mxu2 %v6269_v17  ;;  %4521 = vmatpush.msrb.mxu3 %v4520_v35  ;;  %v4720_v26 = vsub.f32 %v4718_v37, %v4719_v57  ;;  %v4726_v17 = vsub.f32 %v4724_v27, %v4725_v46 }
 0x38a   : > { %4802 = vmatpush.msrb.mxu0 %v4719_v57 }
 0x38b   : > { %4366 = vmatpush.msra.mxu2 %v6284_v38  ;;  %4527 = vmatpush.msrb.mxu3 %v4526_v34  ;;  %v4721_v41 = vand.u32 4294901760, %v4720_v26  ;;  %v4727_v38 = vand.u32 4294901760, %v4726_v17 }
 0x38c   : > { %4699 = vmatmul.f32.vlgmr.msra.gmra.mxu0 %v4698_v20 }
 0x38d   : > { %4369 = vmatpush.msra.mxu2 %v6297_v14  ;;  %4533 = vmatpush.msrb.mxu3 %v4532_v24  ;;  %v4498_v14 = vsub.f32 %v6488_v62, %v4497_v40  ;;  %v4845_v62 = vld [vmem:[%s6808_s2 + $0x118] sm:$0xff]  ;;  %v4899_v40 = vsub.f32 %v4846_v48, %v6602_v58 }
 0x38e   : > { %4304 = vmatmul.f32.vlgmr.msrb.gmra.mxu2 %v4303_v32  ;;  %4402 = vmatmul.f32.vlgmr.msra.gmra.mxu3 %v4301_v7  ;;  %v6615_v42 = vand.u32 4294901760, %v4845_v62  ;;  %v4841_v7 = vld [vmem:[%s6808_s2 + $0xf8] sm:$0xff] }
 0x38f   : > { %4372 = vmatpush.msra.mxu2 %v6310_v29  ;;  %4539 = vmatpush.msrb.mxu3 %v4538_v51  ;;  %v4499_v29 = vand.u32 4294901760, %v4498_v14  ;;  %v4900_v35 = vand.u32 4294901760, %v4899_v40  ;;  %v6640_v52 = vand.u32 4294901760, %v4841_v7 }
 0x390   : > { %4722 = vmatpush.msra.mxu1 %v4721_v41  ;;  %4806 = vmatpush.msrb.mxu0 %v4725_v46  ;;  %v6663_v46 = vand.u32 4294901760, %v4840_v22 }
 0x391   : > { %4488 = vmatpush.msrb.mxu2 %v6352_v45  ;;  %4648 = vmatpush.msra.mxu3 %v6352_v45 }
 0x392   : > { %4728 = vmatpush.msra.mxu1 %v4727_v38  ;;  %v4838_v38 = vld [vmem:[%s6808_s2 + $0xe0] sm:$0xff]  ;;  %v6679_v14 = vsub.f32 %v4840_v22, %v6663_v46 }
 0x393   : > { %4490 = vmatpush.msrb.mxu2 %v6359_v11  ;;  %4650 = vmatpush.msra.mxu3 %v6359_v11 }
 0x394   : > { %4730 = vmatmul.f32.vlgmr.msra.gmra.mxu1 %v4694_v53  ;;  %4808 = vmatmul.f32.vlgmr.msrb.gmra.mxu0 %v4694_v53 }
 0x395   : > { %4492 = vmatpush.msrb.mxu2 %v6371_v33  ;;  %4652 = vmatpush.msra.mxu3 %v6371_v33 }
 0x396   : > { %4375 = vmatmul.f32.vlgmr.msra.gmra.mxu2 %v6512_v54  ;;  %4541 = vmatmul.f32.vlgmr.msrb.gmra.mxu3 %v6480_v28  ;;  %v6625_v54 = vsub.f32 %v4843_v8, %v6612_v6 }
 0x397   : > { %4494 = vmatpush.msrb.mxu2 %v6397_v1  ;;  %4654 = vmatpush.msra.mxu3 %v6397_v1 }
 0x398   : > { %4827 = vmatpush.msrb.mxu1 %v4690_v0  ;;  %v5083_v60 = vand.u32 4294901760, %v6625_v54 }
 0x399   : > { %4617 = vmatpush.msra.mxu2 %v4518_v61  ;;  %4775 = vmatpush.msrb.mxu3 %v4690_v0  ;;  %v4842_v61 = vld [vmem:[%s6808_s2 + $0x100] sm:$0xff] }
 0x39a   : > { %4829 = vmatpush.msrb.mxu1 %v4692_v23  ;;  %v6627_v63 = vand.u32 4294901760, %v4842_v61 }
 0x39b   : > { %4621 = vmatpush.msra.mxu2 %v4524_v56  ;;  %4777 = vmatpush.msrb.mxu3 %v4692_v23  ;;  %v4844_v56 = vld [vmem:[%s6808_s2 + $0x110] sm:$0xff]  ;;  %v4901_v23 = vsub.f32 %v4899_v40, %v4900_v35 }
 0x39c   : > { %4831 = vmatmul.f32.vlgmr.msrb.gmra.mxu1 %v4694_v53  ;;  %v6643_v18 = vsub.f32 %v4842_v61, %v6627_v63  ;;  %v5084_v53 = vsub.f32 %v6625_v54, %v5083_v60 }
 0x39d   : > { %4625 = vmatpush.msra.mxu2 %v4530_v44  ;;  %4964 = vmatpush.msra.mxu1 %v6594_v15  ;;  %v6631_v44 = vsub.f32 %v4845_v62, %v6615_v42  ;;  %v4902_v57 = vand.u32 4294901760, %v4901_v23 }
 0x39e   : > { %4500 = vmatmul.f32.vlgmr.msrb.gmra.mxu2 %v4499_v29  ;;  %4656 = vmatmul.f32.vlgmr.msra.gmra.mxu3 %v6480_v28  ;;  %v5085_v51 = vand.u32 4294901760, %v5084_v53  ;;  %v6681_v29 = vand.u32 4294901760, %v4838_v38 }
 0x39f   : > { %4629 = vmatpush.msra.mxu2 %v4536_v19  ;;  %4966 = vmatpush.msra.mxu1 %v6602_v58  ;;  %v6633_v19 = vand.u32 4294901760, %v4844_v56  ;;  %v4906_v21 = vand.u32 4294901760, %v6631_v44 }
 0x3a1   : > { %4750 = vmatpush.msrb.mxu2 %v4718_v37  ;;  %4968 = vmatpush.msra.mxu1 %v6615_v42  ;;  %v4911_v50 = vsub.f32 %v4844_v56, %v6633_v19  ;;  %v4907_v24 = vsub.f32 %v6631_v44, %v4906_v21  ;;  %v5089_v37 = vand.u32 4294901760, %v6643_v18 }
 0x3a3   : > { %4753 = vmatpush.msrb.mxu2 %v4724_v27  ;;  %4970 = vmatpush.msra.mxu1 %v6633_v19  ;;  %v4912_v27 = vand.u32 4294901760, %v4911_v50  ;;  %v4908_v26 = vand.u32 4294901760, %v4907_v24  ;;  %v5090_v17 = vsub.f32 %v6643_v18, %v5089_v37 }
 0x3a5   : > { %v4913_v31 = vsub.f32 %v4911_v50, %v4912_v27  ;;  %5086 = vmatpush.msrb.mxu1 %v5085_v51 }
 0x3a6   : > { %4631 = vmatmul.f32.vlgmr.msra.gmra.mxu2 %v6480_v28  ;;  %4781 = vmatmul.f32.vlgmr.msrb.gmra.mxu3 %v4696_v59  ;;  %v4893_v28 = vsub.f32 %v4847_v43, %v6594_v15  ;;  %v6666_v59 = vsub.f32 %v4841_v7, %v6640_v52  ;;  %v4837_v43 = vld [vmem:[%s6808_s2 + $0xd8] sm:$0xff] }
 0x3a7   : > { %4864 = vmatpush.msra.mxu2 %v6594_v15 }
 0x3a8   : > { %4935 = vmatpush.msra.mxu0 %v4893_v28  ;;  %v4894_v39 = vand.u32 4294901760, %v4893_v28  ;;  %v5095_v20 = vand.u32 4294901760, %v6666_v59 }
 0x3a9   : > { %4866 = vmatpush.msra.mxu2 %v6602_v58 }
 0x3aa   : > { %4938 = vmatpush.msra.mxu0 %v4899_v40  ;;  %v4895_v2 = vsub.f32 %v4893_v28, %v4894_v39  ;;  %v5096_v48 = vsub.f32 %v6666_v59, %v5095_v20  ;;  %v6700_v28 = vsub.f32 %v4838_v38, %v6681_v29  ;;  %v4836_v40 = vld [vmem:[%s6808_s2 + $0xd0] sm:$0xff] }
 0x3ab   : > { %4868 = vmatpush.msra.mxu2 %v6615_v42  ;;  %v6717_v7 = vand.u32 4294901760, %v4836_v40 }
 0x3ac   : > { %4941 = vmatpush.msra.mxu0 %v6631_v44  ;;  %v4896_v0 = vand.u32 4294901760, %v4895_v2  ;;  %v5097_v61 = vand.u32 4294901760, %v5096_v48 }
 0x3ad   : > { %4870 = vmatpush.msra.mxu2 %v6633_v19 }
 0x3ae   : > { %4756 = vmatmul.f32.vlgmr.msrb.gmra.mxu2 %v4695_v55  ;;  %4897 = vmatpush.msra.mxu3 %v4896_v0  ;;  %v4839_v55 = vld [vmem:[%s6808_s2 + $0xe8] sm:$0xff] }
 0x3af   : > { %4944 = vmatpush.msra.mxu0 %v4911_v50  ;;  %4993 = vmatpush.msrb.mxu2 %v4894_v39  ;;  %v6671_v41 = vand.u32 4294901760, %v4839_v55  ;;  %v6729_v50 = vsub.f32 %v4836_v40, %v6717_v7 }
 0x3b0   : > { %4903 = vmatpush.msra.mxu3 %v4902_v57 }
 0x3b1   : > { %5049 = vmatpush.msrb.mxu0 %v6612_v6  ;;  %4997 = vmatpush.msrb.mxu2 %v4900_v35 }
 0x3b2   : > { %4909 = vmatpush.msra.mxu3 %v4908_v26 }
 0x3b3   : > { %5051 = vmatpush.msrb.mxu0 %v6627_v63  ;;  %5001 = vmatpush.msrb.mxu2 %v4906_v21 }
 0x3b5   : > { %5053 = vmatpush.msrb.mxu0 %v6640_v52  ;;  %5005 = vmatpush.msrb.mxu2 %v4912_v27 }
 0x3b7   : > { %5055 = vmatpush.msrb.mxu0 %v6663_v46 }
 0x3b9   : > { %5057 = vmatpush.msrb.mxu0 %v6671_v41 }
 0x3bb   : > { %5059 = vmatpush.msrb.mxu0 %v6681_v29 }
 0x3d9   : > { %v3963_v45 = vpop.f32.mrf.mxu3 }
 0x3e1   : > { %v3922_v11 = vpop.f32.mrf.mxu2  ;;  %v4020_v36 = vpop.f32.mrf.mxu3 }
 0x3e2   : > { %v3964_v5 = vadd.f32 %v3963_v45, %v3922_v11 }
 0x3e4   : > { %v6683_v45 = vpop.f32.mrf.mxu0  ;;  %v4461_v44 = vpop.f32.mrf.mxu1 }
 0x3e9   : > { %v3993_v33 = vpop.f32.mrf.mxu2  ;;  %v6577_v25 = vpop.f32.mrf.mxu3 }
 0x3ea   : > { %v3994_v47 = vadd.f32 %v3993_v33, %v3964_v5  ;;  %v4914_v33 = vand.u32 4294901760, %v4913_v31  ;;  %v6697_v5 = vand.u32 4294901760, %v4837_v43 }
 0x3ec   : > { %v4021_v49 = vadd.f32 %v4020_v36, %v3994_v47  ;;  %v5091_v36 = vand.u32 4294901760, %v5090_v17  ;;  %4915 = vmatpush.msra.mxu3 %v4914_v33  ;;  %5061 = vmatpush.msrb.mxu0 %v6697_v5 }
 0x3ee   : > { %5092 = vmatpush.msrb.mxu1 %v5091_v36  ;;  %5024 = vmatpush.msrb.mxu3 %v6594_v15 }
 0x3ef   : > { %5063 = vmatpush.msrb.mxu0 %v6717_v7 }
 0x3f0   : > { %5098 = vmatpush.msrb.mxu1 %v5097_v61  ;;  %5026 = vmatpush.msrb.mxu3 %v6602_v58 }
 0x3f1   : > { %v4053_v30 = vpop.f32.mrf.mxu2  ;;  %v6579_v1 = vpop.f32.mrf.mxu3 }
 0x3f2   : > { %v4054_v4 = vadd.f32 %v4053_v30, %v4021_v49  ;;  %v6687_v30 = vsub.f32 %v4839_v55, %v6671_v41  ;;  %5028 = vmatpush.msrb.mxu3 %v6615_v42 }
 0x3f4   : > { %v4079_v11 = vadd.f32 %v6577_v25, %v4054_v4  ;;  %v5101_v25 = vand.u32 4294901760, %v6679_v14  ;;  %v5107_v47 = vand.u32 4294901760, %v6687_v30  ;;  %v5125_v4 = vand.u32 4294901760, %v6729_v50  ;;  %5030 = vmatpush.msrb.mxu3 %v6633_v19  ;;  %v5383_v19 = vld [vmem:[%s6809_s3 + $0x3] ss:$0 sm:$0xff] }
 0x3f5   : > { %v4572_v23 = vpop.f32.mrf.mxu0 }
 0x3f6   : > { %v5102_v56 = vsub.f32 %v6679_v14, %v5101_v25  ;;  %v5108_v2 = vsub.f32 %v6687_v30, %v5107_v47  ;;  %v5126_v42 = vsub.f32 %v6729_v50, %v5125_v4 }
 0x3f7   : > { %v4599_v51 = vpop.f32.mrf.mxu1 }
 0x3f8   : > { %v5103_v49 = vand.u32 4294901760, %v5102_v56  ;;  %v5109_v15 = vand.u32 4294901760, %v5108_v2  ;;  %v5127_v26 = vand.u32 4294901760, %v5126_v42 }
 0x3f9   : > { %v6581_v9 = vpop.f32.mrf.mxu2  ;;  %v6583_v16 = vpop.f32.mrf.mxu3 }
 0x3fa   : > { %v4111_v8 = vadd.f32 %v6581_v9, %v4079_v11  ;;  %v5113_v9 = vand.u32 4294901760, %v6700_v28  ;;  %5104 = vmatpush.msrb.mxu1 %v5103_v49 }
 0x3fc   : > { %v4152_v21 = vadd.f32 %v6579_v1, %v4111_v8  ;;  %5110 = vmatpush.msrb.mxu1 %v5109_v15 }
 0x401   : > { %v6585_v3 = vpop.f32.mrf.mxu2  ;;  %v6587_v10 = vpop.f32.mrf.mxu3 }
 0x402   : > { %v4182_v24 = vadd.f32 %v6585_v3, %v4152_v21 }
 0x404   : > { %v4209_v3 = vadd.f32 %v6583_v16, %v4182_v24 }
 0x409   : > { %v6592_v13 = vpop.f32.mrf.mxu2  ;;  %v6599_v12 = vpop.f32.mrf.mxu3 }
 0x40a   : > { %v4242_v31 = vadd.f32 %v6592_v13, %v4209_v3  ;;  %v4700_v38 = vpop.f32.mrf.mxu0  ;;  %v5382_v13 = vld [vmem:[%s6809_s3 + $0x2] ss:$0 sm:$0xff] }
 0x40b   : > { %v4701_v16 = vadd.f32 %v5383_v19, %v4700_v38 }
 0x40c   : > { %v4267_v48 = vadd.f32 %v6587_v10, %v4242_v31 }
 0x411   : > { %v4305_v34 = vpop.f32.mrf.mxu2  ;;  %v4403_v32 = vpop.f32.mrf.mxu3 }
 0x412   : > { %v4347_v39 = vadd.f32 %v6599_v12, %v4305_v34  ;;  %v6720_v12 = vsub.f32 %v4837_v43, %v6697_v5  ;;  %v5114_v34 = vsub.f32 %v6700_v28, %v5113_v9 }
 0x414   : > { %v5119_v0 = vand.u32 4294901760, %v6720_v12  ;;  %v5115_v22 = vand.u32 4294901760, %v5114_v34  ;;  %v4809_v34 = vpop.f32.mrf.mxu0 }
 0x416   : > { %v5120_v58 = vsub.f32 %v6720_v12, %v5119_v0  ;;  %5116 = vmatpush.msrb.mxu1 %v5115_v22 }
 0x418   : > { %v5121_v55 = vand.u32 4294901760, %v5120_v58 }
 0x419   : > { %v4376_v62 = vpop.f32.mrf.mxu2  ;;  %v4542_v53 = vpop.f32.mrf.mxu3 }
 0x41a   : > { %v4377_v35 = vadd.f32 %v4376_v62, %v4347_v39  ;;  %5122 = vmatpush.msrb.mxu1 %v5121_v55  ;;  %v4731_v62 = vpop.f32.mrf.mxu1 }
 0x41b   : > { %v4732_v61 = vadd.f32 %v4731_v62, %v4701_v16 }
 0x41c   : > { %v4404_v27 = vadd.f32 %v4403_v32, %v4377_v35  ;;  %5128 = vmatpush.msrb.mxu1 %v5127_v26 }
 0x41e   : > { %v4437_v32 = vadd.f32 %v6683_v45, %v4404_v27 }
 0x420   : > { %v4462_v11 = vadd.f32 %v4461_v44, %v4437_v32 }
 0x421   : > { %v4501_v1 = vpop.f32.mrf.mxu2  ;;  %v4657_v33 = vpop.f32.mrf.mxu3 }
 0x422   : > { %v4543_v57 = vadd.f32 %v4542_v53, %v4501_v1  ;;  %v4464_v45 = vadd.f32 %v4462_v11, %v4267_v48  ;;  %v4832_v21 = vpop.f32.mrf.mxu1 }
 0x424   : > { %v4573_v17 = vadd.f32 %v4572_v23, %v4543_v57 }
 0x426   : > { %v4600_v36 = vadd.f32 %v4599_v51, %v4573_v17 }
 0x429   : > { %v4632_v43 = vpop.f32.mrf.mxu2  ;;  %v4782_v35 = vpop.f32.mrf.mxu3 }
 0x42a   : > { %v4633_v8 = vadd.f32 %v4632_v43, %v4600_v36 }
 0x42c   : > { %v4658_v40 = vadd.f32 %v4657_v33, %v4633_v8 }
 0x42e   : > { %v4660_v39 = vadd.f32 %v4658_v40, %v4464_v45 }
 0x430   : > { %v4662_v56 = vadd.f32 %v5382_v13, %v4660_v39 }
 0x431   : > { %v4757_v2 = vpop.f32.mrf.mxu2 }
 0x432   : > { %v4663_v44 = vmax.f32 %v4662_v56, 0.0  ;;  %v4758_v49 = vadd.f32 %v4757_v2, %v4732_v61 }
 0x434   : > { %v4783_v15 = vadd.f32 %v4782_v35, %v4758_v49  ;;  %v5038_v10 = vsel %vm5036_vm6, %v4663_v44, 0 }
 0x435   : > { %v5064_v23 = vand.u32 4294901760, %v5038_v10 }
 0x436   : > { %v4810_v22 = vadd.f32 %v4809_v34, %v4783_v15 }
 0x437   : > { %v5065_v24 = vsub.f32 %v5038_v10, %v5064_v23 }
 0x438   : > { %v4833_v53 = vadd.f32 %v4832_v21, %v4810_v22 }
 0x439   : > { %v5066_v42 = vand.u32 4294901760, %v5065_v24 }
 0x43a   : > { %v4835_v58 = vmax.f32 %v4833_v53, 0.0 }
 0x43b   : > { %v5067_v26 = vsub.f32 %v5065_v24, %v5066_v42 }
 0x43c   : > { %v4849_v27 = vsel %vm3870_vm3, %v4835_v58, 0 }
 0x43d   : > { %v4871_v1 = vand.u32 4294901760, %v4849_v27 }
 0x43f   : > { %v4872_v55 = vsub.f32 %v4849_v27, %v4871_v1  ;;  %4917 = vmatmul.f32.vlgmr.msra.gmra.mxu3 %v4871_v1 }
 0x440   : > { %5181 = vmatpush.msra.mxu3 %v6612_v6 }
 0x441   : > { %v4873_v57 = vand.u32 4294901760, %v4872_v55  ;;  %4947 = vmatmul.f32.vlgmr.msra.gmra.mxu0 %v4872_v55 }
 0x442   : > { %5183 = vmatpush.msra.mxu3 %v6627_v63  ;;  %5214 = vmatpush.msra.mxu0 %v5083_v60  ;;  %v5068_v60 = vand.u32 4294901760, %v5067_v26 }
 0x443   : > { %v4874_v51 = vsub.f32 %v4872_v55, %v4873_v57  ;;  %4974 = vmatmul.f32.vlgmr.msra.gmra.mxu1 %v4873_v57 }
 0x444   : > { %5185 = vmatpush.msra.mxu3 %v6640_v52  ;;  %5218 = vmatpush.msra.mxu0 %v5089_v37 }
 0x445   : > { %v4875_v3 = vand.u32 4294901760, %v4874_v51  ;;  %5257 = vmatpush.msra.mxu1 %v6612_v6 }
 0x446   : > { %5187 = vmatpush.msra.mxu3 %v6663_v46  ;;  %5222 = vmatpush.msra.mxu0 %v5095_v20 }
 0x447   : > { %5259 = vmatpush.msra.mxu1 %v6627_v63  ;;  %4876 = vmatmul.f32.vlgmr.msra.gmra.mxu2 %v4875_v3 }
 0x448   : > { %5032 = vmatmul.f32.vlgmr.msrb.gmra.mxu3 %v4871_v1  ;;  %5144 = vmatpush.msra.mxu2 %v6625_v54 }
 0x449   : > { %5189 = vmatpush.msra.mxu3 %v6671_v41  ;;  %5226 = vmatpush.msra.mxu0 %v5101_v25 }
 0x44a   : > { %5261 = vmatpush.msra.mxu1 %v6640_v52  ;;  %5069 = vmatmul.f32.vlgmr.msrb.gmra.mxu0 %v5068_v60 }
 0x44b   : > { %5147 = vmatpush.msra.mxu2 %v6643_v18  ;;  %5191 = vmatpush.msra.mxu3 %v6681_v29 }
 0x44c   : > { %5230 = vmatpush.msra.mxu0 %v5107_v47  ;;  %5263 = vmatpush.msra.mxu1 %v6663_v46 }
 0x44d   : > { %5130 = vmatmul.f32.vlgmr.msrb.gmra.mxu1 %v5064_v23  ;;  %5150 = vmatpush.msra.mxu2 %v6666_v59 }
 0x44e   : > { %5193 = vmatpush.msra.mxu3 %v6697_v5  ;;  %5234 = vmatpush.msra.mxu0 %v5113_v9 }
 0x44f   : > { %5265 = vmatpush.msra.mxu1 %v6671_v41  ;;  %5153 = vmatpush.msra.mxu2 %v6679_v14 }
 0x450   : > { %5195 = vmatpush.msra.mxu3 %v6717_v7  ;;  %5238 = vmatpush.msra.mxu0 %v5119_v0 }
 0x451   : > { %5267 = vmatpush.msra.mxu1 %v6681_v29  ;;  %5007 = vmatmul.f32.vlgmr.msrb.gmra.mxu2 %v4871_v1 }
 0x452   : > { %5199 = vmatmul.f32.vlgmr.msra.gmra.mxu3 %v5066_v42  ;;  %5156 = vmatpush.msra.mxu2 %v6687_v30 }
 0x453   : > { %5242 = vmatpush.msra.mxu0 %v5125_v4  ;;  %5269 = vmatpush.msra.mxu1 %v6697_v5 }
 0x454   : > { %5244 = vmatmul.f32.vlgmr.msra.gmra.mxu0 %v5064_v23  ;;  %5159 = vmatpush.msra.mxu2 %v6700_v28 }
 0x455   : > { %5271 = vmatpush.msra.mxu1 %v6717_v7 }
 0x456   : > { %5273 = vmatmul.f32.vlgmr.msra.gmra.mxu1 %v5064_v23  ;;  %5162 = vmatpush.msra.mxu2 %v6720_v12 }
 0x458   : > { %5165 = vmatpush.msra.mxu2 %v6729_v50  ;;  %v5384_v50 = vld [vmem:[%s6809_s3 + $0x4] ss:$0 sm:$0xff] }
 0x459   : > { %5168 = vmatmul.f32.vlgmr.msra.gmra.mxu2 %v5065_v24 }
 0x4be   : > { %v4948_v52 = vpop.f32.mrf.mxu0 }
 0x4c0   : > { %v4975_v18 = vpop.f32.mrf.mxu1 }
 0x4c2   : > { %v4918_v6 = vpop.f32.mrf.mxu3 }
 0x4c7   : > { %v5070_v14 = vpop.f32.mrf.mxu0 }
 0x4ca   : > { %v4877_v54 = vpop.f32.mrf.mxu2  ;;  %v5131_v30 = vpop.f32.mrf.mxu1 }
 0x4cb   : > { %v4919_v63 = vadd.f32 %v4918_v6, %v4877_v54  ;;  %v5033_v59 = vpop.f32.mrf.mxu3 }
 0x4cd   : > { %v4949_v37 = vadd.f32 %v4948_v52, %v4919_v63 }
 0x4cf   : > { %v4976_v46 = vadd.f32 %v4975_v18, %v4949_v37 }
 0x4d1   : > { %v5245_v12 = vpop.f32.mrf.mxu0 }
 0x4d3   : > { %v5274_v4 = vpop.f32.mrf.mxu1 }
 0x4d4   : > { %v5008_v41 = vpop.f32.mrf.mxu2 }
 0x4d5   : > { %v5009_v20 = vadd.f32 %v5008_v41, %v4976_v46  ;;  %v5200_v9 = vpop.f32.mrf.mxu3 }
 0x4d7   : > { %v5034_v29 = vadd.f32 %v5033_v59, %v5009_v20 }
 0x4d9   : > { %v5071_v25 = vadd.f32 %v5070_v14, %v5034_v29 }
 0x4db   : > { %v5132_v5 = vadd.f32 %v5131_v30, %v5071_v25 }
 0x4dc   : > { %v5169_v28 = vpop.f32.mrf.mxu2 }
 0x4dd   : > { %v5170_v47 = vadd.f32 %v5169_v28, %v5132_v5 }
 0x4df   : > { %v5201_v7 = vadd.f32 %v5200_v9, %v5170_v47 }
 0x4e1   : > { %v5246_v0 = vadd.f32 %v5245_v12, %v5201_v7 }
 0x4e3   : > { %v5275_v32 = vadd.f32 %v5274_v4, %v5246_v0 }
 0x4e5   : > { %v5278_v17 = vadd.f32 %v5384_v50, %v5275_v32 }
 0x4e7   : > { %5280 = vst.msk [vmem:[%s209_s29] sm:$0xff] %vm5279_vm7, %v5278_v17 }
 0x4e8 PF: > { %s14_s15 = sadd.s32 1, %s5391_s15  }
 0x4e9   : > { %p11_p4 = scmp.ge.s32.totalorder %s14_s15, 6  }
 0x4eb   :  { %13 = sbr.rel (!%p11_p4) target bundleno = 1 (0x1), region = 69 }

</bundles_post_ra>
